<compile_context>
chip_gen: v7x
topology: tpu7x:2x2x1
jax: 0.10.0
libtpu: 0.0.40
codegen_flags: <defaults>
</compile_context>

<pallas_src>
import math
from functools import partial

import jax
import jax.numpy as jnp
from jax.experimental import pallas as pl
from jax.experimental.pallas import tpu as pltpu

BN_EPS = 1e-5
VMEM_LIMIT = 32 * 1024 * 1024   # explicit scoped-VMEM budget (safe on v5e/v6e/v7x)


def _round_up(x: int, m: int) -> int:
    return ((x + m - 1) // m) * m


# ----------------------------------------------------------------------------
# Fused PointNet block kernel (one grid step == one batch element):
#   [optional x @ T transform] -> per-point MLP (emit one per-point output if
#   requested) -> masked max over points -> FC MLP -> (1, W) vector output.
# All weights are passed with constant index_maps so they stay VMEM-resident.
# ----------------------------------------------------------------------------
def _make_pointnet_block_kernel(*, n_points, has_transform, point_relus,
                                head_relus, emit_point_idx):
    n_point = len(point_relus)
    n_head = len(head_relus)

    def kernel(*refs):
        i = 0
        x_ref = refs[i]; i += 1
        t_ref = None
        if has_transform:
            t_ref = refs[i]; i += 1
        point_layers = [(refs[i + 2 * l], refs[i + 2 * l + 1]) for l in range(n_point)]
        i += 2 * n_point
        head_layers = [(refs[i + 2 * l], refs[i + 2 * l + 1]) for l in range(n_head)]
        i += 2 * n_head
        vec_ref = refs[i]; i += 1
        point_out_ref = refs[i] if emit_point_idx is not None else None

        # ---- per-point stack (bf16 MXU inputs, f32 accumulation) ----
        h = x_ref[...]                                        # (Np, Cp) bf16
        if has_transform:
            # PointNet input / feature transform: x @ T (fused, never hits HBM)
            h = jnp.dot(h, t_ref[...], preferred_element_type=jnp.float32)
            h = h.astype(jnp.bfloat16)
        y = None
        for l, (w_ref, s_ref) in enumerate(point_layers):
            y = jnp.dot(h, w_ref[...],
                        preferred_element_type=jnp.float32) + s_ref[...]
            if point_relus[l]:
                y = jnp.maximum(y, 0.0)
            if emit_point_idx == l:
                point_out_ref[...] = y.astype(point_out_ref.dtype)
            h = y.astype(jnp.bfloat16)

        # ---- fused max-pool over points (epilogue of the producing matmul) ----
        n_rows = y.shape[0]
        if n_rows > n_points:                                 # mask padded point rows
            rows = jax.lax.broadcasted_iota(jnp.int32, (n_rows, 1), 0)
            y = jnp.where(rows < n_points, y, -jnp.inf)
        g = jnp.max(y, axis=0, keepdims=True)                 # (1, C) f32
        g = jnp.broadcast_to(g, (8, g.shape[1]))              # MXU-friendly LHS rows

        # ---- post-pool FC stack ----
        for l, (w_ref, s_ref) in enumerate(head_layers):
            g = jnp.dot(g.astype(jnp.bfloat16), w_ref[...],
                        preferred_element_type=jnp.float32) + s_ref[...]
            if head_relus[l]:
                g = jnp.maximum(g, 0.0)
        vec_ref[...] = g[0:1, :].astype(vec_ref.dtype)

    return kernel


def pointnet_block(x_pad, weights, *, n_points, point_relus, head_relus,
                   transform=None, emit_point_idx=None, point_out_width=None):
    """x_pad: (B, Np, Cp) bf16 (padded); transform: (B, Cp, Cp) bf16 or None;
    weights: flat [w0, s0, w1, s1, ...] already BN-folded / padded / cast."""
    B, n_rows, cp = x_pad.shape
    assert len(weights) == 2 * (len(point_relus) + len(head_relus))
    vec_width = weights[-1].shape[1]        # padded width of last head layer

    args = [x_pad]
    in_specs = [pl.BlockSpec((None, n_rows, cp), lambda b: (b, 0, 0))]
    if transform is not None:
        args.append(transform)
        in_specs.append(pl.BlockSpec((None, cp, cp), lambda b: (b, 0, 0)))
    for w in weights:                        # constant index -> fetched once, VMEM-resident
        args.append(w)
        in_specs.append(pl.BlockSpec(w.shape, lambda b: (0, 0)))

    out_shapes = [jax.ShapeDtypeStruct((B, 1, vec_width), jnp.float32)]
    out_specs = [pl.BlockSpec((None, 1, vec_width), lambda b: (b, 0, 0))]
    if emit_point_idx is not None:
        out_shapes.append(jax.ShapeDtypeStruct((B, n_rows, point_out_width),
                                               jnp.bfloat16))
        out_specs.append(pl.BlockSpec((None, n_rows, point_out_width),
                                      lambda b: (b, 0, 0)))

    kernel = _make_pointnet_block_kernel(
        n_points=n_points, has_transform=transform is not None,
        point_relus=tuple(point_relus), head_relus=tuple(head_relus),
        emit_point_idx=emit_point_idx)

    outs = pl.pallas_call(
        kernel,
        grid=(B,),
        in_specs=in_specs,
        out_specs=tuple(out_specs),
        out_shape=tuple(out_shapes),
        compiler_params=pltpu.CompilerParams(
            dimension_semantics=("parallel",),      # B>=2 -> both TCs on v7x
            vmem_limit_bytes=VMEM_LIMIT),
    )(*args)
    if not isinstance(outs, (tuple, list)):
        outs = (outs,)
    return tuple(outs)


# ----------------------------------------------------------------------------
# Eval-mode BatchNorm folding + one-time weight padding / casting (outside jit)
# ----------------------------------------------------------------------------
def fold_bn(w, b, bn):
    if bn is None:
        return w, b
    scale = bn["gamma"] * jax.lax.rsqrt(bn["var"] + BN_EPS)
    return w * scale[None, :], bn["beta"] + (b - bn["mean"]) * scale


def _pad_layer(w, s):
    K, N = w.shape
    kp, np_ = _round_up(K, 128), _round_up(N, 128)
    wp = jnp.pad(w, ((0, kp - K), (0, np_ - N))).astype(jnp.bfloat16)
    sp = jnp.pad(s, (0, np_ - N)).reshape(1, np_).astype(jnp.float32)
    return wp, sp


def prepare_params(params):
    """Fold eval-mode BN into the weights and pre-pad/cast everything once so
    the jitted forward does no per-layer wrapper pads or casts."""
    def prep(layers):
        flat = []
        for (w, b, bn) in layers:
            wf, sf = fold_bn(w, b, bn)
            flat.extend(_pad_layer(wf, sf))
        return flat

    feat = params["feat"]
    stn, fstn = feat["stn"], feat["fstn"]
    return {
        "stn": prep(stn["convs"] + stn["fcs"]),
        "mid": prep([feat["conv1"]] + fstn["convs"] + fstn["fcs"]),
        "tail": prep([feat["conv2"], feat["conv3"],
                      params["fc1"], params["fc2"], params["fc3"]]),
    }


# ----------------------------------------------------------------------------
# Forward: 3 pallas_calls total (channels-last everywhere).
# ----------------------------------------------------------------------------
def pointnet_rel_classifier_forward(prep, edges, feat_ind1, feat_ind2, ls):
    B = edges.shape[0]
    xyz1 = edges[:, feat_ind1].reshape(B, -1, 3)
    xyz2 = edges[:, feat_ind2].reshape(B, -1, 3)
    # torch permutes to (B, 3, N) for Conv1d; channels-last here is equivalent.
    pts = jnp.concatenate([xyz1, xyz2], axis=1)                  # (B, N, 3)
    N = pts.shape[1]
    n_rows, cp = _round_up(N, 8), 128
    pts_pad = jnp.pad(pts, ((0, 0), (0, n_rows - N), (0, cp - 3))).astype(jnp.bfloat16)

    # ---- kernel 1: input STN (conv MLP -> max-pool -> FC MLP -> 3x3) ----
    (t1,) = pointnet_block(pts_pad, prep["stn"], n_points=N,
                           point_relus=(True, True, True),
                           head_relus=(True, True, False))
    T1 = t1[:, 0, :9].reshape(B, 3, 3) + jnp.eye(3, dtype=jnp.float32)
    T1p = jnp.pad(T1, ((0, 0), (0, cp - 3), (0, cp - 3))).astype(jnp.bfloat16)

    # ---- kernel 2: (x @ T1) -> conv1 -> feature STN (ls0 x ls0) ----
    ls0 = ls[0]
    ls0p = _round_up(ls0, 128)
    t2, h1 = pointnet_block(pts_pad, prep["mid"], n_points=N,
                            transform=T1p,
                            point_relus=(True, True, True, True),
                            head_relus=(True, True, False),
                            emit_point_idx=0, point_out_width=ls0p)
    T2 = t2[:, 0, :ls0 * ls0].reshape(B, ls0, ls0) + jnp.eye(ls0, dtype=jnp.float32)
    T2p = jnp.pad(T2, ((0, 0), (0, ls0p - ls0), (0, ls0p - ls0))).astype(jnp.bfloat16)

    # ---- kernel 3: (h1 @ T2) -> conv2 -> conv3 -> global max -> classifier ----
    (dec,) = pointnet_block(h1, prep["tail"], n_points=N,
                            transform=T2p,
                            point_relus=(True, False),
                            head_relus=(True, True, False))
    # TODO(synk): replace_graph(graph, {'edges': decoded}) is framework glue.
    return dec[:, 0, :1]


# ----------------------------------------------------------------------------
# Precision-matched pure-JAX reference (same bf16-input / f32-accum policy).
# ----------------------------------------------------------------------------
def _ref_dense(h, w, b, bn, relu):
    wf, sf = fold_bn(w, b, bn)
    y = jnp.dot(h.astype(jnp.bfloat16), wf.astype(jnp.bfloat16),
                preferred_element_type=jnp.float32) + sf
    return jnp.maximum(y, 0.0) if relu else y


def _ref_stn(p, x, B, N, k):
    h = x.reshape(B * N, -1)
    for (w, b, bn) in p["convs"]:
        h = _ref_dense(h, w, b, bn, True)
    g = jnp.max(h.reshape(B, N, -1), axis=1)
    for li, (w, b, bn) in enumerate(p["fcs"]):
        g = _ref_dense(g, w, b, bn, li < 2)
    return g.reshape(B, k, k) + jnp.eye(k, dtype=jnp.float32)


def reference_forward(params, edges, feat_ind1, feat_ind2, ls):
    B = edges.shape[0]
    xyz1 = edges[:, feat_ind1].reshape(B, -1, 3)
    xyz2 = edges[:, feat_ind2].reshape(B, -1, 3)
    pts = jnp.concatenate([xyz1, xyz2], axis=1)
    N = pts.shape[1]
    feat = params["feat"]
    T1 = _ref_stn(feat["stn"], pts, B, N, 3)
    y = jnp.einsum("bnc,bcd->bnd", pts.astype(jnp.bfloat16), T1.astype(jnp.bfloat16),
                   preferred_element_type=jnp.float32)
    h1 = _ref_dense(y.reshape(B * N, -1), *feat["conv1"], True)
    T2 = _ref_stn(feat["fstn"], h1, B, N, ls[0])
    y2 = jnp.einsum("bnc,bcd->bnd", h1.reshape(B, N, -1).astype(jnp.bfloat16),
                    T2.astype(jnp.bfloat16), preferred_element_type=jnp.float32)
    h2 = _ref_dense(y2.reshape(B * N, -1), *feat["conv2"], True)
    h3 = _ref_dense(h2, *feat["conv3"], False)
    g = jnp.max(h3.reshape(B, N, -1), axis=1)
    g = _ref_dense(g, *params["fc1"], True)
    g = _ref_dense(g, *params["fc2"], True)      # dropout is identity in eval
    return _ref_dense(g, *params["fc3"], False)


# ----------------------------------------------------------------------------
# Deterministic parameter init (mirrors apply_init: weights via init_fn -> here
# scaled normal; biases U(-1,1); BN gamma=1, beta=0, running mean=0, var=1).
# Weights are stored directly in (in, out) matmul form.
# ----------------------------------------------------------------------------
def _init_bn(c):
    return dict(gamma=jnp.ones((c,), jnp.float32),
                beta=jnp.zeros((c,), jnp.float32),
                mean=jnp.zeros((c,), jnp.float32),
                var=jnp.ones((c,), jnp.float32))


def _init_linear(key, fan_in, fan_out):
    kw, kb = jax.random.split(key)
    w = jax.random.normal(kw, (fan_in, fan_out), jnp.float32) / math.sqrt(fan_in)
    b = jax.random.uniform(kb, (fan_out,), jnp.float32, minval=-1.0, maxval=1.0)
    return w, b


def _init_stn(key, k, ls):
    # TODO(synk): canonical STN uses fixed 512/256 FC widths; parameterized by
    # pointnet_ls_list here to match the repo-style encoder.
    ks = jax.random.split(key, 6)
    convs = [(*_init_linear(ks[0], k, ls[0]), _init_bn(ls[0])),
             (*_init_linear(ks[1], ls[0], ls[1]), _init_bn(ls[1])),
             (*_init_linear(ks[2], ls[1], ls[2]), _init_bn(ls[2]))]
    fcs = [(*_init_linear(ks[3], ls[2], ls[1]), _init_bn(ls[1])),
           (*_init_linear(ks[4], ls[1], ls[0]), _init_bn(ls[0])),
           (*_init_linear(ks[5], ls[0], k * k), None)]
    return {"convs": convs, "fcs": fcs}


def init_params(key, ls, channel=3):
    ks = jax.random.split(key, 8)
    feat = {
        "stn": _init_stn(ks[0], channel, ls),
        "fstn": _init_stn(ks[1], ls[0], ls),
        "conv1": (*_init_linear(ks[2], channel, ls[0]), _init_bn(ls[0])),
        "conv2": (*_init_linear(ks[3], ls[0], ls[1]), _init_bn(ls[1])),
        "conv3": (*_init_linear(ks[4], ls[1], ls[2]), _init_bn(ls[2])),
    }
    return {
        "feat": feat,
        "fc1": (*_init_linear(ks[5], ls[2], ls[1]), _init_bn(ls[1])),
        "fc2": (*_init_linear(ks[6], ls[1], ls[0]), _init_bn(ls[0])),
        "fc3": (*_init_linear(ks[7], ls[0], 1), None),
    }


if __name__ == "__main__":
    key = jax.random.PRNGKey(0)
    B, N1, N2 = 2, 16, 16                 # 2 edges, 16 points per object
    pointnet_ls_list = (64, 128, 256)     # small but structurally faithful
    n_extra = 8
    F_total = 3 * (N1 + N2) + n_extra     # 104 edge features

    k_edges, k_params = jax.random.split(key)
    edges = jax.random.normal(k_edges, (B, F_total), jnp.float32)
    feat_ind1 = jnp.arange(0, 3 * N1)                  # self.feat_ind1
    feat_ind2 = jnp.arange(3 * N1, 3 * (N1 + N2))      # self.feat_ind2
    params = init_params(k_params, pointnet_ls_list)
    prep = prepare_params(params)          # fold BN + pad/cast once, outside jit

    fwd = jax.jit(partial(pointnet_rel_classifier_forward,
                          feat_ind1=feat_ind1, feat_ind2=feat_ind2,
                          ls=pointnet_ls_list))
    decoded = jax.block_until_ready(fwd(prep, edges))
    assert decoded.shape == (B, 1) and decoded.dtype == jnp.float32
    assert bool(jnp.all(jnp.isfinite(decoded)))

    ref = reference_forward(params, edges, feat_ind1, feat_ind2, pointnet_ls_list)
    assert bool(jnp.allclose(decoded, ref, rtol=1e-1, atol=1e-1))
    print("KERNEL_OK")
</pallas_src>

<mosaic_0001>
module attributes {stable_mosaic.version = 11 : i64} {
  func.func @kernel(%arg0: i32, %arg1: memref<1x32x128xbf16, #tpu.memory_space<vmem>>, %arg2: memref<128x128xbf16, #tpu.memory_space<vmem>>, %arg3: memref<1x128xf32, #tpu.memory_space<vmem>>, %arg4: memref<128x128xbf16, #tpu.memory_space<vmem>>, %arg5: memref<1x128xf32, #tpu.memory_space<vmem>>, %arg6: memref<128x256xbf16, #tpu.memory_space<vmem>>, %arg7: memref<1x256xf32, #tpu.memory_space<vmem>>, %arg8: memref<256x128xbf16, #tpu.memory_space<vmem>>, %arg9: memref<1x128xf32, #tpu.memory_space<vmem>>, %arg10: memref<128x128xbf16, #tpu.memory_space<vmem>>, %arg11: memref<1x128xf32, #tpu.memory_space<vmem>>, %arg12: memref<128x128xbf16, #tpu.memory_space<vmem>>, %arg13: memref<1x128xf32, #tpu.memory_space<vmem>>, %arg14: memref<1x1x128xf32, #tpu.memory_space<vmem>>) attributes {dimension_semantics = [#tpu.dimension_semantics<parallel>], iteration_bounds = array<i64: 2>, scalar_prefetch = 0 : i64, scratch_operands = 0 : i64, tpu.core_type = #tpu.core_type<tc>, window_params = [{transform_indices = @transform_0, window_bounds = array<i64: 1, 32, 128>}, {pipeline_mode = #tpu.pipeline_mode<synchronous>, transform_indices = @transform_1, window_bounds = array<i64: 128, 128>}, {pipeline_mode = #tpu.pipeline_mode<synchronous>, transform_indices = @transform_2, window_bounds = array<i64: 1, 128>}, {pipeline_mode = #tpu.pipeline_mode<synchronous>, transform_indices = @transform_3, window_bounds = array<i64: 128, 128>}, {pipeline_mode = #tpu.pipeline_mode<synchronous>, transform_indices = @transform_4, window_bounds = array<i64: 1, 128>}, {pipeline_mode = #tpu.pipeline_mode<synchronous>, transform_indices = @transform_5, window_bounds = array<i64: 128, 256>}, {pipeline_mode = #tpu.pipeline_mode<synchronous>, transform_indices = @transform_6, window_bounds = array<i64: 1, 256>}, {pipeline_mode = #tpu.pipeline_mode<synchronous>, transform_indices = @transform_7, window_bounds = array<i64: 256, 128>}, {pipeline_mode = #tpu.pipeline_mode<synchronous>, transform_indices = @transform_8, window_bounds = array<i64: 1, 128>}, {pipeline_mode = #tpu.pipeline_mode<synchronous>, transform_indices = @transform_9, window_bounds = array<i64: 128, 128>}, {pipeline_mode = #tpu.pipeline_mode<synchronous>, transform_indices = @transform_10, window_bounds = array<i64: 1, 128>}, {pipeline_mode = #tpu.pipeline_mode<synchronous>, transform_indices = @transform_11, window_bounds = array<i64: 128, 128>}, {pipeline_mode = #tpu.pipeline_mode<synchronous>, transform_indices = @transform_12, window_bounds = array<i64: 1, 128>}, {transform_indices = @transform_13, window_bounds = array<i64: 1, 1, 128>}]} {
    %c0 = arith.constant 0 : index
    %c0_0 = arith.constant 0 : index
    %c0_1 = arith.constant 0 : index
    %0 = vector.load %arg1[%c0, %c0_0, %c0_1] : memref<1x32x128xbf16, #tpu.memory_space<vmem>>, vector<1x32x128xbf16>
    %1 = vector.shape_cast %0 : vector<1x32x128xbf16> to vector<32x128xbf16>
    %c0_2 = arith.constant 0 : index
    %c0_3 = arith.constant 0 : index
    %2 = vector.load %arg2[%c0_2, %c0_3] : memref<128x128xbf16, #tpu.memory_space<vmem>>, vector<128x128xbf16>
    %cst = arith.constant dense<0.000000e+00> : vector<32x128xf32>
    %3 = tpu.matmul %1, %2, %cst {dimension_numbers = #tpu.dot_dimension_numbers<[1], [0], [0], [1], [0, 0, 1, 1], [], []>} : vector<32x128xbf16>, vector<128x128xbf16>, vector<32x128xf32> -> vector<32x128xf32>
    %c0_4 = arith.constant 0 : index
    %c0_5 = arith.constant 0 : index
    %4 = vector.load %arg3[%c0_4, %c0_5] : memref<1x128xf32, #tpu.memory_space<vmem>>, vector<1x128xf32>
    %5 = vector.broadcast %4 : vector<1x128xf32> to vector<32x128xf32>
    %6 = arith.addf %3, %5 : vector<32x128xf32>
    %cst_6 = arith.constant 0.000000e+00 : f32
    %7 = vector.broadcast %cst_6 : f32 to vector<32x128xf32>
    %8 = arith.maximumf %6, %7 : vector<32x128xf32>
    %9 = arith.truncf %8 : vector<32x128xf32> to vector<32x128xbf16>
    %c0_7 = arith.constant 0 : index
    %c0_8 = arith.constant 0 : index
    %10 = vector.load %arg4[%c0_7, %c0_8] : memref<128x128xbf16, #tpu.memory_space<vmem>>, vector<128x128xbf16>
    %cst_9 = arith.constant dense<0.000000e+00> : vector<32x128xf32>
    %11 = tpu.matmul %9, %10, %cst_9 {dimension_numbers = #tpu.dot_dimension_numbers<[1], [0], [0], [1], [0, 0, 1, 1], [], []>} : vector<32x128xbf16>, vector<128x128xbf16>, vector<32x128xf32> -> vector<32x128xf32>
    %c0_10 = arith.constant 0 : index
    %c0_11 = arith.constant 0 : index
    %12 = vector.load %arg5[%c0_10, %c0_11] : memref<1x128xf32, #tpu.memory_space<vmem>>, vector<1x128xf32>
    %13 = vector.broadcast %12 : vector<1x128xf32> to vector<32x128xf32>
    %14 = arith.addf %11, %13 : vector<32x128xf32>
    %cst_12 = arith.constant 0.000000e+00 : f32
    %15 = vector.broadcast %cst_12 : f32 to vector<32x128xf32>
    %16 = arith.maximumf %14, %15 : vector<32x128xf32>
    %17 = arith.truncf %16 : vector<32x128xf32> to vector<32x128xbf16>
    %c0_13 = arith.constant 0 : index
    %c0_14 = arith.constant 0 : index
    %18 = vector.load %arg6[%c0_13, %c0_14] : memref<128x256xbf16, #tpu.memory_space<vmem>>, vector<128x256xbf16>
    %cst_15 = arith.constant dense<0.000000e+00> : vector<32x256xf32>
    %19 = tpu.matmul %17, %18, %cst_15 {dimension_numbers = #tpu.dot_dimension_numbers<[1], [0], [0], [1], [0, 0, 1, 1], [], []>} : vector<32x128xbf16>, vector<128x256xbf16>, vector<32x256xf32> -> vector<32x256xf32>
    %c0_16 = arith.constant 0 : index
    %c0_17 = arith.constant 0 : index
    %20 = vector.load %arg7[%c0_16, %c0_17] : memref<1x256xf32, #tpu.memory_space<vmem>>, vector<1x256xf32>
    %21 = vector.broadcast %20 : vector<1x256xf32> to vector<32x256xf32>
    %22 = arith.addf %19, %21 : vector<32x256xf32>
    %cst_18 = arith.constant 0.000000e+00 : f32
    %23 = vector.broadcast %cst_18 : f32 to vector<32x256xf32>
    %24 = arith.maximumf %22, %23 : vector<32x256xf32>
    %cst_19 = arith.constant dense<0xFF800000> : vector<256xf32>
    %25 = vector.multi_reduction <maximumf>, %24, %cst_19 [0] : vector<32x256xf32> to vector<256xf32>
    %26 = vector.shape_cast %25 : vector<256xf32> to vector<1x256xf32>
    %27 = vector.shape_cast %26 : vector<1x256xf32> to vector<1x256xf32>
    %28 = vector.broadcast %27 : vector<1x256xf32> to vector<8x256xf32>
    %29 = arith.truncf %28 : vector<8x256xf32> to vector<8x256xbf16>
    %c0_20 = arith.constant 0 : index
    %c0_21 = arith.constant 0 : index
    %30 = vector.load %arg8[%c0_20, %c0_21] : memref<256x128xbf16, #tpu.memory_space<vmem>>, vector<256x128xbf16>
    %cst_22 = arith.constant dense<0.000000e+00> : vector<8x128xf32>
    %31 = tpu.matmul %29, %30, %cst_22 {dimension_numbers = #tpu.dot_dimension_numbers<[1], [0], [0], [1], [0, 0, 1, 1], [], []>} : vector<8x256xbf16>, vector<256x128xbf16>, vector<8x128xf32> -> vector<8x128xf32>
    %c0_23 = arith.constant 0 : index
    %c0_24 = arith.constant 0 : index
    %32 = vector.load %arg9[%c0_23, %c0_24] : memref<1x128xf32, #tpu.memory_space<vmem>>, vector<1x128xf32>
    %33 = vector.broadcast %32 : vector<1x128xf32> to vector<8x128xf32>
    %34 = arith.addf %31, %33 : vector<8x128xf32>
    %cst_25 = arith.constant 0.000000e+00 : f32
    %35 = vector.broadcast %cst_25 : f32 to vector<8x128xf32>
    %36 = arith.maximumf %34, %35 : vector<8x128xf32>
    %37 = arith.truncf %36 : vector<8x128xf32> to vector<8x128xbf16>
    %c0_26 = arith.constant 0 : index
    %c0_27 = arith.constant 0 : index
    %38 = vector.load %arg10[%c0_26, %c0_27] : memref<128x128xbf16, #tpu.memory_space<vmem>>, vector<128x128xbf16>
    %cst_28 = arith.constant dense<0.000000e+00> : vector<8x128xf32>
    %39 = tpu.matmul %37, %38, %cst_28 {dimension_numbers = #tpu.dot_dimension_numbers<[1], [0], [0], [1], [0, 0, 1, 1], [], []>} : vector<8x128xbf16>, vector<128x128xbf16>, vector<8x128xf32> -> vector<8x128xf32>
    %c0_29 = arith.constant 0 : index
    %c0_30 = arith.constant 0 : index
    %40 = vector.load %arg11[%c0_29, %c0_30] : memref<1x128xf32, #tpu.memory_space<vmem>>, vector<1x128xf32>
    %41 = vector.broadcast %40 : vector<1x128xf32> to vector<8x128xf32>
    %42 = arith.addf %39, %41 : vector<8x128xf32>
    %cst_31 = arith.constant 0.000000e+00 : f32
    %43 = vector.broadcast %cst_31 : f32 to vector<8x128xf32>
    %44 = arith.maximumf %42, %43 : vector<8x128xf32>
    %45 = arith.truncf %44 : vector<8x128xf32> to vector<8x128xbf16>
    %c0_32 = arith.constant 0 : index
    %c0_33 = arith.constant 0 : index
    %46 = vector.load %arg12[%c0_32, %c0_33] : memref<128x128xbf16, #tpu.memory_space<vmem>>, vector<128x128xbf16>
    %cst_34 = arith.constant dense<0.000000e+00> : vector<8x128xf32>
    %47 = tpu.matmul %45, %46, %cst_34 {dimension_numbers = #tpu.dot_dimension_numbers<[1], [0], [0], [1], [0, 0, 1, 1], [], []>} : vector<8x128xbf16>, vector<128x128xbf16>, vector<8x128xf32> -> vector<8x128xf32>
    %c0_35 = arith.constant 0 : index
    %c0_36 = arith.constant 0 : index
    %48 = vector.load %arg13[%c0_35, %c0_36] : memref<1x128xf32, #tpu.memory_space<vmem>>, vector<1x128xf32>
    %49 = vector.broadcast %48 : vector<1x128xf32> to vector<8x128xf32>
    %50 = arith.addf %47, %49 : vector<8x128xf32>
    %51 = vector.extract_strided_slice %50 {offsets = [0, 0], sizes = [1, 128], strides = [1, 1]} : vector<8x128xf32> to vector<1x128xf32>
    %c0_37 = arith.constant 0 : index
    %c0_38 = arith.constant 0 : index
    %c0_39 = arith.constant 0 : index
    %52 = vector.load %arg14[%c0_37, %c0_38, %c0_39] : memref<1x1x128xf32, #tpu.memory_space<vmem>>, vector<1x1x128xf32>
    %53 = vector.shape_cast %52 : vector<1x1x128xf32> to vector<1x128xf32>
    %54 = vector.shape_cast %51 : vector<1x128xf32> to vector<1x1x128xf32>
    tpu.vector_store %arg14[%c0_37, %c0_38, %c0_39], %54 {strides = array<i32>} : memref<1x1x128xf32, #tpu.memory_space<vmem>>, vector<1x1x128xf32>,
    return
  }
  func.func @transform_0(%arg0: i32) -> (i32, i32, i32) {
    %c0_i32 = arith.constant 0 : i32
    %c0_i32_0 = arith.constant 0 : i32
    %c0_i32_1 = arith.constant 0 : i32
    return %arg0, %c0_i32, %c0_i32_0 : i32, i32, i32
  }
  func.func @transform_1(%arg0: i32) -> (i32, i32) {
    %c0_i32 = arith.constant 0 : i32
    %c0_i32_0 = arith.constant 0 : i32
    %c0_i32_1 = arith.constant 0 : i32
    return %c0_i32, %c0_i32_0 : i32, i32
  }
  func.func @transform_2(%arg0: i32) -> (i32, i32) {
    %c0_i32 = arith.constant 0 : i32
    %c0_i32_0 = arith.constant 0 : i32
    %c0_i32_1 = arith.constant 0 : i32
    return %c0_i32, %c0_i32_0 : i32, i32
  }
  func.func @transform_3(%arg0: i32) -> (i32, i32) {
    %c0_i32 = arith.constant 0 : i32
    %c0_i32_0 = arith.constant 0 : i32
    %c0_i32_1 = arith.constant 0 : i32
    return %c0_i32, %c0_i32_0 : i32, i32
  }
  func.func @transform_4(%arg0: i32) -> (i32, i32) {
    %c0_i32 = arith.constant 0 : i32
    %c0_i32_0 = arith.constant 0 : i32
    %c0_i32_1 = arith.constant 0 : i32
    return %c0_i32, %c0_i32_0 : i32, i32
  }
  func.func @transform_5(%arg0: i32) -> (i32, i32) {
    %c0_i32 = arith.constant 0 : i32
    %c0_i32_0 = arith.constant 0 : i32
    %c0_i32_1 = arith.constant 0 : i32
    return %c0_i32, %c0_i32_0 : i32, i32
  }
  func.func @transform_6(%arg0: i32) -> (i32, i32) {
    %c0_i32 = arith.constant 0 : i32
    %c0_i32_0 = arith.constant 0 : i32
    %c0_i32_1 = arith.constant 0 : i32
    return %c0_i32, %c0_i32_0 : i32, i32
  }
  func.func @transform_7(%arg0: i32) -> (i32, i32) {
    %c0_i32 = arith.constant 0 : i32
    %c0_i32_0 = arith.constant 0 : i32
    %c0_i32_1 = arith.constant 0 : i32
    return %c0_i32, %c0_i32_0 : i32, i32
  }
  func.func @transform_8(%arg0: i32) -> (i32, i32) {
    %c0_i32 = arith.constant 0 : i32
    %c0_i32_0 = arith.constant 0 : i32
    %c0_i32_1 = arith.constant 0 : i32
    return %c0_i32, %c0_i32_0 : i32, i32
  }
  func.func @transform_9(%arg0: i32) -> (i32, i32) {
    %c0_i32 = arith.constant 0 : i32
    %c0_i32_0 = arith.constant 0 : i32
    %c0_i32_1 = arith.constant 0 : i32
    return %c0_i32, %c0_i32_0 : i32, i32
  }
  func.func @transform_10(%arg0: i32) -> (i32, i32) {
    %c0_i32 = arith.constant 0 : i32
    %c0_i32_0 = arith.constant 0 : i32
    %c0_i32_1 = arith.constant 0 : i32
    return %c0_i32, %c0_i32_0 : i32, i32
  }
  func.func @transform_11(%arg0: i32) -> (i32, i32) {
    %c0_i32 = arith.constant 0 : i32
    %c0_i32_0 = arith.constant 0 : i32
    %c0_i32_1 = arith.constant 0 : i32
    return %c0_i32, %c0_i32_0 : i32, i32
  }
  func.func @transform_12(%arg0: i32) -> (i32, i32) {
    %c0_i32 = arith.constant 0 : i32
    %c0_i32_0 = arith.constant 0 : i32
    %c0_i32_1 = arith.constant 0 : i32
    return %c0_i32, %c0_i32_0 : i32, i32
  }
  func.func @transform_13(%arg0: i32) -> (i32, i32, i32) {
    %c0_i32 = arith.constant 0 : i32
    %c0_i32_0 = arith.constant 0 : i32
    %c0_i32_1 = arith.constant 0 : i32
    return %arg0, %c0_i32, %c0_i32_0 : i32, i32, i32
  }
}

module attributes {stable_mosaic.version = 11 : i64} {
  func.func @kernel(%arg0: i32, %arg1: memref<1x32x128xbf16, #tpu.memory_space<vmem>>, %arg2: memref<1x128x128xbf16, #tpu.memory_space<vmem>>, %arg3: memref<128x128xbf16, #tpu.memory_space<vmem>>, %arg4: memref<1x128xf32, #tpu.memory_space<vmem>>, %arg5: memref<128x128xbf16, #tpu.memory_space<vmem>>, %arg6: memref<1x128xf32, #tpu.memory_space<vmem>>, %arg7: memref<128x128xbf16, #tpu.memory_space<vmem>>, %arg8: memref<1x128xf32, #tpu.memory_space<vmem>>, %arg9: memref<128x256xbf16, #tpu.memory_space<vmem>>, %arg10: memref<1x256xf32, #tpu.memory_space<vmem>>, %arg11: memref<256x128xbf16, #tpu.memory_space<vmem>>, %arg12: memref<1x128xf32, #tpu.memory_space<vmem>>, %arg13: memref<128x128xbf16, #tpu.memory_space<vmem>>, %arg14: memref<1x128xf32, #tpu.memory_space<vmem>>, %arg15: memref<128x4096xbf16, #tpu.memory_space<vmem>>, %arg16: memref<1x4096xf32, #tpu.memory_space<vmem>>, %arg17: memref<1x1x4096xf32, #tpu.memory_space<vmem>>, %arg18: memref<1x32x128xbf16, #tpu.memory_space<vmem>>) attributes {dimension_semantics = [#tpu.dimension_semantics<parallel>], iteration_bounds = array<i64: 2>, scalar_prefetch = 0 : i64, scratch_operands = 0 : i64, tpu.core_type = #tpu.core_type<tc>, window_params = [{transform_indices = @transform_0, window_bounds = array<i64: 1, 32, 128>}, {transform_indices = @transform_1, window_bounds = array<i64: 1, 128, 128>}, {pipeline_mode = #tpu.pipeline_mode<synchronous>, transform_indices = @transform_2, window_bounds = array<i64: 128, 128>}, {pipeline_mode = #tpu.pipeline_mode<synchronous>, transform_indices = @transform_3, window_bounds = array<i64: 1, 128>}, {pipeline_mode = #tpu.pipeline_mode<synchronous>, transform_indices = @transform_4, window_bounds = array<i64: 128, 128>}, {pipeline_mode = #tpu.pipeline_mode<synchronous>, transform_indices = @transform_5, window_bounds = array<i64: 1, 128>}, {pipeline_mode = #tpu.pipeline_mode<synchronous>, transform_indices = @transform_6, window_bounds = array<i64: 128, 128>}, {pipeline_mode = #tpu.pipeline_mode<synchronous>, transform_indices = @transform_7, window_bounds = array<i64: 1, 128>}, {pipeline_mode = #tpu.pipeline_mode<synchronous>, transform_indices = @transform_8, window_bounds = array<i64: 128, 256>}, {pipeline_mode = #tpu.pipeline_mode<synchronous>, transform_indices = @transform_9, window_bounds = array<i64: 1, 256>}, {pipeline_mode = #tpu.pipeline_mode<synchronous>, transform_indices = @transform_10, window_bounds = array<i64: 256, 128>}, {pipeline_mode = #tpu.pipeline_mode<synchronous>, transform_indices = @transform_11, window_bounds = array<i64: 1, 128>}, {pipeline_mode = #tpu.pipeline_mode<synchronous>, transform_indices = @transform_12, window_bounds = array<i64: 128, 128>}, {pipeline_mode = #tpu.pipeline_mode<synchronous>, transform_indices = @transform_13, window_bounds = array<i64: 1, 128>}, {pipeline_mode = #tpu.pipeline_mode<synchronous>, transform_indices = @transform_14, window_bounds = array<i64: 128, 4096>}, {pipeline_mode = #tpu.pipeline_mode<synchronous>, transform_indices = @transform_15, window_bounds = array<i64: 1, 4096>}, {transform_indices = @transform_16, window_bounds = array<i64: 1, 1, 4096>}, {transform_indices = @transform_17, window_bounds = array<i64: 1, 32, 128>}]} {
    %c0 = arith.constant 0 : index
    %c0_0 = arith.constant 0 : index
    %c0_1 = arith.constant 0 : index
    %0 = vector.load %arg1[%c0, %c0_0, %c0_1] : memref<1x32x128xbf16, #tpu.memory_space<vmem>>, vector<1x32x128xbf16>
    %1 = vector.shape_cast %0 : vector<1x32x128xbf16> to vector<32x128xbf16>
    %c0_2 = arith.constant 0 : index
    %c0_3 = arith.constant 0 : index
    %c0_4 = arith.constant 0 : index
    %2 = vector.load %arg2[%c0_2, %c0_3, %c0_4] : memref<1x128x128xbf16, #tpu.memory_space<vmem>>, vector<1x128x128xbf16>
    %3 = vector.shape_cast %2 : vector<1x128x128xbf16> to vector<128x128xbf16>
    %cst = arith.constant dense<0.000000e+00> : vector<32x128xf32>
    %4 = tpu.matmul %1, %3, %cst {dimension_numbers = #tpu.dot_dimension_numbers<[1], [0], [0], [1], [0, 0, 1, 1], [], []>} : vector<32x128xbf16>, vector<128x128xbf16>, vector<32x128xf32> -> vector<32x128xf32>
    %5 = arith.truncf %4 : vector<32x128xf32> to vector<32x128xbf16>
    %c0_5 = arith.constant 0 : index
    %c0_6 = arith.constant 0 : index
    %6 = vector.load %arg3[%c0_5, %c0_6] : memref<128x128xbf16, #tpu.memory_space<vmem>>, vector<128x128xbf16>
    %cst_7 = arith.constant dense<0.000000e+00> : vector<32x128xf32>
    %7 = tpu.matmul %5, %6, %cst_7 {dimension_numbers = #tpu.dot_dimension_numbers<[1], [0], [0], [1], [0, 0, 1, 1], [], []>} : vector<32x128xbf16>, vector<128x128xbf16>, vector<32x128xf32> -> vector<32x128xf32>
    %c0_8 = arith.constant 0 : index
    %c0_9 = arith.constant 0 : index
    %8 = vector.load %arg4[%c0_8, %c0_9] : memref<1x128xf32, #tpu.memory_space<vmem>>, vector<1x128xf32>
    %9 = vector.broadcast %8 : vector<1x128xf32> to vector<32x128xf32>
    %10 = arith.addf %7, %9 : vector<32x128xf32>
    %cst_10 = arith.constant 0.000000e+00 : f32
    %11 = vector.broadcast %cst_10 : f32 to vector<32x128xf32>
    %12 = arith.maximumf %10, %11 : vector<32x128xf32>
    %13 = arith.truncf %12 : vector<32x128xf32> to vector<32x128xbf16>
    %c0_11 = arith.constant 0 : index
    %c0_12 = arith.constant 0 : index
    %c0_13 = arith.constant 0 : index
    %14 = vector.load %arg18[%c0_11, %c0_12, %c0_13] : memref<1x32x128xbf16, #tpu.memory_space<vmem>>, vector<1x32x128xbf16>
    %15 = vector.shape_cast %14 : vector<1x32x128xbf16> to vector<32x128xbf16>
    %16 = vector.shape_cast %13 : vector<32x128xbf16> to vector<1x32x128xbf16>
    tpu.vector_store %arg18[%c0_11, %c0_12, %c0_13], %16 {strides = array<i32>} : memref<1x32x128xbf16, #tpu.memory_space<vmem>>, vector<1x32x128xbf16>,
    %17 = arith.truncf %12 : vector<32x128xf32> to vector<32x128xbf16>
    %c0_14 = arith.constant 0 : index
    %c0_15 = arith.constant 0 : index
    %18 = vector.load %arg5[%c0_14, %c0_15] : memref<128x128xbf16, #tpu.memory_space<vmem>>, vector<128x128xbf16>
    %cst_16 = arith.constant dense<0.000000e+00> : vector<32x128xf32>
    %19 = tpu.matmul %17, %18, %cst_16 {dimension_numbers = #tpu.dot_dimension_numbers<[1], [0], [0], [1], [0, 0, 1, 1], [], []>} : vector<32x128xbf16>, vector<128x128xbf16>, vector<32x128xf32> -> vector<32x128xf32>
    %c0_17 = arith.constant 0 : index
    %c0_18 = arith.constant 0 : index
    %20 = vector.load %arg6[%c0_17, %c0_18] : memref<1x128xf32, #tpu.memory_space<vmem>>, vector<1x128xf32>
    %21 = vector.broadcast %20 : vector<1x128xf32> to vector<32x128xf32>
    %22 = arith.addf %19, %21 : vector<32x128xf32>
    %cst_19 = arith.constant 0.000000e+00 : f32
    %23 = vector.broadcast %cst_19 : f32 to vector<32x128xf32>
    %24 = arith.maximumf %22, %23 : vector<32x128xf32>
    %25 = arith.truncf %24 : vector<32x128xf32> to vector<32x128xbf16>
    %c0_20 = arith.constant 0 : index
    %c0_21 = arith.constant 0 : index
    %26 = vector.load %arg7[%c0_20, %c0_21] : memref<128x128xbf16, #tpu.memory_space<vmem>>, vector<128x128xbf16>
    %cst_22 = arith.constant dense<0.000000e+00> : vector<32x128xf32>
    %27 = tpu.matmul %25, %26, %cst_22 {dimension_numbers = #tpu.dot_dimension_numbers<[1], [0], [0], [1], [0, 0, 1, 1], [], []>} : vector<32x128xbf16>, vector<128x128xbf16>, vector<32x128xf32> -> vector<32x128xf32>
    %c0_23 = arith.constant 0 : index
    %c0_24 = arith.constant 0 : index
    %28 = vector.load %arg8[%c0_23, %c0_24] : memref<1x128xf32, #tpu.memory_space<vmem>>, vector<1x128xf32>
    %29 = vector.broadcast %28 : vector<1x128xf32> to vector<32x128xf32>
    %30 = arith.addf %27, %29 : vector<32x128xf32>
    %cst_25 = arith.constant 0.000000e+00 : f32
    %31 = vector.broadcast %cst_25 : f32 to vector<32x128xf32>
    %32 = arith.maximumf %30, %31 : vector<32x128xf32>
    %33 = arith.truncf %32 : vector<32x128xf32> to vector<32x128xbf16>
    %c0_26 = arith.constant 0 : index
    %c0_27 = arith.constant 0 : index
    %34 = vector.load %arg9[%c0_26, %c0_27] : memref<128x256xbf16, #tpu.memory_space<vmem>>, vector<128x256xbf16>
    %cst_28 = arith.constant dense<0.000000e+00> : vector<32x256xf32>
    %35 = tpu.matmul %33, %34, %cst_28 {dimension_numbers = #tpu.dot_dimension_numbers<[1], [0], [0], [1], [0, 0, 1, 1], [], []>} : vector<32x128xbf16>, vector<128x256xbf16>, vector<32x256xf32> -> vector<32x256xf32>
    %c0_29 = arith.constant 0 : index
    %c0_30 = arith.constant 0 : index
    %36 = vector.load %arg10[%c0_29, %c0_30] : memref<1x256xf32, #tpu.memory_space<vmem>>, vector<1x256xf32>
    %37 = vector.broadcast %36 : vector<1x256xf32> to vector<32x256xf32>
    %38 = arith.addf %35, %37 : vector<32x256xf32>
    %cst_31 = arith.constant 0.000000e+00 : f32
    %39 = vector.broadcast %cst_31 : f32 to vector<32x256xf32>
    %40 = arith.maximumf %38, %39 : vector<32x256xf32>
    %cst_32 = arith.constant dense<0xFF800000> : vector<256xf32>
    %41 = vector.multi_reduction <maximumf>, %40, %cst_32 [0] : vector<32x256xf32> to vector<256xf32>
    %42 = vector.shape_cast %41 : vector<256xf32> to vector<1x256xf32>
    %43 = vector.shape_cast %42 : vector<1x256xf32> to vector<1x256xf32>
    %44 = vector.broadcast %43 : vector<1x256xf32> to vector<8x256xf32>
    %45 = arith.truncf %44 : vector<8x256xf32> to vector<8x256xbf16>
    %c0_33 = arith.constant 0 : index
    %c0_34 = arith.constant 0 : index
    %46 = vector.load %arg11[%c0_33, %c0_34] : memref<256x128xbf16, #tpu.memory_space<vmem>>, vector<256x128xbf16>
    %cst_35 = arith.constant dense<0.000000e+00> : vector<8x128xf32>
    %47 = tpu.matmul %45, %46, %cst_35 {dimension_numbers = #tpu.dot_dimension_numbers<[1], [0], [0], [1], [0, 0, 1, 1], [], []>} : vector<8x256xbf16>, vector<256x128xbf16>, vector<8x128xf32> -> vector<8x128xf32>
    %c0_36 = arith.constant 0 : index
    %c0_37 = arith.constant 0 : index
    %48 = vector.load %arg12[%c0_36, %c0_37] : memref<1x128xf32, #tpu.memory_space<vmem>>, vector<1x128xf32>
    %49 = vector.broadcast %48 : vector<1x128xf32> to vector<8x128xf32>
    %50 = arith.addf %47, %49 : vector<8x128xf32>
    %cst_38 = arith.constant 0.000000e+00 : f32
    %51 = vector.broadcast %cst_38 : f32 to vector<8x128xf32>
    %52 = arith.maximumf %50, %51 : vector<8x128xf32>
    %53 = arith.truncf %52 : vector<8x128xf32> to vector<8x128xbf16>
    %c0_39 = arith.constant 0 : index
    %c0_40 = arith.constant 0 : index
    %54 = vector.load %arg13[%c0_39, %c0_40] : memref<128x128xbf16, #tpu.memory_space<vmem>>, vector<128x128xbf16>
    %cst_41 = arith.constant dense<0.000000e+00> : vector<8x128xf32>
    %55 = tpu.matmul %53, %54, %cst_41 {dimension_numbers = #tpu.dot_dimension_numbers<[1], [0], [0], [1], [0, 0, 1, 1], [], []>} : vector<8x128xbf16>, vector<128x128xbf16>, vector<8x128xf32> -> vector<8x128xf32>
    %c0_42 = arith.constant 0 : index
    %c0_43 = arith.constant 0 : index
    %56 = vector.load %arg14[%c0_42, %c0_43] : memref<1x128xf32, #tpu.memory_space<vmem>>, vector<1x128xf32>
    %57 = vector.broadcast %56 : vector<1x128xf32> to vector<8x128xf32>
    %58 = arith.addf %55, %57 : vector<8x128xf32>
    %cst_44 = arith.constant 0.000000e+00 : f32
    %59 = vector.broadcast %cst_44 : f32 to vector<8x128xf32>
    %60 = arith.maximumf %58, %59 : vector<8x128xf32>
    %61 = arith.truncf %60 : vector<8x128xf32> to vector<8x128xbf16>
    %c0_45 = arith.constant 0 : index
    %c0_46 = arith.constant 0 : index
    %62 = vector.load %arg15[%c0_45, %c0_46] : memref<128x4096xbf16, #tpu.memory_space<vmem>>, vector<128x4096xbf16>
    %cst_47 = arith.constant dense<0.000000e+00> : vector<8x4096xf32>
    %63 = tpu.matmul %61, %62, %cst_47 {dimension_numbers = #tpu.dot_dimension_numbers<[1], [0], [0], [1], [0, 0, 1, 1], [], []>} : vector<8x128xbf16>, vector<128x4096xbf16>, vector<8x4096xf32> -> vector<8x4096xf32>
    %c0_48 = arith.constant 0 : index
    %c0_49 = arith.constant 0 : index
    %64 = vector.load %arg16[%c0_48, %c0_49] : memref<1x4096xf32, #tpu.memory_space<vmem>>, vector<1x4096xf32>
    %65 = vector.broadcast %64 : vector<1x4096xf32> to vector<8x4096xf32>
    %66 = arith.addf %63, %65 : vector<8x4096xf32>
    %67 = vector.extract_strided_slice %66 {offsets = [0, 0], sizes = [1, 4096], strides = [1, 1]} : vector<8x4096xf32> to vector<1x4096xf32>
    %c0_50 = arith.constant 0 : index
    %c0_51 = arith.constant 0 : index
    %c0_52 = arith.constant 0 : index
    %68 = vector.load %arg17[%c0_50, %c0_51, %c0_52] : memref<1x1x4096xf32, #tpu.memory_space<vmem>>, vector<1x1x4096xf32>
    %69 = vector.shape_cast %68 : vector<1x1x4096xf32> to vector<1x4096xf32>
    %70 = vector.shape_cast %67 : vector<1x4096xf32> to vector<1x1x4096xf32>
    tpu.vector_store %arg17[%c0_50, %c0_51, %c0_52], %70 {strides = array<i32>} : memref<1x1x4096xf32, #tpu.memory_space<vmem>>, vector<1x1x4096xf32>,
    return
  }
  func.func @transform_0(%arg0: i32) -> (i32, i32, i32) {
    %c0_i32 = arith.constant 0 : i32
    %c0_i32_0 = arith.constant 0 : i32
    %c0_i32_1 = arith.constant 0 : i32
    return %arg0, %c0_i32, %c0_i32_0 : i32, i32, i32
  }
  func.func @transform_1(%arg0: i32) -> (i32, i32, i32) {
    %c0_i32 = arith.constant 0 : i32
    %c0_i32_0 = arith.constant 0 : i32
    %c0_i32_1 = arith.constant 0 : i32
    return %arg0, %c0_i32, %c0_i32_0 : i32, i32, i32
  }
  func.func @transform_2(%arg0: i32) -> (i32, i32) {
    %c0_i32 = arith.constant 0 : i32
    %c0_i32_0 = arith.constant 0 : i32
    %c0_i32_1 = arith.constant 0 : i32
    return %c0_i32, %c0_i32_0 : i32, i32
  }
  func.func @transform_3(%arg0: i32) -> (i32, i32) {
    %c0_i32 = arith.constant 0 : i32
    %c0_i32_0 = arith.constant 0 : i32
    %c0_i32_1 = arith.constant 0 : i32
    return %c0_i32, %c0_i32_0 : i32, i32
  }
  func.func @transform_4(%arg0: i32) -> (i32, i32) {
    %c0_i32 = arith.constant 0 : i32
    %c0_i32_0 = arith.constant 0 : i32
    %c0_i32_1 = arith.constant 0 : i32
    return %c0_i32, %c0_i32_0 : i32, i32
  }
  func.func @transform_5(%arg0: i32) -> (i32, i32) {
    %c0_i32 = arith.constant 0 : i32
    %c0_i32_0 = arith.constant 0 : i32
    %c0_i32_1 = arith.constant 0 : i32
    return %c0_i32, %c0_i32_0 : i32, i32
  }
  func.func @transform_6(%arg0: i32) -> (i32, i32) {
    %c0_i32 = arith.constant 0 : i32
    %c0_i32_0 = arith.constant 0 : i32
    %c0_i32_1 = arith.constant 0 : i32
    return %c0_i32, %c0_i32_0 : i32, i32
  }
  func.func @transform_7(%arg0: i32) -> (i32, i32) {
    %c0_i32 = arith.constant 0 : i32
    %c0_i32_0 = arith.constant 0 : i32
    %c0_i32_1 = arith.constant 0 : i32
    return %c0_i32, %c0_i32_0 : i32, i32
  }
  func.func @transform_8(%arg0: i32) -> (i32, i32) {
    %c0_i32 = arith.constant 0 : i32
    %c0_i32_0 = arith.constant 0 : i32
    %c0_i32_1 = arith.constant 0 : i32
    return %c0_i32, %c0_i32_0 : i32, i32
  }
  func.func @transform_9(%arg0: i32) -> (i32, i32) {
    %c0_i32 = arith.constant 0 : i32
    %c0_i32_0 = arith.constant 0 : i32
    %c0_i32_1 = arith.constant 0 : i32
    return %c0_i32, %c0_i32_0 : i32, i32
  }
  func.func @transform_10(%arg0: i32) -> (i32, i32) {
    %c0_i32 = arith.constant 0 : i32
    %c0_i32_0 = arith.constant 0 : i32
    %c0_i32_1 = arith.constant 0 : i32
    return %c0_i32, %c0_i32_0 : i32, i32
  }
  func.func @transform_11(%arg0: i32) -> (i32, i32) {
    %c0_i32 = arith.constant 0 : i32
    %c0_i32_0 = arith.constant 0 : i32
    %c0_i32_1 = arith.constant 0 : i32
    return %c0_i32, %c0_i32_0 : i32, i32
  }
  func.func @transform_12(%arg0: i32) -> (i32, i32) {
    %c0_i32 = arith.constant 0 : i32
    %c0_i32_0 = arith.constant 0 : i32
    %c0_i32_1 = arith.constant 0 : i32
    return %c0_i32, %c0_i32_0 : i32, i32
  }
  func.func @transform_13(%arg0: i32) -> (i32, i32) {
    %c0_i32 = arith.constant 0 : i32
    %c0_i32_0 = arith.constant 0 : i32
    %c0_i32_1 = arith.constant 0 : i32
    return %c0_i32, %c0_i32_0 : i32, i32
  }
  func.func @transform_14(%arg0: i32) -> (i32, i32) {
    %c0_i32 = arith.constant 0 : i32
    %c0_i32_0 = arith.constant 0 : i32
    %c0_i32_1 = arith.constant 0 : i32
    return %c0_i32, %c0_i32_0 : i32, i32
  }
  func.func @transform_15(%arg0: i32) -> (i32, i32) {
    %c0_i32 = arith.constant 0 : i32
    %c0_i32_0 = arith.constant 0 : i32
    %c0_i32_1 = arith.constant 0 : i32
    return %c0_i32, %c0_i32_0 : i32, i32
  }
  func.func @transform_16(%arg0: i32) -> (i32, i32, i32) {
    %c0_i32 = arith.constant 0 : i32
    %c0_i32_0 = arith.constant 0 : i32
    %c0_i32_1 = arith.constant 0 : i32
    return %arg0, %c0_i32, %c0_i32_0 : i32, i32, i32
  }
  func.func @transform_17(%arg0: i32) -> (i32, i32, i32) {
    %c0_i32 = arith.constant 0 : i32
    %c0_i32_0 = arith.constant 0 : i32
    %c0_i32_1 = arith.constant 0 : i32
    return %arg0, %c0_i32, %c0_i32_0 : i32, i32, i32
  }
}

module attributes {stable_mosaic.version = 11 : i64} {
  func.func @kernel(%arg0: i32, %arg1: memref<1x32x128xbf16, #tpu.memory_space<vmem>>, %arg2: memref<1x128x128xbf16, #tpu.memory_space<vmem>>, %arg3: memref<128x128xbf16, #tpu.memory_space<vmem>>, %arg4: memref<1x128xf32, #tpu.memory_space<vmem>>, %arg5: memref<128x256xbf16, #tpu.memory_space<vmem>>, %arg6: memref<1x256xf32, #tpu.memory_space<vmem>>, %arg7: memref<256x128xbf16, #tpu.memory_space<vmem>>, %arg8: memref<1x128xf32, #tpu.memory_space<vmem>>, %arg9: memref<128x128xbf16, #tpu.memory_space<vmem>>, %arg10: memref<1x128xf32, #tpu.memory_space<vmem>>, %arg11: memref<128x128xbf16, #tpu.memory_space<vmem>>, %arg12: memref<1x128xf32, #tpu.memory_space<vmem>>, %arg13: memref<1x1x128xf32, #tpu.memory_space<vmem>>) attributes {dimension_semantics = [#tpu.dimension_semantics<parallel>], iteration_bounds = array<i64: 2>, scalar_prefetch = 0 : i64, scratch_operands = 0 : i64, tpu.core_type = #tpu.core_type<tc>, window_params = [{transform_indices = @transform_0, window_bounds = array<i64: 1, 32, 128>}, {transform_indices = @transform_1, window_bounds = array<i64: 1, 128, 128>}, {pipeline_mode = #tpu.pipeline_mode<synchronous>, transform_indices = @transform_2, window_bounds = array<i64: 128, 128>}, {pipeline_mode = #tpu.pipeline_mode<synchronous>, transform_indices = @transform_3, window_bounds = array<i64: 1, 128>}, {pipeline_mode = #tpu.pipeline_mode<synchronous>, transform_indices = @transform_4, window_bounds = array<i64: 128, 256>}, {pipeline_mode = #tpu.pipeline_mode<synchronous>, transform_indices = @transform_5, window_bounds = array<i64: 1, 256>}, {pipeline_mode = #tpu.pipeline_mode<synchronous>, transform_indices = @transform_6, window_bounds = array<i64: 256, 128>}, {pipeline_mode = #tpu.pipeline_mode<synchronous>, transform_indices = @transform_7, window_bounds = array<i64: 1, 128>}, {pipeline_mode = #tpu.pipeline_mode<synchronous>, transform_indices = @transform_8, window_bounds = array<i64: 128, 128>}, {pipeline_mode = #tpu.pipeline_mode<synchronous>, transform_indices = @transform_9, window_bounds = array<i64: 1, 128>}, {pipeline_mode = #tpu.pipeline_mode<synchronous>, transform_indices = @transform_10, window_bounds = array<i64: 128, 128>}, {pipeline_mode = #tpu.pipeline_mode<synchronous>, transform_indices = @transform_11, window_bounds = array<i64: 1, 128>}, {transform_indices = @transform_12, window_bounds = array<i64: 1, 1, 128>}]} {
    %c0 = arith.constant 0 : index
    %c0_0 = arith.constant 0 : index
    %c0_1 = arith.constant 0 : index
    %0 = vector.load %arg1[%c0, %c0_0, %c0_1] : memref<1x32x128xbf16, #tpu.memory_space<vmem>>, vector<1x32x128xbf16>
    %1 = vector.shape_cast %0 : vector<1x32x128xbf16> to vector<32x128xbf16>
    %c0_2 = arith.constant 0 : index
    %c0_3 = arith.constant 0 : index
    %c0_4 = arith.constant 0 : index
    %2 = vector.load %arg2[%c0_2, %c0_3, %c0_4] : memref<1x128x128xbf16, #tpu.memory_space<vmem>>, vector<1x128x128xbf16>
    %3 = vector.shape_cast %2 : vector<1x128x128xbf16> to vector<128x128xbf16>
    %cst = arith.constant dense<0.000000e+00> : vector<32x128xf32>
    %4 = tpu.matmul %1, %3, %cst {dimension_numbers = #tpu.dot_dimension_numbers<[1], [0], [0], [1], [0, 0, 1, 1], [], []>} : vector<32x128xbf16>, vector<128x128xbf16>, vector<32x128xf32> -> vector<32x128xf32>
    %5 = arith.truncf %4 : vector<32x128xf32> to vector<32x128xbf16>
    %c0_5 = arith.constant 0 : index
    %c0_6 = arith.constant 0 : index
    %6 = vector.load %arg3[%c0_5, %c0_6] : memref<128x128xbf16, #tpu.memory_space<vmem>>, vector<128x128xbf16>
    %cst_7 = arith.constant dense<0.000000e+00> : vector<32x128xf32>
    %7 = tpu.matmul %5, %6, %cst_7 {dimension_numbers = #tpu.dot_dimension_numbers<[1], [0], [0], [1], [0, 0, 1, 1], [], []>} : vector<32x128xbf16>, vector<128x128xbf16>, vector<32x128xf32> -> vector<32x128xf32>
    %c0_8 = arith.constant 0 : index
    %c0_9 = arith.constant 0 : index
    %8 = vector.load %arg4[%c0_8, %c0_9] : memref<1x128xf32, #tpu.memory_space<vmem>>, vector<1x128xf32>
    %9 = vector.broadcast %8 : vector<1x128xf32> to vector<32x128xf32>
    %10 = arith.addf %7, %9 : vector<32x128xf32>
    %cst_10 = arith.constant 0.000000e+00 : f32
    %11 = vector.broadcast %cst_10 : f32 to vector<32x128xf32>
    %12 = arith.maximumf %10, %11 : vector<32x128xf32>
    %13 = arith.truncf %12 : vector<32x128xf32> to vector<32x128xbf16>
    %c0_11 = arith.constant 0 : index
    %c0_12 = arith.constant 0 : index
    %14 = vector.load %arg5[%c0_11, %c0_12] : memref<128x256xbf16, #tpu.memory_space<vmem>>, vector<128x256xbf16>
    %cst_13 = arith.constant dense<0.000000e+00> : vector<32x256xf32>
    %15 = tpu.matmul %13, %14, %cst_13 {dimension_numbers = #tpu.dot_dimension_numbers<[1], [0], [0], [1], [0, 0, 1, 1], [], []>} : vector<32x128xbf16>, vector<128x256xbf16>, vector<32x256xf32> -> vector<32x256xf32>
    %c0_14 = arith.constant 0 : index
    %c0_15 = arith.constant 0 : index
    %16 = vector.load %arg6[%c0_14, %c0_15] : memref<1x256xf32, #tpu.memory_space<vmem>>, vector<1x256xf32>
    %17 = vector.broadcast %16 : vector<1x256xf32> to vector<32x256xf32>
    %18 = arith.addf %15, %17 : vector<32x256xf32>
    %cst_16 = arith.constant dense<0xFF800000> : vector<256xf32>
    %19 = vector.multi_reduction <maximumf>, %18, %cst_16 [0] : vector<32x256xf32> to vector<256xf32>
    %20 = vector.shape_cast %19 : vector<256xf32> to vector<1x256xf32>
    %21 = vector.shape_cast %20 : vector<1x256xf32> to vector<1x256xf32>
    %22 = vector.broadcast %21 : vector<1x256xf32> to vector<8x256xf32>
    %23 = arith.truncf %22 : vector<8x256xf32> to vector<8x256xbf16>
    %c0_17 = arith.constant 0 : index
    %c0_18 = arith.constant 0 : index
    %24 = vector.load %arg7[%c0_17, %c0_18] : memref<256x128xbf16, #tpu.memory_space<vmem>>, vector<256x128xbf16>
    %cst_19 = arith.constant dense<0.000000e+00> : vector<8x128xf32>
    %25 = tpu.matmul %23, %24, %cst_19 {dimension_numbers = #tpu.dot_dimension_numbers<[1], [0], [0], [1], [0, 0, 1, 1], [], []>} : vector<8x256xbf16>, vector<256x128xbf16>, vector<8x128xf32> -> vector<8x128xf32>
    %c0_20 = arith.constant 0 : index
    %c0_21 = arith.constant 0 : index
    %26 = vector.load %arg8[%c0_20, %c0_21] : memref<1x128xf32, #tpu.memory_space<vmem>>, vector<1x128xf32>
    %27 = vector.broadcast %26 : vector<1x128xf32> to vector<8x128xf32>
    %28 = arith.addf %25, %27 : vector<8x128xf32>
    %cst_22 = arith.constant 0.000000e+00 : f32
    %29 = vector.broadcast %cst_22 : f32 to vector<8x128xf32>
    %30 = arith.maximumf %28, %29 : vector<8x128xf32>
    %31 = arith.truncf %30 : vector<8x128xf32> to vector<8x128xbf16>
    %c0_23 = arith.constant 0 : index
    %c0_24 = arith.constant 0 : index
    %32 = vector.load %arg9[%c0_23, %c0_24] : memref<128x128xbf16, #tpu.memory_space<vmem>>, vector<128x128xbf16>
    %cst_25 = arith.constant dense<0.000000e+00> : vector<8x128xf32>
    %33 = tpu.matmul %31, %32, %cst_25 {dimension_numbers = #tpu.dot_dimension_numbers<[1], [0], [0], [1], [0, 0, 1, 1], [], []>} : vector<8x128xbf16>, vector<128x128xbf16>, vector<8x128xf32> -> vector<8x128xf32>
    %c0_26 = arith.constant 0 : index
    %c0_27 = arith.constant 0 : index
    %34 = vector.load %arg10[%c0_26, %c0_27] : memref<1x128xf32, #tpu.memory_space<vmem>>, vector<1x128xf32>
    %35 = vector.broadcast %34 : vector<1x128xf32> to vector<8x128xf32>
    %36 = arith.addf %33, %35 : vector<8x128xf32>
    %cst_28 = arith.constant 0.000000e+00 : f32
    %37 = vector.broadcast %cst_28 : f32 to vector<8x128xf32>
    %38 = arith.maximumf %36, %37 : vector<8x128xf32>
    %39 = arith.truncf %38 : vector<8x128xf32> to vector<8x128xbf16>
    %c0_29 = arith.constant 0 : index
    %c0_30 = arith.constant 0 : index
    %40 = vector.load %arg11[%c0_29, %c0_30] : memref<128x128xbf16, #tpu.memory_space<vmem>>, vector<128x128xbf16>
    %cst_31 = arith.constant dense<0.000000e+00> : vector<8x128xf32>
    %41 = tpu.matmul %39, %40, %cst_31 {dimension_numbers = #tpu.dot_dimension_numbers<[1], [0], [0], [1], [0, 0, 1, 1], [], []>} : vector<8x128xbf16>, vector<128x128xbf16>, vector<8x128xf32> -> vector<8x128xf32>
    %c0_32 = arith.constant 0 : index
    %c0_33 = arith.constant 0 : index
    %42 = vector.load %arg12[%c0_32, %c0_33] : memref<1x128xf32, #tpu.memory_space<vmem>>, vector<1x128xf32>
    %43 = vector.broadcast %42 : vector<1x128xf32> to vector<8x128xf32>
    %44 = arith.addf %41, %43 : vector<8x128xf32>
    %45 = vector.extract_strided_slice %44 {offsets = [0, 0], sizes = [1, 128], strides = [1, 1]} : vector<8x128xf32> to vector<1x128xf32>
    %c0_34 = arith.constant 0 : index
    %c0_35 = arith.constant 0 : index
    %c0_36 = arith.constant 0 : index
    %46 = vector.load %arg13[%c0_34, %c0_35, %c0_36] : memref<1x1x128xf32, #tpu.memory_space<vmem>>, vector<1x1x128xf32>
    %47 = vector.shape_cast %46 : vector<1x1x128xf32> to vector<1x128xf32>
    %48 = vector.shape_cast %45 : vector<1x128xf32> to vector<1x1x128xf32>
    tpu.vector_store %arg13[%c0_34, %c0_35, %c0_36], %48 {strides = array<i32>} : memref<1x1x128xf32, #tpu.memory_space<vmem>>, vector<1x1x128xf32>,
    return
  }
  func.func @transform_0(%arg0: i32) -> (i32, i32, i32) {
    %c0_i32 = arith.constant 0 : i32
    %c0_i32_0 = arith.constant 0 : i32
    %c0_i32_1 = arith.constant 0 : i32
    return %arg0, %c0_i32, %c0_i32_0 : i32, i32, i32
  }
  func.func @transform_1(%arg0: i32) -> (i32, i32, i32) {
    %c0_i32 = arith.constant 0 : i32
    %c0_i32_0 = arith.constant 0 : i32
    %c0_i32_1 = arith.constant 0 : i32
    return %arg0, %c0_i32, %c0_i32_0 : i32, i32, i32
  }
  func.func @transform_2(%arg0: i32) -> (i32, i32) {
    %c0_i32 = arith.constant 0 : i32
    %c0_i32_0 = arith.constant 0 : i32
    %c0_i32_1 = arith.constant 0 : i32
    return %c0_i32, %c0_i32_0 : i32, i32
  }
  func.func @transform_3(%arg0: i32) -> (i32, i32) {
    %c0_i32 = arith.constant 0 : i32
    %c0_i32_0 = arith.constant 0 : i32
    %c0_i32_1 = arith.constant 0 : i32
    return %c0_i32, %c0_i32_0 : i32, i32
  }
  func.func @transform_4(%arg0: i32) -> (i32, i32) {
    %c0_i32 = arith.constant 0 : i32
    %c0_i32_0 = arith.constant 0 : i32
    %c0_i32_1 = arith.constant 0 : i32
    return %c0_i32, %c0_i32_0 : i32, i32
  }
  func.func @transform_5(%arg0: i32) -> (i32, i32) {
    %c0_i32 = arith.constant 0 : i32
    %c0_i32_0 = arith.constant 0 : i32
    %c0_i32_1 = arith.constant 0 : i32
    return %c0_i32, %c0_i32_0 : i32, i32
  }
  func.func @transform_6(%arg0: i32) -> (i32, i32) {
    %c0_i32 = arith.constant 0 : i32
    %c0_i32_0 = arith.constant 0 : i32
    %c0_i32_1 = arith.constant 0 : i32
    return %c0_i32, %c0_i32_0 : i32, i32
  }
  func.func @transform_7(%arg0: i32) -> (i32, i32) {
    %c0_i32 = arith.constant 0 : i32
    %c0_i32_0 = arith.constant 0 : i32
    %c0_i32_1 = arith.constant 0 : i32
    return %c0_i32, %c0_i32_0 : i32, i32
  }
  func.func @transform_8(%arg0: i32) -> (i32, i32) {
    %c0_i32 = arith.constant 0 : i32
    %c0_i32_0 = arith.constant 0 : i32
    %c0_i32_1 = arith.constant 0 : i32
    return %c0_i32, %c0_i32_0 : i32, i32
  }
  func.func @transform_9(%arg0: i32) -> (i32, i32) {
    %c0_i32 = arith.constant 0 : i32
    %c0_i32_0 = arith.constant 0 : i32
    %c0_i32_1 = arith.constant 0 : i32
    return %c0_i32, %c0_i32_0 : i32, i32
  }
  func.func @transform_10(%arg0: i32) -> (i32, i32) {
    %c0_i32 = arith.constant 0 : i32
    %c0_i32_0 = arith.constant 0 : i32
    %c0_i32_1 = arith.constant 0 : i32
    return %c0_i32, %c0_i32_0 : i32, i32
  }
  func.func @transform_11(%arg0: i32) -> (i32, i32) {
    %c0_i32 = arith.constant 0 : i32
    %c0_i32_0 = arith.constant 0 : i32
    %c0_i32_1 = arith.constant 0 : i32
    return %c0_i32, %c0_i32_0 : i32, i32
  }
  func.func @transform_12(%arg0: i32) -> (i32, i32, i32) {
    %c0_i32 = arith.constant 0 : i32
    %c0_i32_0 = arith.constant 0 : i32
    %c0_i32_1 = arith.constant 0 : i32
    return %arg0, %c0_i32, %c0_i32_0 : i32, i32, i32
  }
}

</mosaic_0001>

<bundles_post_ra>
// kernel: squeeze.3
= control target key start
LH: loop header
LB: loop body
LE: loop exit
PB: predicated region body
PF: predicated region fallthrough
CT: control target
= control target key end

     0   :  { %vm7_vm0 = vcmask 23552   ;;  %s36_s8 = smov 122   ;;  %s56_s0 = inlined_call_operand.vmem [shape: f32[2,9], index: 0, kind: input, shape index: {}]   ;;  %s57_s1 = inlined_call_operand.vmem [shape: f32[2,3,3], index: 1, kind: output, shape index: {}]  }
   0x1   :  { %v4_v0 = vld [vmem:[%s56_s0] sm:$0x3]  ;;  %s35_s0 = smov 125  }
   0x2   :  { %5 = vst [vmem:[#allocation1] sm:$0x3] %v4_v0 }
   0x9   :  { %v9_v1 = vld [vmem:[#allocation1] sm:$0x3]  }
   0xa   :  { %v6_v2 = vld [vmem:[#allocation1] sm:$0x3]   ;;  %10 = vrot.lane.b32.xlu0 %v9_v1, %s35_s0 }
   0xb   :  { %8 = vst.msk [vmem:[#allocation0] ss:$8 sm:$0x3] %vm7_vm0, %v6_v2   ;;  %v15_v3 = vld [vmem:[#allocation1] sm:$0x3]  }
   0xe   :  { %16 = vrot.lane.b32.xlu0 %v15_v3, %s36_s8 }
  0x7c   :  { %v11_v4 = vpop.permute.xlu0 %10  }
  0x7d   :  { %14 = vst.msk [vmem:[#allocation0 + $0x1] ss:$8 sm:$0x3] %vm7_vm0, %v11_v4  }
  0x80   :  { %v17_v5 = vpop.permute.xlu0 %16  }
  0x81   :  { %20 = vst.msk [vmem:[#allocation0 + $0x2] ss:$8 sm:$0x3] %vm7_vm0, %v17_v5  }
  0x88   :  { %v24_v6 = vld [vmem:[#allocation0] sm:$0xf]  ;;  %v28_v7 = vld [vmem:[#allocation0 + $0x8] sm:$0xf] }
  0x89   :  { %26 = vst [vmem:[%s57_s1] sm:$0xf] %v24_v6  ;;  %32 = vst [vmem:[%s57_s1 + $0x4] sm:$0xf] %v28_v7 }

// kernel: squeeze.4
= control target key start
LH: loop header
LB: loop body
LE: loop exit
PB: predicated region body
PF: predicated region fallthrough
CT: control target
= control target key end

     0   :  { %vm161_vm0 = vcmask 523264   ;;  %vm384_vm1 = vcmask 1047556   ;;  %s601_s26 = smov 64   ;;  %s1012_s0 = inlined_call_operand.vmem [shape: f32[2,4096], index: 0, kind: input, shape index: {}]   ;;  %s1013_s1 = inlined_call_operand.vmem [shape: f32[2,64,64], index: 1, kind: output, shape index: {}]  }
   0x1   :  { %v522_v0 = vld [vmem:[%s1012_s0 + $0xe] sm:$0x3]  ;;  %v523_v1 = vld [vmem:[%s1012_s0 + $0xc] sm:$0x3]  ;;  %v524_v2 = vld [vmem:[%s1012_s0 + $0xa] sm:$0x3] }
   0x2   :  { %128 = vst [vmem:[#allocation0 + $0x38] sm:$0x3] %v522_v0  ;;  %133 = vst [vmem:[#allocation0 + $0x30] sm:$0x3] %v523_v1  ;;  %v525_v3 = vld [vmem:[%s1012_s0 + $0x8] sm:$0x3] }
   0x3   :  { %138 = vst [vmem:[#allocation0 + $0x28] sm:$0x3] %v524_v2  ;;  %v526_v4 = vld [vmem:[%s1012_s0 + $0x6] sm:$0x3]  ;;  %v527_v5 = vld [vmem:[%s1012_s0 + $0x4] sm:$0x3] }
   0x4   :  { %143 = vst [vmem:[#allocation0 + $0x20] sm:$0x3] %v525_v3  ;;  %148 = vst [vmem:[#allocation0 + $0x18] sm:$0x3] %v526_v4  ;;  %v528_v6 = vld [vmem:[%s1012_s0 + $0x2] sm:$0x3] }
   0x5   :  { %153 = vst [vmem:[#allocation0 + $0x10] sm:$0x3] %v527_v5  ;;  %v158_v7 = vld [vmem:[%s1012_s0] sm:$0x3]  ;;  %157 = vst [vmem:[#allocation0 + $0x8] sm:$0x3] %v528_v6 }
   0x6   :  { %159 = vst [vmem:[#allocation0] sm:$0x3] %v158_v7  ;;  %v506_v8 = vld [vmem:[%s1012_s0 + $0x2e] sm:$0x3]  ;;  %v507_v9 = vld [vmem:[%s1012_s0 + $0x2c] sm:$0x3] }
   0x7   :  { %48 = vst [vmem:[#allocation0 + $0xb8] sm:$0x3] %v506_v8  ;;  %53 = vst [vmem:[#allocation0 + $0xb0] sm:$0x3] %v507_v9  ;;  %v508_v10 = vld [vmem:[%s1012_s0 + $0x2a] sm:$0x3] }
   0x8   :  { %v509_v11 = vld [vmem:[%s1012_s0 + $0x28] sm:$0x3]  ;;  %v510_v12 = vld [vmem:[%s1012_s0 + $0x26] sm:$0x3]  ;;  %58 = vst [vmem:[#allocation0 + $0xa8] sm:$0x3] %v508_v10 }
   0x9   :  { %63 = vst [vmem:[#allocation0 + $0xa0] sm:$0x3] %v509_v11  ;;  %68 = vst [vmem:[#allocation0 + $0x98] sm:$0x3] %v510_v12  ;;  %v511_v13 = vld [vmem:[%s1012_s0 + $0x24] sm:$0x3] }
   0xa   :  { %v512_v14 = vld [vmem:[%s1012_s0 + $0x22] sm:$0x3]  ;;  %v513_v15 = vld [vmem:[%s1012_s0 + $0x20] sm:$0x3]  ;;  %73 = vst [vmem:[#allocation0 + $0x90] sm:$0x3] %v511_v13 }
   0xb   :  { %78 = vst [vmem:[#allocation0 + $0x88] sm:$0x3] %v512_v14  ;;  %83 = vst [vmem:[#allocation0 + $0x80] sm:$0x3] %v513_v15  ;;  %v514_v16 = vld [vmem:[%s1012_s0 + $0x1e] sm:$0x3] }
   0xc   :  { %v515_v17 = vld [vmem:[%s1012_s0 + $0x1c] sm:$0x3]  ;;  %v516_v18 = vld [vmem:[%s1012_s0 + $0x1a] sm:$0x3]  ;;  %88 = vst [vmem:[#allocation0 + $0x78] sm:$0x3] %v514_v16 }
   0xd   :  { %93 = vst [vmem:[#allocation0 + $0x70] sm:$0x3] %v515_v17  ;;  %98 = vst [vmem:[#allocation0 + $0x68] sm:$0x3] %v516_v18  ;;  %v517_v19 = vld [vmem:[%s1012_s0 + $0x18] sm:$0x3] }
   0xe   :  { %v518_v20 = vld [vmem:[%s1012_s0 + $0x16] sm:$0x3]  ;;  %v519_v21 = vld [vmem:[%s1012_s0 + $0x14] sm:$0x3]  ;;  %v194_v22 = vld [vmem:[#allocation0 + $0x28] sm:$0x3]  }
   0xf   :  { %v201_v23 = vld [vmem:[#allocation0 + $0x30] sm:$0x3]   ;;  %v208_v24 = vld [vmem:[#allocation0 + $0x38] sm:$0x3]   ;;  %103 = vst [vmem:[#allocation0 + $0x60] sm:$0x3] %v517_v19 }
  0x10   :  { %108 = vst [vmem:[#allocation0 + $0x58] sm:$0x3] %v518_v20  ;;  %113 = vst [vmem:[#allocation0 + $0x50] sm:$0x3] %v519_v21  ;;  %v173_v25 = vld [vmem:[#allocation0 + $0x10] sm:$0x3]  }
  0x11   :  { %v180_v26 = vld [vmem:[#allocation0 + $0x18] sm:$0x3]   ;;  %v187_v27 = vld [vmem:[#allocation0 + $0x20] sm:$0x3]   ;;  %538 = vst.msk [vmem:[%s1013_s1 + $0xa] sm:$0x1] %vm161_vm0, %v194_v22  }
  0x12   :  { %539 = vst.msk [vmem:[%s1013_s1 + $0x49] sm:$0x2] %vm161_vm0, %v194_v22   ;;  %540 = vst.msk [vmem:[%s1013_s1 + $0xc] sm:$0x1] %vm161_vm0, %v201_v23   ;;  %v160_v28 = vld [vmem:[#allocation0] sm:$0x3]  }
  0x13   :  { %541 = vst.msk [vmem:[%s1013_s1 + $0x4b] sm:$0x2] %vm161_vm0, %v201_v23   ;;  %542 = vst.msk [vmem:[%s1013_s1 + $0xe] sm:$0x1] %vm161_vm0, %v208_v24   ;;  %v166_v29 = vld [vmem:[#allocation0 + $0x8] sm:$0x3]  }
  0x14   :  { %543 = vst.msk [vmem:[%s1013_s1 + $0x4d] sm:$0x2] %vm161_vm0, %v208_v24   ;;  %532 = vst.msk [vmem:[%s1013_s1 + $0x4] sm:$0x1] %vm161_vm0, %v173_v25   ;;  %v520_v30 = vld [vmem:[%s1012_s0 + $0x12] sm:$0x3] }
  0x15   :  { %533 = vst.msk [vmem:[%s1013_s1 + $0x43] sm:$0x2] %vm161_vm0, %v173_v25   ;;  %534 = vst.msk [vmem:[%s1013_s1 + $0x6] sm:$0x1] %vm161_vm0, %v180_v26   ;;  %v292_v34 = vld [vmem:[#allocation0 + $0x98] sm:$0x3]  }
  0x16   :  { %535 = vst.msk [vmem:[%s1013_s1 + $0x45] sm:$0x2] %vm161_vm0, %v180_v26   ;;  %536 = vst.msk [vmem:[%s1013_s1 + $0x8] sm:$0x1] %vm161_vm0, %v187_v27   ;;  %v299_v35 = vld [vmem:[#allocation0 + $0xa0] sm:$0x3]  }
  0x17   :  { %537 = vst.msk [vmem:[%s1013_s1 + $0x47] sm:$0x2] %vm161_vm0, %v187_v27   ;;  %162 = vst.msk [vmem:[%s1013_s1] sm:$0x1] %vm161_vm0, %v160_v28   ;;  %v306_v36 = vld [vmem:[#allocation0 + $0xa8] sm:$0x3]  }
  0x18   :  { %529 = vst.msk [vmem:[%s1013_s1 + $0x3f] sm:$0x2] %vm161_vm0, %v160_v28   ;;  %530 = vst.msk [vmem:[%s1013_s1 + $0x2] sm:$0x1] %vm161_vm0, %v166_v29   ;;  %v271_v37 = vld [vmem:[#allocation0 + $0x80] sm:$0x3]  }
  0x19   :  { %531 = vst.msk [vmem:[%s1013_s1 + $0x41] sm:$0x2] %vm161_vm0, %v166_v29   ;;  %v382_v31 = vld [vmem:[#allocation0] ss:$8 sm:$0xf]  }
  0x1a   :  { %v383_v32 = vld [vmem:[#allocation0] ss:$8 sm:$0xf0]   ;;  %118 = vst [vmem:[#allocation0 + $0x48] sm:$0x3] %v520_v30 }
  0x1b   :  { %v385_v33 = vsel %vm384_vm1, %v383_v32, %v382_v31  ;;  %v278_v38 = vld [vmem:[#allocation0 + $0x88] sm:$0x3]   ;;  %v285_v39 = vld [vmem:[#allocation0 + $0x90] sm:$0x3]   ;;  %566 = vst.msk [vmem:[%s1013_s1 + $0x26] sm:$0x1] %vm161_vm0, %v292_v34  }
  0x1c   :  { %386 = vrot.lane.b32.xlu0 %v385_v33, %s601_s26  ;;  %567 = vst.msk [vmem:[%s1013_s1 + $0x65] sm:$0x2] %vm161_vm0, %v292_v34   ;;  %568 = vst.msk [vmem:[%s1013_s1 + $0x28] sm:$0x1] %vm161_vm0, %v299_v35   ;;  %v313_v40 = vld [vmem:[#allocation0 + $0xb0] sm:$0x3]  }
  0x1d   :  { %569 = vst.msk [vmem:[%s1013_s1 + $0x67] sm:$0x2] %vm161_vm0, %v299_v35   ;;  %570 = vst.msk [vmem:[%s1013_s1 + $0x2a] sm:$0x1] %vm161_vm0, %v306_v36   ;;  %v320_v43 = vld [vmem:[#allocation0 + $0xb8] sm:$0x3]  }
  0x1e   :  { %571 = vst.msk [vmem:[%s1013_s1 + $0x69] sm:$0x2] %vm161_vm0, %v306_v36   ;;  %560 = vst.msk [vmem:[%s1013_s1 + $0x20] sm:$0x1] %vm161_vm0, %v271_v37   ;;  %v521_v51 = vld [vmem:[%s1012_s0 + $0x10] sm:$0x3] }
  0x1f   :  { %561 = vst.msk [vmem:[%s1013_s1 + $0x5f] sm:$0x2] %vm161_vm0, %v271_v37   ;;  %562 = vst.msk [vmem:[%s1013_s1 + $0x22] sm:$0x1] %vm161_vm0, %v278_v38   ;;  %v229_v53 = vld [vmem:[#allocation0 + $0x50] sm:$0x3]  }
  0x20   :  { %563 = vst.msk [vmem:[%s1013_s1 + $0x61] sm:$0x2] %vm161_vm0, %v278_v38   ;;  %564 = vst.msk [vmem:[%s1013_s1 + $0x24] sm:$0x1] %vm161_vm0, %v285_v39   ;;  %v236_v54 = vld [vmem:[#allocation0 + $0x58] sm:$0x3]  }
  0x21   :  { %565 = vst.msk [vmem:[%s1013_s1 + $0x63] sm:$0x2] %vm161_vm0, %v285_v39   ;;  %v403_v41 = vld [vmem:[#allocation0 + $0x80] ss:$8 sm:$0xf]  }
  0x22   :  { %572 = vst.msk [vmem:[%s1013_s1 + $0x2c] sm:$0x1] %vm161_vm0, %v313_v40   ;;  %573 = vst.msk [vmem:[%s1013_s1 + $0x6b] sm:$0x2] %vm161_vm0, %v313_v40   ;;  %v222_v52 = vld [vmem:[#allocation0 + $0x48] sm:$0x3]  }
  0x23   :  { %v405_v42 = vld [vmem:[#allocation0 + $0x80] ss:$8 sm:$0xf0]   ;;  %574 = vst.msk [vmem:[%s1013_s1 + $0x2e] sm:$0x1] %vm161_vm0, %v320_v43  }
  0x24   :  { %v407_v44 = vsel %vm384_vm1, %v405_v42, %v403_v41  ;;  %575 = vst.msk [vmem:[%s1013_s1 + $0x6d] sm:$0x2] %vm161_vm0, %v320_v43   ;;  %v392_v45 = vld [vmem:[#allocation0 + $0x1] ss:$8 sm:$0xf]  }
  0x25   :  { %v394_v46 = vld [vmem:[#allocation0 + $0x1] ss:$8 sm:$0xf0]   ;;  %408 = vrot.lane.b32.xlu1 %v407_v44, %s601_s26  ;;  %123 = vst [vmem:[#allocation0 + $0x40] sm:$0x3] %v521_v51 }
  0x26   :  { %v396_v47 = vsel %vm384_vm1, %v394_v46, %v392_v45  ;;  %v414_v48 = vld [vmem:[#allocation0 + $0x81] ss:$8 sm:$0xf]   ;;  %546 = vst.msk [vmem:[%s1013_s1 + $0x12] sm:$0x1] %vm161_vm0, %v222_v52  }
  0x27   :  { %v416_v49 = vld [vmem:[#allocation0 + $0x81] ss:$8 sm:$0xf0]   ;;  %397 = vrot.lane.b32.xlu0 %v396_v47, %s601_s26  ;;  %547 = vst.msk [vmem:[%s1013_s1 + $0x51] sm:$0x2] %vm161_vm0, %v222_v52  }
  0x28   :  { %v418_v50 = vsel %vm384_vm1, %v416_v49, %v414_v48  ;;  %548 = vst.msk [vmem:[%s1013_s1 + $0x14] sm:$0x1] %vm161_vm0, %v229_v53   ;;  %549 = vst.msk [vmem:[%s1013_s1 + $0x53] sm:$0x2] %vm161_vm0, %v229_v53   ;;  %v243_v55 = vld [vmem:[#allocation0 + $0x60] sm:$0x3]  }
  0x29   :  { %550 = vst.msk [vmem:[%s1013_s1 + $0x16] sm:$0x1] %vm161_vm0, %v236_v54   ;;  %551 = vst.msk [vmem:[%s1013_s1 + $0x55] sm:$0x2] %vm161_vm0, %v236_v54   ;;  %v250_v56 = vld [vmem:[#allocation0 + $0x68] sm:$0x3]   ;;  %419 = vrot.lane.b32.xlu1 %v418_v50, %s601_s26 }
  0x2a   :  { %v257_v57 = vld [vmem:[#allocation0 + $0x70] sm:$0x3]   ;;  %552 = vst.msk [vmem:[%s1013_s1 + $0x18] sm:$0x1] %vm161_vm0, %v243_v55   ;;  %553 = vst.msk [vmem:[%s1013_s1 + $0x57] sm:$0x2] %vm161_vm0, %v243_v55  }
  0x2b   :  { %554 = vst.msk [vmem:[%s1013_s1 + $0x1a] sm:$0x1] %vm161_vm0, %v250_v56   ;;  %555 = vst.msk [vmem:[%s1013_s1 + $0x59] sm:$0x2] %vm161_vm0, %v250_v56   ;;  %v264_v58 = vld [vmem:[#allocation0 + $0x78] sm:$0x3]  }
  0x2c   :  { %556 = vst.msk [vmem:[%s1013_s1 + $0x1c] sm:$0x1] %vm161_vm0, %v257_v57   ;;  %557 = vst.msk [vmem:[%s1013_s1 + $0x5b] sm:$0x2] %vm161_vm0, %v257_v57   ;;  %v498_v60 = vld [vmem:[%s1012_s0 + $0x3e] sm:$0x3] }
  0x2d   :  { %v427_v59 = vld [vmem:[#allocation0 + $0x40] ss:$8 sm:$0xf0]   ;;  %558 = vst.msk [vmem:[%s1013_s1 + $0x1e] sm:$0x1] %vm161_vm0, %v264_v58  }
  0x2e   :  { %559 = vst.msk [vmem:[%s1013_s1 + $0x5d] sm:$0x2] %vm161_vm0, %v264_v58   ;;  %v499_v61 = vld [vmem:[%s1012_s0 + $0x3c] sm:$0x3]  ;;  %v500_v62 = vld [vmem:[%s1012_s0 + $0x3a] sm:$0x3] }
  0x2f   :  { %8 = vst [vmem:[#allocation0 + $0xf8] sm:$0x3] %v498_v60  ;;  %13 = vst [vmem:[#allocation0 + $0xf0] sm:$0x3] %v499_v61  ;;  %v501_v63 = vld [vmem:[%s1012_s0 + $0x38] sm:$0x3] }
  0x30   :  { %18 = vst [vmem:[#allocation0 + $0xe8] sm:$0x3] %v500_v62  ;;  %v502_v0 = vld [vmem:[%s1012_s0 + $0x36] sm:$0x3]  ;;  %v503_v1 = vld [vmem:[%s1012_s0 + $0x34] sm:$0x3] }
  0x31   :  { %23 = vst [vmem:[#allocation0 + $0xe0] sm:$0x3] %v501_v63  ;;  %28 = vst [vmem:[#allocation0 + $0xd8] sm:$0x3] %v502_v0  ;;  %v504_v2 = vld [vmem:[%s1012_s0 + $0x32] sm:$0x3] }
  0x32   :  { %33 = vst [vmem:[#allocation0 + $0xd0] sm:$0x3] %v503_v1  ;;  %v505_v3 = vld [vmem:[%s1012_s0 + $0x30] sm:$0x3]  ;;  %38 = vst [vmem:[#allocation0 + $0xc8] sm:$0x3] %v504_v2 }
  0x33   :  { %v438_v4 = vld [vmem:[#allocation0 + $0x41] ss:$8 sm:$0xf0]   ;;  %43 = vst [vmem:[#allocation0 + $0xc0] sm:$0x3] %v505_v3 }
  0x34   :  { %v425_v5 = vld [vmem:[#allocation0 + $0x40] ss:$8 sm:$0xf]   ;;  %v436_v8 = vld [vmem:[#allocation0 + $0x41] ss:$8 sm:$0xf]  }
  0x35   :  { %v215_v6 = vld [vmem:[#allocation0 + $0x40] sm:$0x3]   ;;  %v429_v7 = vsel %vm384_vm1, %v427_v59, %v425_v5  ;;  %v440_v9 = vsel %vm384_vm1, %v438_v4, %v436_v8 }
  0x36   :  { %544 = vst.msk [vmem:[%s1013_s1 + $0x10] sm:$0x1] %vm161_vm0, %v215_v6   ;;  %545 = vst.msk [vmem:[%s1013_s1 + $0x4f] sm:$0x2] %vm161_vm0, %v215_v6   ;;  %430 = vrot.lane.b32.xlu0 %v429_v7, %s601_s26  ;;  %441 = vrot.lane.b32.xlu1 %v440_v9, %s601_s26  ;;  %v369_v11 = vld [vmem:[#allocation0 + $0xf0] sm:$0x3]  }
  0x37   :  { %v362_v10 = vld [vmem:[#allocation0 + $0xe8] sm:$0x3]   ;;  %v376_v12 = vld [vmem:[#allocation0 + $0xf8] sm:$0x3]   ;;  %588 = vst.msk [vmem:[%s1013_s1 + $0x3c] sm:$0x1] %vm161_vm0, %v369_v11  }
  0x38   :  { %v348_v14 = vld [vmem:[#allocation0 + $0xd8] sm:$0x3]   ;;  %v355_v15 = vld [vmem:[#allocation0 + $0xe0] sm:$0x3]   ;;  %586 = vst.msk [vmem:[%s1013_s1 + $0x3a] sm:$0x1] %vm161_vm0, %v362_v10  }
  0x39   :  { %v341_v13 = vld [vmem:[#allocation0 + $0xd0] sm:$0x3]   ;;  %587 = vst.msk [vmem:[%s1013_s1 + $0x79] sm:$0x2] %vm161_vm0, %v362_v10   ;;  %589 = vst.msk [vmem:[%s1013_s1 + $0x7b] sm:$0x2] %vm161_vm0, %v369_v11  }
  0x3a   :  { %590 = vst.msk [vmem:[%s1013_s1 + $0x3e] sm:$0x1] %vm161_vm0, %v376_v12   ;;  %591 = vst.msk [vmem:[%s1013_s1 + $0x7d] sm:$0x2] %vm161_vm0, %v376_v12   ;;  %v327_v16 = vld [vmem:[#allocation0 + $0xc0] sm:$0x3]  }
  0x3b   :  { %v334_v17 = vld [vmem:[#allocation0 + $0xc8] sm:$0x3]   ;;  %580 = vst.msk [vmem:[%s1013_s1 + $0x34] sm:$0x1] %vm161_vm0, %v341_v13   ;;  %581 = vst.msk [vmem:[%s1013_s1 + $0x73] sm:$0x2] %vm161_vm0, %v341_v13  }
  0x3c   :  { %582 = vst.msk [vmem:[%s1013_s1 + $0x36] sm:$0x1] %vm161_vm0, %v348_v14   ;;  %583 = vst.msk [vmem:[%s1013_s1 + $0x75] sm:$0x2] %vm161_vm0, %v348_v14  }
  0x3d   :  { %584 = vst.msk [vmem:[%s1013_s1 + $0x38] sm:$0x1] %vm161_vm0, %v355_v15   ;;  %585 = vst.msk [vmem:[%s1013_s1 + $0x77] sm:$0x2] %vm161_vm0, %v355_v15  }
  0x3e   :  { %576 = vst.msk [vmem:[%s1013_s1 + $0x30] sm:$0x1] %vm161_vm0, %v327_v16   ;;  %577 = vst.msk [vmem:[%s1013_s1 + $0x6f] sm:$0x2] %vm161_vm0, %v327_v16  }
  0x3f   :  { %578 = vst.msk [vmem:[%s1013_s1 + $0x32] sm:$0x1] %vm161_vm0, %v334_v17   ;;  %579 = vst.msk [vmem:[%s1013_s1 + $0x71] sm:$0x2] %vm161_vm0, %v334_v17  }
  0x40   :  { %v458_v18 = vld [vmem:[#allocation0 + $0xc1] ss:$8 sm:$0xf]   ;;  %v447_v21 = vld [vmem:[#allocation0 + $0xc0] ss:$8 sm:$0xf]  }
  0x41   :  { %v460_v19 = vld [vmem:[#allocation0 + $0xc1] ss:$8 sm:$0xf0]   ;;  %v449_v22 = vld [vmem:[#allocation0 + $0xc0] ss:$8 sm:$0xf0]  }
  0x42   :  { %v462_v20 = vsel %vm384_vm1, %v460_v19, %v458_v18  ;;  %v451_v23 = vsel %vm384_vm1, %v449_v22, %v447_v21 }
  0x43   :  { %463 = vrot.lane.b32.xlu1 %v462_v20, %s601_s26  ;;  %452 = vrot.lane.b32.xlu0 %v451_v23, %s601_s26 }
  0x8e   :  { %v387_v24 = vpop.permute.xlu0 %386  }
  0x8f   :  { %592 = vst.msk [vmem:[%s1013_s1 + $0x1] ss:$2 sm:$0xff] %vm161_vm0, %v387_v24  }
  0x97   :  { %v409_v25 = vpop.permute.xlu1 %408  }
  0x98   :  { %594 = vst.msk [vmem:[%s1013_s1 + $0x21] ss:$2 sm:$0xff] %vm161_vm0, %v409_v25  }
  0x99   :  { %v398_v26 = vpop.permute.xlu0 %397  }
  0x9a   :  { %593 = vst.msk [vmem:[%s1013_s1 + $0x41] ss:$2 sm:$0xff] %vm161_vm0, %v398_v26  }
  0x9b   :  { %v420_v27 = vpop.permute.xlu1 %419  }
  0x9c   :  { %595 = vst.msk [vmem:[%s1013_s1 + $0x61] ss:$2 sm:$0xff] %vm161_vm0, %v420_v27  }
  0xa8   :  { %v431_v28 = vpop.permute.xlu0 %430   ;;  %v442_v29 = vpop.permute.xlu1 %441  }
  0xa9   :  { %596 = vst.msk [vmem:[%s1013_s1 + $0x11] ss:$2 sm:$0xff] %vm161_vm0, %v431_v28   ;;  %597 = vst.msk [vmem:[%s1013_s1 + $0x51] ss:$2 sm:$0xff] %vm161_vm0, %v442_v29  }
  0xb5   :  { %v464_v30 = vpop.permute.xlu1 %463   ;;  %v453_v31 = vpop.permute.xlu0 %452  }
  0xb6   :  { %599 = vst.msk [vmem:[%s1013_s1 + $0x71] ss:$2 sm:$0xff] %vm161_vm0, %v464_v30   ;;  %598 = vst.msk [vmem:[%s1013_s1 + $0x31] ss:$2 sm:$0xff] %vm161_vm0, %v453_v31  }

// kernel: pointnet_rel_classifier_forward.3
= control target key start
LH: loop header
LB: loop body
LE: loop exit
PB: predicated region body
PF: predicated region fallthrough
CT: control target
= control target key end

     0   :  { %s2233_s0 = inlined_call_operand.vmem [shape: bf16[2,32,128], index: 0, kind: input, shape index: {}]   ;;  %s2234_s1 = inlined_call_operand.vmem [shape: bf16[128,128], index: 1, kind: input, shape index: {}]   ;;  %s2235_s2 = inlined_call_operand.vmem [shape: f32[1,128], index: 2, kind: input, shape index: {}]   ;;  %s2236_s3 = inlined_call_operand.hbm [shape: bf16[128,128], index: 3, kind: input, shape index: {}]   ;;  %s2237_s4 = inlined_call_operand.vmem [shape: f32[1,128], index: 4, kind: input, shape index: {}]   ;;  %s2238_s5 = inlined_call_operand.vmem [shape: bf16[128,256], index: 5, kind: input, shape index: {}]   ;;  %s2239_s6 = inlined_call_operand.vmem [shape: f32[1,256], index: 6, kind: input, shape index: {}]   ;;  %s2240_s7 = inlined_call_operand.vmem [shape: bf16[256,128], index: 7, kind: input, shape index: {}]   ;;  %s2241_s8 = inlined_call_operand.vmem [shape: f32[1,128], index: 8, kind: input, shape index: {}]   ;;  %s2242_s9 = inlined_call_operand.hbm [shape: bf16[128,128], index: 9, kind: input, shape index: {}]   ;;  %s2243_s10 = inlined_call_operand.vmem [shape: f32[1,128], index: 10, kind: input, shape index: {}]   ;;  %s2244_s11 = inlined_call_operand.hbm [shape: bf16[128,128], index: 11, kind: input, shape index: {}]   ;;  %s2245_s12 = inlined_call_operand.vmem [shape: f32[1,128], index: 12, kind: input, shape index: {}]   ;;  %s2246_s13 = inlined_call_operand.vmem [shape: f32[2,1,128], index: 13, kind: output, shape index: {}]  }
   0x1   :  { %2250 = sst [smem:[#allocation10_spill]] %s2246_s13 }
   0x2   :  { %18 = vsyncpa [#allocation3], 0 }
   0x3   :  { %19 = vsyncpa [#allocation5], 0  ;;  %s1942_s25 = smov 0  }
   0x4 LB: > { %2251 = sst [smem:[#allocation9_spill]] %s1862_s25  ;;  %s1948_s26 = sadd.s32 4294967295, %s1862_s25   ;;  %s1862_s25 = sphi %s1942_s25, %s25_s25  }
   0x5   : > { %p1421_p0 = scmp.ge.s32.totalorder %s1862_s25, 1  ;;  %p334_p1 = scmp.lt.s32.totalorder %s1862_s25, 3 }
   0x6   : > { %p2247_p2 = scmp.eq.s32.totalorder %s1948_s26, 0  ;;  %s1864_s28 = smov [#allocation4]  }
   0x7   : > { %p1953_p3 = pnand %p1421_p0, %p334_p1  ;;  %s380_s29 = sshll.u32 %s1864_s28, 4  ;;  %s381_s29 = int_to_ptr.vmem [resolvable:$true] %s380_s29 }
   0x8   : > { %s1865_s30 = smov [#allocation2]   ;;  %s1866_s16 = smov [#allocation6]  }
   0x9   : > { %s2252_s27 = scalar_select %p1953_p3, 1, 0 }
   0xa   : > { %p1658_p4 = pneg %p1953_p3  ;;  %s352_s14 = sshll.u32 %s1865_s30, 4  ;;  %s1965_s14 = int_to_ptr.vmem [resolvable:$true] %s352_s14 }
   0xb   : > { %s396_s17 = sshll.u32 %s1866_s16, 4  ;;  %s1764_s20 = scalar_lea.hbm %s2242_s9, 1024  ;;  %s1967_s17 = int_to_ptr.vmem [resolvable:$true] %s396_s17 }
   0xc   : > { %p1961_p5 = pnand %p2247_p2, %p1658_p4  ;;  %p1765_p6 = scmp.ne.s32.totalorder %s2242_s9, %s1764_s20 }
   0xd   : > { %p1771_p10 = scmp.lt.u32.totalorder %s1764_s20, %s2242_s9 }
   0xe   : > { %p1977_p7 = pneg %p1961_p5 }
  0x10   : > { %p1767_p8 = pnand %p1977_p7, %p1765_p6 }
  0x12   : > { %p1768_p9 = pneg %p1767_p8 }
  0x14   : > { %p1773_p11 = pnand %p1771_p10, %p1768_p9 }
  0x16   : > { %1776 = shalt.err (!%p1773_p11)
}
  0x17   : > { %s1777_s30 = scalar_lea.vmem %s381_s29, 1024  ;;  %p1785_p1 = scmp.lt.s32.totalorder %s381_s29, %s381_s29 }
  0x18   : > { %p1778_p12 = scmp.ne.s32.totalorder %s381_s29, %s1777_s30  ;;  %p1786_p4 = scmp.lt.s32.totalorder %s1777_s30, %s1777_s30 }
  0x1a   : > { %p1780_p13 = pnand %p1778_p12, %p1977_p7  ;;  %p1787_p2 = por %p1786_p4, %p1785_p1 }
  0x1c   : > { %p1781_p0 = pneg %p1780_p13 }
  0x1e   : > { %p1788_p3 = pnand %p1787_p2, %p1781_p0 }
  0x20   : > { %1791 = shalt.err (!%p1788_p3)
}
  0x21   : > { %s1867_s16 = smov 64   ;;  %s1868_s18 = smov 4  }
  0x22   : > { %1664 = dma.hbm_to_vmem [thread:$0]  (!%p1961_p5), %s2242_s9, 1024, %s381_s29, [#allocation5], %s1867_s16, %s1867_s16, %s1868_s18  }
  0x23   : > { %s1792_s24 = scalar_lea.hbm %s2236_s3, 1024 }
  0x24   : > { %p1793_p2 = scmp.ne.s32.totalorder %s2236_s3, %s1792_s24  ;;  %p1799_p8 = scmp.lt.u32.totalorder %s1792_s24, %s2236_s3 }
  0x26   : > { %p1795_p3 = pnand %p1793_p2, %p1977_p7 }
  0x28   : > { %p1796_p6 = pneg %p1795_p3 }
  0x2a   : > { %p1801_p9 = pnand %p1799_p8, %p1796_p6 }
  0x2c   : > { %1804 = shalt.err (!%p1801_p9)
}
  0x2d   : > { %s1805_s29 = scalar_lea.vmem %s1965_s14, 1024  ;;  %p1813_p13 = scmp.lt.s32.totalorder %s1965_s14, %s1965_s14 }
  0x2e   : > { %p1806_p10 = scmp.ne.s32.totalorder %s1965_s14, %s1805_s29  ;;  %p1814_p0 = scmp.lt.s32.totalorder %s1805_s29, %s1805_s29 }
  0x30   : > { %p1808_p11 = pnand %p1806_p10, %p1977_p7  ;;  %p1815_p1 = por %p1814_p0, %p1813_p13 }
  0x32   : > { %p1809_p12 = pneg %p1808_p11 }
  0x34   : > { %p1816_p4 = pnand %p1815_p1, %p1809_p12 }
  0x36   : > { %1819 = shalt.err (!%p1816_p4)
}
  0x37   : > { %1661 = dma.hbm_to_vmem [thread:$0]  (!%p1961_p5), %s2236_s3, 1024, %s1965_s14, [#allocation3], %s1867_s16, %s1867_s16, %s1868_s18  }
  0x38   : > { %s1820_s21 = scalar_lea.hbm %s2244_s11, 1024 }
  0x39   : > { %p1821_p2 = scmp.ne.s32.totalorder %s2244_s11, %s1820_s21  ;;  %p1827_p8 = scmp.lt.u32.totalorder %s1820_s21, %s2244_s11 }
  0x3b   : > { %p1823_p3 = pnand %p1821_p2, %p1977_p7 }
  0x3d   : > { %p1824_p6 = pneg %p1823_p3 }
  0x3f   : > { %p1829_p9 = pnand %p1827_p8, %p1824_p6 }
  0x41   : > { %1832 = shalt.err (!%p1829_p9)
}
  0x42   : > { %s1833_s14 = scalar_lea.vmem %s1967_s17, 1024  ;;  %p1841_p13 = scmp.lt.s32.totalorder %s1967_s17, %s1967_s17 }
  0x43   : > { %p1834_p10 = scmp.ne.s32.totalorder %s1967_s17, %s1833_s14  ;;  %p1842_p0 = scmp.lt.s32.totalorder %s1833_s14, %s1833_s14 }
  0x45   : > { %p1836_p11 = pnand %p1834_p10, %p1977_p7  ;;  %p1843_p1 = por %p1842_p0, %p1841_p13 }
  0x47   : > { %p1837_p12 = pneg %p1836_p11 }
  0x49   : > { %p1844_p4 = pnand %p1843_p1, %p1837_p12 }
  0x4b   : > { %1847 = shalt.err (!%p1844_p4)
}
  0x4c   : > { %1667 = dma.hbm_to_vmem [thread:$0]  (!%p1961_p5), %s2244_s11, 1024, %s1967_s17, [#allocation5], %s1867_s16, %s1867_s16, %s1868_s18  }
  0x4d   : > { %p2255_p2 = scmp.ne.s32.totalorder %s2252_s27, 0 }
  0x4e   : > { %p2256_p7 = scmp.eq.s32.totalorder (!%p2255_p2), %s1948_s26, 0 }
  0x4f   : > { %423 = sbr.rel (%p2255_p2) target bundleno = 1467 (0x5bb), region = 72 }
  0x56   : > { %1853 = dma.done.wait (%p2256_p7), [#allocation3], 1024   ;;  %p2257_p3 = pmov %p2256_p7 }
  0x58   : > { %1855 = vsyncadd (%p2257_p3), [#allocation3], 4294966272  ;;  %p2258_p6 = pmov %p2257_p3 }
  0x59   : > { %p2259_p8 = pmov %p2257_p3 }
  0x5a   : > { %1857 = dma.done.wait (%p2258_p6), [#allocation5], 2048  }
  0x5b   : > { %1859 = vsyncadd (%p2259_p8), [#allocation5], 4294965248  ;;  %p473_p9 = scmp.lt.s32.totalorder %s1948_s26, 1  ;;  %v1690_v0 = vld [vmem:[%s2234_s1] sm:$0xff]   ;;  %v1691_v1 = vld [vmem:[%s2234_s1 + $0x8] sm:$0xff]   ;;  %v1869_v49 = vmov 0  }
  0x5c   : > { %1566 = vmatprep.subr.bf16.mxu0 %v1690_v0  ;;  %v1692_v2 = vld [vmem:[%s2234_s1 + $0x10] sm:$0xff]   ;;  %v1693_v3 = vld [vmem:[%s2234_s1 + $0x18] sm:$0xff]   ;;  %v1700_v5 = vld [vmem:[#allocation2] sm:$0xff]   ;;  %vm1871_vm0 = vmmov 0   ;;  %s2260_s30 = sld [smem:[#allocation10_spill]] }
  0x5d   : > { %s2263_s26 = smov (!%p473_p9, %s1948_s26), 1  ;;  %1567 = vmatpush3.bf16.msra.mxu0 %v1690_v0  ;;  %v1701_v6 = vld [vmem:[#allocation2 + $0x8] sm:$0xff]   ;;  %v1694_v7 = vld [vmem:[%s2234_s1 + $0x20] sm:$0xff]   ;;  %1586 = vmatprep.subr.bf16.mxu1 %v1700_v5  ;;  %v1702_v8 = vld [vmem:[#allocation2 + $0x10] sm:$0xff]  }
  0x5e   : > { %s1505_s16 = sshll.u32 %s2263_s26, 4  ;;  %1568 = vmatprep.subr.bf16.mxu0 %v1691_v1  ;;  %1587 = vmatpush3.bf16.msra.mxu1 %v1700_v5  ;;  %v1695_v9 = vld [vmem:[%s2234_s1 + $0x28] sm:$0xff]   ;;  %v1703_v10 = vld [vmem:[#allocation2 + $0x18] sm:$0xff]   ;;  %v1696_v11 = vld [vmem:[%s2234_s1 + $0x30] sm:$0xff]  }
  0x5f   : > { %s2075_s21 = scalar_lea.vmem %s2233_s0, %s1505_s16  ;;  %1588 = vmatprep.subr.bf16.mxu1 %v1701_v6  ;;  %v1704_v12 = vld [vmem:[#allocation2 + $0x20] sm:$0xff]   ;;  %v1697_v13 = vld [vmem:[%s2234_s1 + $0x38] sm:$0xff]   ;;  %v1705_v14 = vld [vmem:[#allocation2 + $0x28] sm:$0xff]  }
  0x60   : > { %v1698_v4 = vld [vmem:[%s2075_s21] sm:$0xff]   ;;  %v1699_v15 = vld [vmem:[%s2075_s21 + $0x8] sm:$0xff]   ;;  %v1706_v16 = vld [vmem:[#allocation2 + $0x30] sm:$0xff]  }
  0x61   : > { %1569 = vmatpush3.bf16.msra.mxu0 %v1691_v1  ;;  %1582 = vmatprep.mubr.bf16.mxu0 %v1698_v4  ;;  %v1707_v17 = vld [vmem:[#allocation2 + $0x38] sm:$0xff]   ;;  %v1708_v18 = vld [vmem:[%s2238_s5] ss:$8 sps:$4 sm:$0xff]   ;;  %v1710_v19 = vld [vmem:[%s2238_s5 + $0x4] ss:$8 sps:$4 sm:$0xff]  }
  0x62   : > { %1570 = vmatprep.subr.bf16.mxu0 %v1692_v2  ;;  %1589 = vmatpush3.bf16.msra.mxu1 %v1701_v6  ;;  %v1713_v20 = vld [vmem:[%s2238_s5 + $0x14] ss:$8 sps:$4 sm:$0xff]   ;;  %v1711_v21 = vld [vmem:[%s2238_s5 + $0x10] ss:$8 sps:$4 sm:$0xff]   ;;  %v1716_v22 = vld [vmem:[%s2238_s5 + $0x24] ss:$8 sps:$4 sm:$0xff]   ;;  %s480_s14 = scalar_lea.vmem %s2260_s30, %s2263_s26 }
  0x63   : > { %1590 = vmatprep.subr.bf16.mxu1 %v1702_v8  ;;  %v1714_v23 = vld [vmem:[%s2238_s5 + $0x20] ss:$8 sps:$4 sm:$0xff]   ;;  %v1719_v24 = vld [vmem:[%s2238_s5 + $0x34] ss:$8 sps:$4 sm:$0xff]   ;;  %v1717_v25 = vld [vmem:[%s2238_s5 + $0x30] ss:$8 sps:$4 sm:$0xff]  }
  0x64   : > { %v1722_v26 = vld [vmem:[%s2238_s5 + $0x44] ss:$8 sps:$4 sm:$0xff]   ;;  %v1720_v27 = vld [vmem:[%s2238_s5 + $0x40] ss:$8 sps:$4 sm:$0xff]   ;;  %v1725_v28 = vld [vmem:[%s2238_s5 + $0x54] ss:$8 sps:$4 sm:$0xff]  }
  0x65   : > { %1571 = vmatpush3.bf16.msra.mxu0 %v1692_v2  ;;  %v1723_v29 = vld [vmem:[%s2238_s5 + $0x50] ss:$8 sps:$4 sm:$0xff]   ;;  %v1432_v30 = vld [vmem:[%s2235_s2] ss:$0 sm:$0xff]  ;;  %v1728_v45 = vld [vmem:[%s2238_s5 + $0x64] ss:$8 sps:$4 sm:$0xff]  }
  0x66   : > { %1572 = vmatprep.subr.bf16.mxu0 %v1693_v3  ;;  %1591 = vmatpush3.bf16.msra.mxu1 %v1702_v8  ;;  %v1726_v46 = vld [vmem:[%s2238_s5 + $0x60] ss:$8 sps:$4 sm:$0xff]   ;;  %v1731_v47 = vld [vmem:[%s2238_s5 + $0x74] ss:$8 sps:$4 sm:$0xff]   ;;  %v1729_v48 = vld [vmem:[%s2238_s5 + $0x70] ss:$8 sps:$4 sm:$0xff]  }
  0x67   : > { %1592 = vmatprep.subr.bf16.mxu1 %v1703_v10  ;;  %v1443_v50 = vld [vmem:[%s2237_s4] ss:$0 sm:$0xff]  ;;  %v1735_v4 = vld [vmem:[%s2240_s7 + $0x8] sm:$0xff]   ;;  %v1736_v5 = vld [vmem:[%s2240_s7 + $0x50] sm:$0xff]  }
  0x68   : > { %v1732_v1 = vld [vmem:[%s2240_s7 + $0x40] sm:$0xff]   ;;  %v1737_v6 = vld [vmem:[%s2240_s7 + $0x10] sm:$0xff]   ;;  %v1739_v8 = vld [vmem:[%s2240_s7 + $0x18] sm:$0xff]  }
  0x69   : > { %1573 = vmatpush3.bf16.msra.mxu0 %v1693_v3  ;;  %v1733_v2 = vld [vmem:[%s2240_s7] sm:$0xff]   ;;  %v1734_v3 = vld [vmem:[%s2240_s7 + $0x48] sm:$0xff]  }
  0x6a   : > { %1574 = vmatprep.subr.bf16.mxu0 %v1694_v7  ;;  %1593 = vmatpush3.bf16.msra.mxu1 %v1703_v10  ;;  %v1741_v10 = vld [vmem:[%s2240_s7 + $0x20] sm:$0xff]  }
  0x6b   : > { %1594 = vmatprep.subr.bf16.mxu1 %v1704_v12 }
  0x6d   : > { %1575 = vmatpush3.bf16.msra.mxu0 %v1694_v7  ;;  %v1738_v7 = vld [vmem:[%s2240_s7 + $0x58] sm:$0xff]  }
  0x6e   : > { %1576 = vmatprep.subr.bf16.mxu0 %v1695_v9  ;;  %1595 = vmatpush3.bf16.msra.mxu1 %v1704_v12  ;;  %v1743_v12 = vld [vmem:[%s2240_s7 + $0x28] sm:$0xff]  }
  0x6f   : > { %1596 = vmatprep.subr.bf16.mxu1 %v1705_v14 }
  0x71   : > { %1577 = vmatpush3.bf16.msra.mxu0 %v1695_v9  ;;  %v1740_v9 = vld [vmem:[%s2240_s7 + $0x60] sm:$0xff]  }
  0x72   : > { %1578 = vmatprep.subr.bf16.mxu0 %v1696_v11  ;;  %1597 = vmatpush3.bf16.msra.mxu1 %v1705_v14  ;;  %v1745_v14 = vld [vmem:[%s2240_s7 + $0x30] sm:$0xff]  }
  0x73   : > { %1598 = vmatprep.subr.bf16.mxu1 %v1706_v16 }
  0x75   : > { %1579 = vmatpush3.bf16.msra.mxu0 %v1696_v11  ;;  %v1742_v11 = vld [vmem:[%s2240_s7 + $0x68] sm:$0xff]  }
  0x76   : > { %1580 = vmatprep.subr.bf16.mxu0 %v1697_v13  ;;  %1599 = vmatpush3.bf16.msra.mxu1 %v1706_v16  ;;  %v1747_v16 = vld [vmem:[%s2240_s7 + $0x38] sm:$0xff]  }
  0x77   : > { %1600 = vmatprep.subr.bf16.mxu1 %v1707_v17 }
  0x79   : > { %1581 = vmatpush3.bf16.msra.mxu0 %v1697_v13  ;;  %v1744_v13 = vld [vmem:[%s2240_s7 + $0x70] sm:$0xff]  }
  0x7a   : > { %1601 = vmatpush3.bf16.msra.mxu1 %v1707_v17  ;;  %858 = vmatprep.subr.bf16.mxu0 %v1710_v19  ;;  %v1748_v17 = vld [vmem:[#allocation4] sm:$0xff]   ;;  %v1749_v19 = vld [vmem:[#allocation4 + $0x8] sm:$0xff]  }
  0x7b   : > { %1526 = vmatprep.subr.bf16.mxu1 %v1732_v1 }
  0x7c   : > { %1583 = vmatmul.mubr.bf16.vlgmr.msra.gmra.mrb[0].mxu0 %v1699_v15  ;;  %v1746_v15 = vld [vmem:[%s2240_s7 + $0x78] sm:$0xff]  }
  0x7d   : > { %859 = vmatpush1.bf16.msra.mxu0 %v1708_v18  ;;  %890 = vmatprep.mubr.bf16.mxu0 %v1869_v49  ;;  %v1870_v18 = vmov 0.0  }
  0x7e   : > { %860 = vmatprep.subr.bf16.mxu0 %v1713_v20  ;;  %v1750_v20 = vld [vmem:[#allocation4 + $0x10] sm:$0xff]  }
  0x81   : > { %861 = vmatpush1.bf16.msra.mxu0 %v1711_v21  ;;  %v1751_v21 = vld [vmem:[#allocation4 + $0x18] sm:$0xff]  }
  0x82   : > { %862 = vmatprep.subr.bf16.mxu0 %v1716_v22  ;;  %v1752_v22 = vld [vmem:[#allocation4 + $0x20] sm:$0xff]  }
  0x85   : > { %863 = vmatpush1.bf16.msra.mxu0 %v1714_v23  ;;  %v1753_v23 = vld [vmem:[#allocation4 + $0x28] sm:$0xff]  }
  0x86   : > { %864 = vmatprep.subr.bf16.mxu0 %v1719_v24  ;;  %v768_v24 = vlaneseq }
  0x89   : > { %865 = vmatpush1.bf16.msra.mxu0 %v1717_v25  ;;  %v769_v25 = vshrl.u32 %v768_v24, 7 }
  0x8a   : > { %866 = vmatprep.subr.bf16.mxu0 %v1722_v26 }
  0x8b   : > { %v770_v26 = vsub.s32 0, %v769_v25 }
  0x8d   : > { %867 = vmatpush1.bf16.msra.mxu0 %v1720_v27  ;;  %v766_v27 = vld [vmem:[%s2239_s6] sm:$0x3] }
  0x8e   : > { %868 = vmatprep.subr.bf16.mxu0 %v1725_v28 }
  0x91   : > { %869 = vmatpush1.bf16.msra.mxu0 %v1723_v29  ;;  %v774_v29 = vsub.s32 1, %v769_v25 }
  0x92   : > { %870 = vmatprep.subr.bf16.mxu0 %v1728_v45 }
  0x95   : > { %871 = vmatpush1.bf16.msra.mxu0 %v1726_v46 }
  0x96   : > { %872 = vmatprep.subr.bf16.mxu0 %v1731_v47 }
  0x99   : > { %873 = vmatpush1.bf16.msra.mxu0 %v1729_v48 }
  0x9a   : > { %1606 = vmatprep.subr.bf16.mxu0 %v1870_v18 }
 0x14f   : > { %v1584_v31 = vpop.f32.mrb[0].mxu0 }
 0x150   : > { %v612_v32 = vadd.f32 %v1584_v31, %v1432_v30  ;;  %v603_v33 = vpop.f32.mrb[1].mxu0 }
 0x151   : > { %v604_v34 = vadd.f32 %v1432_v30, %v603_v33  ;;  %v1585_v35 = vpop.f32.mrb[2].mxu0 }
 0x152   : > { %v615_v36 = vadd.f32 %v1585_v35, %v1432_v30  ;;  %v606_v37 = vpop.f32.mrb[3].mxu0  ;;  %v620_v39 = vmax.f32 %v612_v32, 0.0  ;;  %v771_v32 = vrot.slane %v766_v27, %v770_v26 }
 0x153   : > { %v607_v38 = vadd.f32 %v1432_v30, %v606_v37  ;;  %v618_v41 = vmax.f32 %v604_v34, 0.0  ;;  %v775_v34 = vrot.slane %v766_v27, %v774_v29  ;;  %v1762_v29 = vld [vmem:[#allocation6 + $0x30] sm:$0xff]  }
 0x154   : > { %v621_v40 = vmax.f32 %v615_v36, 0.0 }
 0x155   : > { %v619_v42 = vmax.f32 %v607_v38, 0.0 }
 0x156   : > { %v623_v43 = vpack.c.bf16 %v621_v40, %v620_v39 }
 0x157   : > { %v622_v44 = vpack.c.bf16 %v619_v42, %v618_v41 }
 0x159   : > { %1602 = vmatprep.mubr.bf16.mxu1 %v622_v44 }
 0x15a   : > { %1603 = vmatmul.mubr.bf16.vlgmr.msra.gmra.mrb[0].mxu1 %v623_v43 }
 0x15b   : > { %1527 = vmatpush3.bf16.msra.mxu1 %v1733_v2 }
 0x15c   : > { %1528 = vmatprep.subr.bf16.mxu1 %v1734_v3 }
 0x15f   : > { %1529 = vmatpush3.bf16.msra.mxu1 %v1735_v4 }
 0x160   : > { %1530 = vmatprep.subr.bf16.mxu1 %v1736_v5 }
 0x163   : > { %1531 = vmatpush3.bf16.msra.mxu1 %v1737_v6 }
 0x164   : > { %1532 = vmatprep.subr.bf16.mxu1 %v1738_v7 }
 0x167   : > { %1533 = vmatpush3.bf16.msra.mxu1 %v1739_v8 }
 0x168   : > { %1534 = vmatprep.subr.bf16.mxu1 %v1740_v9 }
 0x16b   : > { %1535 = vmatpush3.bf16.msra.mxu1 %v1741_v10 }
 0x16c   : > { %1536 = vmatprep.subr.bf16.mxu1 %v1742_v11  ;;  %v1754_v11 = vld [vmem:[#allocation4 + $0x30] sm:$0xff]  }
 0x16f   : > { %1537 = vmatpush3.bf16.msra.mxu1 %v1743_v12  ;;  %v1755_v12 = vld [vmem:[#allocation4 + $0x38] sm:$0xff]  }
 0x170   : > { %1538 = vmatprep.subr.bf16.mxu1 %v1744_v13  ;;  %v1756_v13 = vld [vmem:[#allocation6] sm:$0xff]  }
 0x173   : > { %1539 = vmatpush3.bf16.msra.mxu1 %v1745_v14  ;;  %v1757_v14 = vld [vmem:[#allocation6 + $0x8] sm:$0xff]  }
 0x174   : > { %1540 = vmatprep.subr.bf16.mxu1 %v1746_v15  ;;  %v1758_v15 = vld [vmem:[#allocation6 + $0x10] sm:$0xff]  }
 0x177   : > { %1541 = vmatpush3.bf16.msra.mxu1 %v1747_v16  ;;  %v1759_v16 = vld [vmem:[#allocation6 + $0x18] sm:$0xff]  }
 0x178   : > { %1626 = vmatprep.subr.bf16.mxu1 %v1870_v18 }
 0x22d   : > { %v1604_v51 = vpop.f32.mrb[0].mxu1 }
 0x22e   : > { %v738_v52 = vadd.f32 %v1604_v51, %v1443_v50  ;;  %v729_v53 = vpop.f32.mrb[1].mxu1 }
 0x22f   : > { %v730_v54 = vadd.f32 %v1443_v50, %v729_v53  ;;  %v1605_v55 = vpop.f32.mrb[2].mxu1 }
 0x230   : > { %v741_v56 = vadd.f32 %v1605_v55, %v1443_v50  ;;  %v732_v57 = vpop.f32.mrb[3].mxu1  ;;  %v746_v59 = vmax.f32 %v738_v52, 0.0 }
 0x231   : > { %v733_v58 = vadd.f32 %v1443_v50, %v732_v57  ;;  %v744_v61 = vmax.f32 %v730_v54, 0.0 }
 0x232   : > { %v747_v60 = vmax.f32 %v741_v56, 0.0 }
 0x233   : > { %v745_v62 = vmax.f32 %v733_v58, 0.0 }
 0x234   : > { %v749_v63 = vpack.c.bf16 %v747_v60, %v746_v59 }
 0x235   : > { %v748_v0 = vpack.c.bf16 %v745_v62, %v744_v61 }
 0x237   : > { %891 = vmatmul.mubr.bf16.vlgmr.msra.gmra.mrb[4].mxu0 %v748_v0 }
 0x238   : > { %900 = vmatprep.mubr.bf16.mxu0 %v1869_v49  ;;  %1607 = vmatpush3.bf16.msra.mxu0 %v1748_v17  ;;  %v1760_v17 = vld [vmem:[#allocation6 + $0x20] sm:$0xff]  }
 0x239   : > { %1608 = vmatprep.subr.bf16.mxu0 %v1870_v18 }
 0x23c   : > { %1609 = vmatpush3.bf16.msra.mxu0 %v1749_v19  ;;  %v1761_v19 = vld [vmem:[#allocation6 + $0x28] sm:$0xff]  }
 0x23d   : > { %1610 = vmatprep.subr.bf16.mxu0 %v1870_v18 }
 0x23f   : > { %901 = vmatmul.mubr.bf16.gmra.mrb[8].mxu0 %v749_v63 }
 0x240   : > { %1611 = vmatpush3.bf16.msra.mxu0 %v1750_v20  ;;  %1622 = vmatprep.mubr.msk.bf16.mxu0 %vm1871_vm0, %v1870_v18 }
 0x241   : > { %1612 = vmatprep.subr.bf16.mxu0 %v1870_v18 }
 0x244   : > { %1613 = vmatpush3.bf16.msra.mxu0 %v1751_v21  ;;  %v1468_v21 = vld [vmem:[%s2241_s8] ss:$0 sm:$0xff] }
 0x245   : > { %1614 = vmatprep.subr.bf16.mxu0 %v1870_v18 }
 0x248   : > { %1615 = vmatpush3.bf16.msra.mxu0 %v1752_v22 }
 0x249   : > { %1616 = vmatprep.subr.bf16.mxu0 %v1870_v18 }
 0x24c   : > { %1617 = vmatpush3.bf16.msra.mxu0 %v1753_v23 }
 0x24d   : > { %1618 = vmatprep.subr.bf16.mxu0 %v1870_v18 }
 0x250   : > { %1619 = vmatpush3.bf16.msra.mxu0 %v1754_v11 }
 0x251   : > { %1620 = vmatprep.subr.bf16.mxu0 %v1870_v18 }
 0x254   : > { %1621 = vmatpush3.bf16.msra.mxu0 %v1755_v12 }
 0x30a   : > { %v892_v28 = vpop.f32.mrb[4].mxu0 }
 0x30b   : > { %v894_v30 = vpop.f32.mrb[5].mxu0  ;;  %v893_v35 = vadd.f32 %v892_v28, %v771_v32 }
 0x30c   : > { %v896_v31 = vpop.f32.mrb[6].mxu0  ;;  %v895_v36 = vadd.f32 %v894_v30, %v775_v34  ;;  %v1763_v30 = vld [vmem:[#allocation6 + $0x38] sm:$0xff]  }
 0x30d   : > { %v898_v33 = vpop.f32.mrb[7].mxu0  ;;  %v897_v38 = vadd.f32 %v896_v31, %v771_v32  ;;  %v911_v44 = vmax.f32 %v893_v35, 0.0  ;;  %v1485_v31 = vld [vmem:[%s2243_s10] ss:$0 sm:$0xff] }
 0x30e   : > { %v899_v41 = vadd.f32 %v898_v33, %v775_v34  ;;  %v912_v48 = vmax.f32 %v895_v36, 0.0 }
 0x30f   : > { %v913_v51 = vmax.f32 %v897_v38, 0.0 }
 0x310   : > { %v914_v54 = vmax.f32 %v899_v41, 0.0 }
 0x312   : > { %v902_v37 = vpop.f32.mrb[8].mxu0 }
 0x313   : > { %v903_v39 = vadd.f32 %v902_v37, %v771_v32  ;;  %v904_v40 = vpop.f32.mrb[9].mxu0 }
 0x314   : > { %v905_v42 = vadd.f32 %v904_v40, %v775_v34  ;;  %v906_v43 = vpop.f32.mrb[10].mxu0 }
 0x315   : > { %v915_v45 = vmax.f32 %v903_v39, 0.0  ;;  %v907_v46 = vadd.f32 %v906_v43, %v771_v32  ;;  %v908_v47 = vpop.f32.mrb[11].mxu0  ;;  %v1494_v39 = vld [vmem:[%s2245_s12] ss:$0 sm:$0xff] }
 0x316   : > { %v916_v49 = vmax.f32 %v905_v42, 0.0  ;;  %v909_v50 = vadd.f32 %v908_v47, %v775_v34 }
 0x317   : > { %v919_v52 = vmax.f32 %v911_v44, %v915_v45  ;;  %v917_v53 = vmax.f32 %v907_v46, 0.0 }
 0x318   : > { %v928_v55 = vmax.f32 %v912_v48, %v916_v49  ;;  %v918_v56 = vmax.f32 %v909_v50, 0.0 }
 0x319   : > { %v920_v57 = vmax.f32 %v913_v51, %v917_v53 }
 0x31a   : > { %v929_v58 = vmax.f32 %v914_v54, %v918_v56 }
 0x31b   : > { %v921_v59 = vmax.f32 %v919_v52, %v920_v57 }
 0x31c   : > { %v930_v60 = vmax.f32 %v928_v55, %v929_v58 }
 0x31d   : > { %v922_v61 = vrot.slane %v921_v59, 4 }
 0x31e   : > { %v931_v62 = vrot.slane %v930_v60, 4 }
 0x31f   : > { %v923_v63 = vmax.f32 %v921_v59, %v922_v61 }
 0x320   : > { %v932_v0 = vmax.f32 %v930_v60, %v931_v62 }
 0x321   : > { %v924_v1 = vrot.slane %v923_v63, 2 }
 0x322   : > { %v933_v2 = vrot.slane %v932_v0, 2 }
 0x323   : > { %v925_v3 = vmax.f32 %v923_v63, %v924_v1 }
 0x324   : > { %v934_v4 = vmax.f32 %v932_v0, %v933_v2 }
 0x325   : > { %v926_v5 = vrot.slane %v925_v3, 1 }
 0x326   : > { %v935_v6 = vrot.slane %v934_v4, 1 }
 0x327   : > { %v927_v7 = vmax.f32 %v925_v3, %v926_v5 }
 0x328   : > { %v936_v8 = vmax.f32 %v934_v4, %v935_v6 }
 0x329   : > { %v937_v10 = vpack.c.bf16 %v927_v7, %v927_v7 }
 0x32a   : > { %v938_v9 = vpack.c.bf16 %v936_v8, %v936_v8 }
 0x32c   : > { %1106 = vmatprep.mubr.bf16.mxu1 %v938_v9 }
 0x32d   : > { %1107 = vmatmul.mubr.bf16.vlgmr.msra.gmra.mrb[4].mxu1 %v937_v10 }
 0x32e   : > { %1642 = vmatprep.mubr.msk.bf16.mxu1 %vm1871_vm0, %v1870_v18  ;;  %1627 = vmatpush3.bf16.msra.mxu1 %v1756_v13 }
 0x32f   : > { %1628 = vmatprep.subr.bf16.mxu1 %v1870_v18 }
 0x332   : > { %1629 = vmatpush3.bf16.msra.mxu1 %v1757_v14 }
 0x333   : > { %1630 = vmatprep.subr.bf16.mxu1 %v1870_v18 }
 0x336   : > { %1631 = vmatpush3.bf16.msra.mxu1 %v1758_v15 }
 0x337   : > { %1632 = vmatprep.subr.bf16.mxu1 %v1870_v18 }
 0x33a   : > { %1633 = vmatpush3.bf16.msra.mxu1 %v1759_v16 }
 0x33b   : > { %1634 = vmatprep.subr.bf16.mxu1 %v1870_v18 }
 0x33e   : > { %1635 = vmatpush3.bf16.msra.mxu1 %v1760_v17 }
 0x33f   : > { %1636 = vmatprep.subr.bf16.mxu1 %v1870_v18 }
 0x342   : > { %1637 = vmatpush3.bf16.msra.mxu1 %v1761_v19 }
 0x343   : > { %1638 = vmatprep.subr.bf16.mxu1 %v1870_v18 }
 0x346   : > { %1639 = vmatpush3.bf16.msra.mxu1 %v1762_v29 }
 0x347   : > { %1640 = vmatprep.subr.bf16.mxu1 %v1870_v18 }
 0x34a   : > { %1641 = vmatpush3.bf16.msra.mxu1 %v1763_v30 }
 0x400   : > { %v1542_v20 = vpop.f32.mrb[4].mxu1 }
 0x401   : > { %v1543_v22 = vpop.f32.mrb[5].mxu1 }
 0x402   : > { %v1544_v23 = vadd.f32 %v1543_v22, %v1542_v20  ;;  %v1545_v24 = vpop.f32.mrb[6].mxu1 }
 0x403   : > { %v1546_v25 = vpop.f32.mrb[7].mxu1 }
 0x404   : > { %v1109_v26 = vadd.f32 %v1544_v23, %v1468_v21 }
 0x406   : > { %v1114_v27 = vmax.f32 %v1109_v26, 0.0 }
 0x408   : > { %v1115_v28 = vpack.c.bf16 %v1114_v27, %v1114_v27 }
 0x40a   : > { %1623 = vmatmul.mubr.bf16.vlgmr.msra.gmra.mrb[12].mxu0 %v1115_v28 }
 0x4dd   : > { %v1221_v32 = vpop.f32.mrb[12].mxu0 }
 0x4de   : > { %v1222_v33 = vadd.f32 %v1485_v31, %v1221_v32  ;;  %v1624_v34 = vpop.f32.mrb[13].mxu0 }
 0x4df   : > { %v1224_v35 = vpop.f32.mrb[14].mxu0 }
 0x4e0   : > { %v1227_v36 = vmax.f32 %v1222_v33, 0.0  ;;  %v1625_v37 = vpop.f32.mrb[15].mxu0 }
 0x4e2   : > { %v1228_v38 = vpack.c.bf16 %v1227_v36, %v1227_v36 }
 0x4e4   : > { %1643 = vmatmul.mubr.bf16.vlgmr.msra.gmra.mrb[8].mxu1 %v1228_v38 }
 0x5b7   : > { %v1334_v18 = vpop.f32.mrb[8].mxu1 }
 0x5b8   : > { %v1335_v40 = vadd.f32 %v1494_v39, %v1334_v18  ;;  %v1644_v41 = vpop.f32.mrb[9].mxu1 }
 0x5b9   : > { %v1337_v42 = vpop.f32.mrb[10].mxu1 }
 0x5ba   : > { %1340 = vst [vmem:[%s480_s14] sm:$0x1] %v1335_v40  ;;  %v1645_v43 = vpop.f32.mrb[11].mxu1 }
 0x5bb PF: > { %s2261_s29 = sld [smem:[#allocation9_spill]] }
 0x5c1   : > { %s25_s25 = sadd.s32 1, %s2261_s29  }
 0x5c2   : > { %p22_p5 = scmp.ge.s32.totalorder %s25_s25, 4  }
 0x5c4   :  { %24 = sbr.rel (!%p22_p5) target bundleno = 4 (0x4), region = 115 }
 0x5cb   :  { %1358 = vsyncpa [#allocation3], 1 }
 0x5cc   :  { %1360 = vsyncpa [#allocation3 + $0x1], 1 }
 0x5cd   :  { %1361 = vsyncpa [#allocation5], 1 }

// kernel: pointnet_rel_classifier_forward.5
= control target key start
LH: loop header
LB: loop body
LE: loop exit
PB: predicated region body
PF: predicated region fallthrough
CT: control target
= control target key end

     0   :  { %s1714_s21 = smov 0   ;;  %s1954_s0 = inlined_call_operand.vmem [shape: bf16[2,32,128], index: 0, kind: input, shape index: {}]   ;;  %s1955_s1 = inlined_call_operand.vmem [shape: bf16[2,128,128], index: 1, kind: input, shape index: {}]   ;;  %s1956_s2 = inlined_call_operand.vmem [shape: bf16[128,128], index: 2, kind: input, shape index: {}]   ;;  %s1957_s3 = inlined_call_operand.vmem [shape: f32[1,128], index: 3, kind: input, shape index: {}]   ;;  %s1958_s4 = inlined_call_operand.vmem [shape: bf16[128,256], index: 4, kind: input, shape index: {}]   ;;  %s1959_s5 = inlined_call_operand.vmem [shape: f32[1,256], index: 5, kind: input, shape index: {}]   ;;  %s1960_s6 = inlined_call_operand.vmem [shape: bf16[256,128], index: 6, kind: input, shape index: {}]   ;;  %s1961_s7 = inlined_call_operand.vmem [shape: f32[1,128], index: 7, kind: input, shape index: {}]   ;;  %s1962_s8 = inlined_call_operand.vmem [shape: bf16[128,128], index: 8, kind: input, shape index: {}]   ;;  %s1963_s9 = inlined_call_operand.vmem [shape: f32[1,128], index: 9, kind: input, shape index: {}]   ;;  %s1964_s10 = inlined_call_operand.vmem [shape: bf16[128,128], index: 10, kind: input, shape index: {}]   ;;  %s1965_s11 = inlined_call_operand.vmem [shape: f32[1,128], index: 11, kind: input, shape index: {}]   ;;  %s1966_s12 = inlined_call_operand.vmem [shape: f32[2,1,128], index: 12, kind: output, shape index: {}]  }
   0x1 LB: > { %s1330_s22 = sadd.s32 4294967295, %s1644_s21   ;;  %p1334_p0 = scmp.ge.s32.totalorder %s1644_s21, 1  ;;  %s1644_s21 = sphi %s1714_s21, %s22_s21  }
   0x2   : > { %p372_p1 = scmp.lt.s32.totalorder %s1644_s21, 3 }
   0x4   : > { %p373_p2 = pnand %p1334_p0, %p372_p1 }
   0x5   : > { %p417_p3 = scmp.lt.s32.totalorder (!%p373_p2), %s1330_s22, 1  ;;  %v1574_v0 = vld [vmem:[%s1956_s2] sm:$0xff] (!%p373_p2)   ;;  %v1575_v1 = vld [vmem:[%s1956_s2 + $0x8] sm:$0xff] (!%p373_p2)   ;;  %v1576_v2 = vld [vmem:[%s1956_s2 + $0x10] sm:$0xff] (!%p373_p2)   ;;  %v1646_v40 = vmov (!%p373_p2), 0   ;;  %vm1648_vm0 = vmmov (!%p373_p2), 0  }
   0x6   : > { %376 = sbr.rel (%p373_p2) target bundleno = 1386 (0x56a), region = 68  ;;  %1493 = vmatprep.subr.bf16.mxu1 (!%p373_p2), %v1574_v0  ;;  %v1577_v5 = vld [vmem:[%s1956_s2 + $0x18] sm:$0xff] (!%p373_p2)   ;;  %v1578_v7 = vld [vmem:[%s1956_s2 + $0x20] sm:$0xff] (!%p373_p2)   ;;  %v1579_v10 = vld [vmem:[%s1956_s2 + $0x28] sm:$0xff] (!%p373_p2)  }
   0x7   : > { %1494 = vmatpush3.bf16.msra.mxu1 (!%p373_p2), %v1574_v0  ;;  %v1580_v12 = vld [vmem:[%s1956_s2 + $0x30] sm:$0xff] (!%p373_p2)   ;;  %v1581_v17 = vld [vmem:[%s1956_s2 + $0x38] sm:$0xff] (!%p373_p2)   ;;  %v1582_v18 = vld [vmem:[%s1958_s4] ss:$8 sps:$4 sm:$0xff] (!%p373_p2)  }
   0x8   : > { %1495 = vmatprep.subr.bf16.mxu1 (!%p373_p2), %v1575_v1  ;;  %v1584_v19 = vld [vmem:[%s1958_s4 + $0x4] ss:$8 sps:$4 sm:$0xff] (!%p373_p2)   ;;  %v1587_v20 = vld [vmem:[%s1958_s4 + $0x14] ss:$8 sps:$4 sm:$0xff] (!%p373_p2)   ;;  %v1585_v21 = vld [vmem:[%s1958_s4 + $0x10] ss:$8 sps:$4 sm:$0xff] (!%p373_p2)  }
   0x9   : > { %v1590_v22 = vld [vmem:[%s1958_s4 + $0x24] ss:$8 sps:$4 sm:$0xff] (!%p373_p2)   ;;  %v1588_v23 = vld [vmem:[%s1958_s4 + $0x20] ss:$8 sps:$4 sm:$0xff] (!%p373_p2)   ;;  %v1593_v24 = vld [vmem:[%s1958_s4 + $0x34] ss:$8 sps:$4 sm:$0xff] (!%p373_p2)  }
   0xa   : > { %v1591_v25 = vld [vmem:[%s1958_s4 + $0x30] ss:$8 sps:$4 sm:$0xff] (!%p373_p2)   ;;  %v1596_v26 = vld [vmem:[%s1958_s4 + $0x44] ss:$8 sps:$4 sm:$0xff] (!%p373_p2)   ;;  %v1594_v27 = vld [vmem:[%s1958_s4 + $0x40] ss:$8 sps:$4 sm:$0xff] (!%p373_p2)  }
   0xb   : > { %1496 = vmatpush3.bf16.msra.mxu1 (!%p373_p2), %v1575_v1  ;;  %v1599_v28 = vld [vmem:[%s1958_s4 + $0x54] ss:$8 sps:$4 sm:$0xff] (!%p373_p2)   ;;  %v1597_v29 = vld [vmem:[%s1958_s4 + $0x50] ss:$8 sps:$4 sm:$0xff] (!%p373_p2)   ;;  %v1602_v36 = vld [vmem:[%s1958_s4 + $0x64] ss:$8 sps:$4 sm:$0xff] (!%p373_p2)  }
   0xc   : > { %1497 = vmatprep.subr.bf16.mxu1 (!%p373_p2), %v1576_v2  ;;  %v1600_v37 = vld [vmem:[%s1958_s4 + $0x60] ss:$8 sps:$4 sm:$0xff] (!%p373_p2)   ;;  %v1605_v38 = vld [vmem:[%s1958_s4 + $0x74] ss:$8 sps:$4 sm:$0xff] (!%p373_p2)   ;;  %v1603_v39 = vld [vmem:[%s1958_s4 + $0x70] ss:$8 sps:$4 sm:$0xff] (!%p373_p2)  }
   0xd   : > { %s1968_s22 = smov (!%p417_p3, %s1330_s22), 1  ;;  %v1349_v41 = vld [vmem:[%s1957_s3] ss:$0 sm:$0xff]  ;;  %v1608_v58 = vld [vmem:[%s1960_s6 + $0x48] sm:$0xff]   ;;  %v1610_v60 = vld [vmem:[%s1960_s6 + $0x50] sm:$0xff]  }
   0xe   : > { %s1412_s27 = sshll.u32 %s1968_s22, 6  ;;  %s1411_s15 = sshll.u32 %s1968_s22, 4  ;;  %v1606_v56 = vld [vmem:[%s1960_s6 + $0x40] sm:$0xff]   ;;  %v1609_v59 = vld [vmem:[%s1960_s6 + $0x8] sm:$0xff]   ;;  %v1611_v61 = vld [vmem:[%s1960_s6 + $0x10] sm:$0xff]  }
   0xf   : > { %s1737_s14 = scalar_lea.vmem %s1955_s1, %s1412_s27  ;;  %s1749_s20 = scalar_lea.vmem %s1954_s0, %s1411_s15  ;;  %1498 = vmatpush3.bf16.msra.mxu1 %v1576_v2  ;;  %v1607_v57 = vld [vmem:[%s1960_s6] sm:$0xff]   ;;  %v1612_v62 = vld [vmem:[%s1960_s6 + $0x58] sm:$0xff]   ;;  %v1616_v2 = vld [vmem:[%s1960_s6 + $0x68] sm:$0xff]  }
  0x10   : > { %v1564_v3 = vld [vmem:[%s1737_s14] sm:$0xff]   ;;  %v1565_v4 = vld [vmem:[%s1737_s14 + $0x8] sm:$0xff]   ;;  %v1566_v6 = vld [vmem:[%s1737_s14 + $0x10] sm:$0xff]   ;;  %1499 = vmatprep.subr.bf16.mxu1 %v1577_v5  ;;  %s429_s27 = scalar_lea.vmem %s1966_s12, %s1968_s22 }
  0x11   : > { %1473 = vmatprep.subr.bf16.mxu0 %v1564_v3  ;;  %v1567_v8 = vld [vmem:[%s1737_s14 + $0x18] sm:$0xff]   ;;  %v1572_v9 = vld [vmem:[%s1749_s20] sm:$0xff]   ;;  %v1569_v13 = vld [vmem:[%s1737_s14 + $0x28] sm:$0xff]  }
  0x12   : > { %1474 = vmatpush3.bf16.msra.mxu0 %v1564_v3  ;;  %1489 = vmatprep.mubr.bf16.mxu0 %v1572_v9  ;;  %v1568_v11 = vld [vmem:[%s1737_s14 + $0x20] sm:$0xff]   ;;  %v1570_v14 = vld [vmem:[%s1737_s14 + $0x30] sm:$0xff]   ;;  %v1571_v15 = vld [vmem:[%s1737_s14 + $0x38] sm:$0xff]   ;;  %v1647_v9 = vmov 0.0  }
  0x13   : > { %1475 = vmatprep.subr.bf16.mxu0 %v1565_v4  ;;  %1500 = vmatpush3.bf16.msra.mxu1 %v1577_v5  ;;  %v1573_v16 = vld [vmem:[%s1749_s20 + $0x8] sm:$0xff]   ;;  %v1613_v63 = vld [vmem:[%s1960_s6 + $0x18] sm:$0xff]   ;;  %v1614_v0 = vld [vmem:[%s1960_s6 + $0x60] sm:$0xff]  }
  0x14   : > { %1501 = vmatprep.subr.bf16.mxu1 %v1578_v7  ;;  %v1615_v1 = vld [vmem:[%s1960_s6 + $0x20] sm:$0xff]   ;;  %v1617_v3 = vld [vmem:[%s1960_s6 + $0x28] sm:$0xff]   ;;  %v1619_v5 = vld [vmem:[%s1960_s6 + $0x30] sm:$0xff]  }
  0x16   : > { %1476 = vmatpush3.bf16.msra.mxu0 %v1565_v4  ;;  %v1618_v4 = vld [vmem:[%s1960_s6 + $0x70] sm:$0xff]  }
  0x17   : > { %1477 = vmatprep.subr.bf16.mxu0 %v1566_v6  ;;  %1502 = vmatpush3.bf16.msra.mxu1 %v1578_v7  ;;  %v1621_v7 = vld [vmem:[%s1960_s6 + $0x38] sm:$0xff]  }
  0x18   : > { %1503 = vmatprep.subr.bf16.mxu1 %v1579_v10 }
  0x1a   : > { %1478 = vmatpush3.bf16.msra.mxu0 %v1566_v6  ;;  %v1620_v6 = vld [vmem:[%s1960_s6 + $0x78] sm:$0xff]  }
  0x1b   : > { %1479 = vmatprep.subr.bf16.mxu0 %v1567_v8  ;;  %1504 = vmatpush3.bf16.msra.mxu1 %v1579_v10  ;;  %v1623_v10 = vld [vmem:[%s1962_s8 + $0x8] sm:$0xff]  }
  0x1c   : > { %1505 = vmatprep.subr.bf16.mxu1 %v1580_v12 }
  0x1e   : > { %1480 = vmatpush3.bf16.msra.mxu0 %v1567_v8  ;;  %v1622_v8 = vld [vmem:[%s1962_s8] sm:$0xff]  }
  0x1f   : > { %1481 = vmatprep.subr.bf16.mxu0 %v1568_v11  ;;  %1506 = vmatpush3.bf16.msra.mxu1 %v1580_v12  ;;  %v1625_v12 = vld [vmem:[%s1962_s8 + $0x18] sm:$0xff]  }
  0x20   : > { %1507 = vmatprep.subr.bf16.mxu1 %v1581_v17 }
  0x22   : > { %1482 = vmatpush3.bf16.msra.mxu0 %v1568_v11  ;;  %v1624_v11 = vld [vmem:[%s1962_s8 + $0x10] sm:$0xff]  }
  0x23   : > { %1483 = vmatprep.subr.bf16.mxu0 %v1569_v13  ;;  %1508 = vmatpush3.bf16.msra.mxu1 %v1581_v17 }
  0x24   : > { %1433 = vmatprep.subr.bf16.mxu1 %v1606_v56 }
  0x26   : > { %1484 = vmatpush3.bf16.msra.mxu0 %v1569_v13  ;;  %v1626_v13 = vld [vmem:[%s1962_s8 + $0x20] sm:$0xff]  }
  0x27   : > { %1485 = vmatprep.subr.bf16.mxu0 %v1570_v14 }
  0x2a   : > { %1486 = vmatpush3.bf16.msra.mxu0 %v1570_v14  ;;  %v1627_v14 = vld [vmem:[%s1962_s8 + $0x28] sm:$0xff]  }
  0x2b   : > { %1487 = vmatprep.subr.bf16.mxu0 %v1571_v15 }
  0x2e   : > { %1488 = vmatpush3.bf16.msra.mxu0 %v1571_v15  ;;  %v706_v15 = vlaneseq }
  0x2f   : > { %796 = vmatprep.subr.bf16.mxu0 %v1584_v19 }
  0x31   : > { %1490 = vmatmul.mubr.bf16.vlgmr.msra.gmra.mrb[0].mxu0 %v1573_v16  ;;  %v707_v16 = vshrl.u32 %v706_v15, 7 }
  0x32   : > { %797 = vmatpush1.bf16.msra.mxu0 %v1582_v18  ;;  %828 = vmatprep.mubr.bf16.mxu0 %v1646_v40 }
  0x33   : > { %798 = vmatprep.subr.bf16.mxu0 %v1587_v20  ;;  %v708_v18 = vsub.s32 0, %v707_v16  ;;  %v704_v20 = vld [vmem:[%s1959_s5] sm:$0x3] }
  0x36   : > { %799 = vmatpush1.bf16.msra.mxu0 %v1585_v21  ;;  %v712_v21 = vsub.s32 1, %v707_v16 }
  0x37   : > { %800 = vmatprep.subr.bf16.mxu0 %v1590_v22 }
  0x3a   : > { %801 = vmatpush1.bf16.msra.mxu0 %v1588_v23 }
  0x3b   : > { %802 = vmatprep.subr.bf16.mxu0 %v1593_v24  ;;  %v709_v24 = vrot.slane %v704_v20, %v708_v18 }
  0x3e   : > { %803 = vmatpush1.bf16.msra.mxu0 %v1591_v25  ;;  %v713_v25 = vrot.slane %v704_v20, %v712_v21 }
  0x3f   : > { %804 = vmatprep.subr.bf16.mxu0 %v1596_v26 }
  0x42   : > { %805 = vmatpush1.bf16.msra.mxu0 %v1594_v27 }
  0x43   : > { %806 = vmatprep.subr.bf16.mxu0 %v1599_v28 }
  0x46   : > { %807 = vmatpush1.bf16.msra.mxu0 %v1597_v29 }
  0x47   : > { %808 = vmatprep.subr.bf16.mxu0 %v1602_v36 }
  0x4a   : > { %809 = vmatpush1.bf16.msra.mxu0 %v1600_v37 }
  0x4b   : > { %810 = vmatprep.subr.bf16.mxu0 %v1605_v38 }
  0x4e   : > { %811 = vmatpush1.bf16.msra.mxu0 %v1603_v39 }
  0x4f   : > { %1513 = vmatprep.subr.bf16.mxu0 %v1647_v9 }
 0x104   : > { %v1491_v30 = vpop.f32.mrb[0].mxu0 }
 0x105   : > { %v545_v31 = vpop.f32.mrb[1].mxu0 }
 0x106   : > { %v1492_v32 = vpop.f32.mrb[2].mxu0 }
 0x107   : > { %v561_v33 = vpack.c.bf16 %v1492_v32, %v1491_v30  ;;  %v548_v34 = vpop.f32.mrb[3].mxu0 }
 0x108   : > { %v560_v35 = vpack.c.bf16 %v548_v34, %v545_v31 }
 0x10a   : > { %1509 = vmatprep.mubr.bf16.mxu1 %v560_v35 }
 0x10b   : > { %1510 = vmatmul.mubr.bf16.vlgmr.msra.gmra.mrb[0].mxu1 %v561_v33 }
 0x10c   : > { %1434 = vmatpush3.bf16.msra.mxu1 %v1607_v57 }
 0x10d   : > { %1435 = vmatprep.subr.bf16.mxu1 %v1608_v58  ;;  %v1628_v58 = vld [vmem:[%s1962_s8 + $0x30] sm:$0xff]  }
 0x110   : > { %1436 = vmatpush3.bf16.msra.mxu1 %v1609_v59  ;;  %v1629_v59 = vld [vmem:[%s1962_s8 + $0x38] sm:$0xff]  }
 0x111   : > { %1437 = vmatprep.subr.bf16.mxu1 %v1610_v60  ;;  %v1630_v60 = vld [vmem:[%s1964_s10] sm:$0xff]  }
 0x114   : > { %1438 = vmatpush3.bf16.msra.mxu1 %v1611_v61  ;;  %v1631_v61 = vld [vmem:[%s1964_s10 + $0x8] sm:$0xff]  }
 0x115   : > { %1439 = vmatprep.subr.bf16.mxu1 %v1612_v62  ;;  %v1632_v62 = vld [vmem:[%s1964_s10 + $0x10] sm:$0xff]  }
 0x118   : > { %1440 = vmatpush3.bf16.msra.mxu1 %v1613_v63  ;;  %v1633_v63 = vld [vmem:[%s1964_s10 + $0x18] sm:$0xff]  }
 0x119   : > { %1441 = vmatprep.subr.bf16.mxu1 %v1614_v0  ;;  %v1634_v0 = vld [vmem:[%s1964_s10 + $0x20] sm:$0xff]  }
 0x11c   : > { %1442 = vmatpush3.bf16.msra.mxu1 %v1615_v1  ;;  %v1635_v1 = vld [vmem:[%s1964_s10 + $0x28] sm:$0xff]  }
 0x11d   : > { %1443 = vmatprep.subr.bf16.mxu1 %v1616_v2 }
 0x120   : > { %1444 = vmatpush3.bf16.msra.mxu1 %v1617_v3  ;;  %v1374_v3 = vld [vmem:[%s1961_s7] ss:$0 sm:$0xff] }
 0x121   : > { %1445 = vmatprep.subr.bf16.mxu1 %v1618_v4 }
 0x124   : > { %1446 = vmatpush3.bf16.msra.mxu1 %v1619_v5 }
 0x125   : > { %1447 = vmatprep.subr.bf16.mxu1 %v1620_v6 }
 0x128   : > { %1448 = vmatpush3.bf16.msra.mxu1 %v1621_v7 }
 0x129   : > { %1533 = vmatprep.subr.bf16.mxu1 %v1647_v9 }
 0x1de   : > { %v1511_v42 = vpop.f32.mrb[0].mxu1 }
 0x1df   : > { %v676_v43 = vadd.f32 %v1511_v42, %v1349_v41  ;;  %v667_v44 = vpop.f32.mrb[1].mxu1 }
 0x1e0   : > { %v668_v45 = vadd.f32 %v1349_v41, %v667_v44  ;;  %v1512_v46 = vpop.f32.mrb[2].mxu1 }
 0x1e1   : > { %v679_v47 = vadd.f32 %v1512_v46, %v1349_v41  ;;  %v670_v48 = vpop.f32.mrb[3].mxu1  ;;  %v684_v50 = vmax.f32 %v676_v43, 0.0 }
 0x1e2   : > { %v671_v49 = vadd.f32 %v1349_v41, %v670_v48  ;;  %v682_v52 = vmax.f32 %v668_v45, 0.0 }
 0x1e3   : > { %v685_v51 = vmax.f32 %v679_v47, 0.0 }
 0x1e4   : > { %v683_v53 = vmax.f32 %v671_v49, 0.0 }
 0x1e5   : > { %v687_v54 = vpack.c.bf16 %v685_v51, %v684_v50 }
 0x1e6   : > { %v686_v55 = vpack.c.bf16 %v683_v53, %v682_v52 }
 0x1e8   : > { %829 = vmatmul.mubr.bf16.vlgmr.msra.gmra.mrb[4].mxu0 %v686_v55 }
 0x1e9   : > { %838 = vmatprep.mubr.bf16.mxu0 %v1646_v40  ;;  %1514 = vmatpush3.bf16.msra.mxu0 %v1622_v8 }
 0x1ea   : > { %1515 = vmatprep.subr.bf16.mxu0 %v1647_v9 }
 0x1ed   : > { %1516 = vmatpush3.bf16.msra.mxu0 %v1623_v10 }
 0x1ee   : > { %1517 = vmatprep.subr.bf16.mxu0 %v1647_v9 }
 0x1f0   : > { %839 = vmatmul.mubr.bf16.gmra.mrb[8].mxu0 %v687_v54 }
 0x1f1   : > { %1518 = vmatpush3.bf16.msra.mxu0 %v1624_v11  ;;  %1529 = vmatprep.mubr.msk.bf16.mxu0 %vm1648_vm0, %v1647_v9 }
 0x1f2   : > { %1519 = vmatprep.subr.bf16.mxu0 %v1647_v9 }
 0x1f5   : > { %1520 = vmatpush3.bf16.msra.mxu0 %v1625_v12  ;;  %v1636_v12 = vld [vmem:[%s1964_s10 + $0x30] sm:$0xff]  }
 0x1f6   : > { %1521 = vmatprep.subr.bf16.mxu0 %v1647_v9 }
 0x1f9   : > { %1522 = vmatpush3.bf16.msra.mxu0 %v1626_v13  ;;  %v1637_v13 = vld [vmem:[%s1964_s10 + $0x38] sm:$0xff]  }
 0x1fa   : > { %1523 = vmatprep.subr.bf16.mxu0 %v1647_v9 }
 0x1fd   : > { %1524 = vmatpush3.bf16.msra.mxu0 %v1627_v14  ;;  %v1391_v14 = vld [vmem:[%s1963_s9] ss:$0 sm:$0xff] }
 0x1fe   : > { %1525 = vmatprep.subr.bf16.mxu0 %v1647_v9 }
 0x201   : > { %1526 = vmatpush3.bf16.msra.mxu0 %v1628_v58 }
 0x202   : > { %1527 = vmatprep.subr.bf16.mxu0 %v1647_v9 }
 0x205   : > { %1528 = vmatpush3.bf16.msra.mxu0 %v1629_v59 }
 0x2bb   : > { %v830_v17 = vpop.f32.mrb[4].mxu0 }
 0x2bc   : > { %v832_v19 = vpop.f32.mrb[5].mxu0  ;;  %v831_v27 = vadd.f32 %v830_v17, %v709_v24 }
 0x2bd   : > { %v834_v22 = vpop.f32.mrb[6].mxu0  ;;  %v833_v30 = vadd.f32 %v832_v19, %v713_v25 }
 0x2be   : > { %v836_v23 = vpop.f32.mrb[7].mxu0  ;;  %v835_v33 = vadd.f32 %v834_v22, %v709_v24 }
 0x2bf   : > { %v837_v37 = vadd.f32 %v836_v23, %v713_v25 }
 0x2c3   : > { %v840_v26 = vpop.f32.mrb[8].mxu0 }
 0x2c4   : > { %v841_v28 = vadd.f32 %v840_v26, %v709_v24  ;;  %v842_v29 = vpop.f32.mrb[9].mxu0 }
 0x2c5   : > { %v843_v31 = vadd.f32 %v842_v29, %v713_v25  ;;  %v844_v32 = vpop.f32.mrb[10].mxu0 }
 0x2c6   : > { %v849_v34 = vmax.f32 %v831_v27, %v841_v28  ;;  %v845_v35 = vadd.f32 %v844_v32, %v709_v24  ;;  %v846_v36 = vpop.f32.mrb[11].mxu0 }
 0x2c7   : > { %v858_v38 = vmax.f32 %v833_v30, %v843_v31  ;;  %v847_v39 = vadd.f32 %v846_v36, %v713_v25 }
 0x2c8   : > { %v850_v40 = vmax.f32 %v835_v33, %v845_v35 }
 0x2c9   : > { %v859_v41 = vmax.f32 %v837_v37, %v847_v39 }
 0x2ca   : > { %v851_v42 = vmax.f32 %v849_v34, %v850_v40 }
 0x2cb   : > { %v860_v43 = vmax.f32 %v858_v38, %v859_v41 }
 0x2cc   : > { %v852_v44 = vrot.slane %v851_v42, 4 }
 0x2cd   : > { %v861_v45 = vrot.slane %v860_v43, 4 }
 0x2ce   : > { %v853_v46 = vmax.f32 %v851_v42, %v852_v44 }
 0x2cf   : > { %v862_v47 = vmax.f32 %v860_v43, %v861_v45 }
 0x2d0   : > { %v854_v48 = vrot.slane %v853_v46, 2 }
 0x2d1   : > { %v863_v49 = vrot.slane %v862_v47, 2 }
 0x2d2   : > { %v855_v50 = vmax.f32 %v853_v46, %v854_v48 }
 0x2d3   : > { %v864_v51 = vmax.f32 %v862_v47, %v863_v49 }
 0x2d4   : > { %v856_v52 = vrot.slane %v855_v50, 1 }
 0x2d5   : > { %v865_v53 = vrot.slane %v864_v51, 1 }
 0x2d6   : > { %v857_v54 = vmax.f32 %v855_v50, %v856_v52 }
 0x2d7   : > { %v866_v55 = vmax.f32 %v864_v51, %v865_v53 }
 0x2d8   : > { %v867_v57 = vpack.c.bf16 %v857_v54, %v857_v54 }
 0x2d9   : > { %v868_v56 = vpack.c.bf16 %v866_v55, %v866_v55 }
 0x2db   : > { %1036 = vmatprep.mubr.bf16.mxu1 %v868_v56 }
 0x2dc   : > { %1037 = vmatmul.mubr.bf16.vlgmr.msra.gmra.mrb[4].mxu1 %v867_v57 }
 0x2dd   : > { %1549 = vmatprep.mubr.msk.bf16.mxu1 %vm1648_vm0, %v1647_v9  ;;  %1534 = vmatpush3.bf16.msra.mxu1 %v1630_v60 }
 0x2de   : > { %1535 = vmatprep.subr.bf16.mxu1 %v1647_v9 }
 0x2e1   : > { %1536 = vmatpush3.bf16.msra.mxu1 %v1631_v61 }
 0x2e2   : > { %1537 = vmatprep.subr.bf16.mxu1 %v1647_v9 }
 0x2e5   : > { %1538 = vmatpush3.bf16.msra.mxu1 %v1632_v62 }
 0x2e6   : > { %1539 = vmatprep.subr.bf16.mxu1 %v1647_v9 }
 0x2e9   : > { %1540 = vmatpush3.bf16.msra.mxu1 %v1633_v63 }
 0x2ea   : > { %1541 = vmatprep.subr.bf16.mxu1 %v1647_v9 }
 0x2ed   : > { %1542 = vmatpush3.bf16.msra.mxu1 %v1634_v0 }
 0x2ee   : > { %1543 = vmatprep.subr.bf16.mxu1 %v1647_v9 }
 0x2f1   : > { %1544 = vmatpush3.bf16.msra.mxu1 %v1635_v1 }
 0x2f2   : > { %1545 = vmatprep.subr.bf16.mxu1 %v1647_v9 }
 0x2f5   : > { %1546 = vmatpush3.bf16.msra.mxu1 %v1636_v12 }
 0x2f6   : > { %1547 = vmatprep.subr.bf16.mxu1 %v1647_v9  ;;  %v1400_v9 = vld [vmem:[%s1965_s11] ss:$0 sm:$0xff] }
 0x2f9   : > { %1548 = vmatpush3.bf16.msra.mxu1 %v1637_v13 }
 0x3af   : > { %v1449_v2 = vpop.f32.mrb[4].mxu1 }
 0x3b0   : > { %v1450_v4 = vpop.f32.mrb[5].mxu1 }
 0x3b1   : > { %v1451_v5 = vadd.f32 %v1450_v4, %v1449_v2  ;;  %v1452_v6 = vpop.f32.mrb[6].mxu1 }
 0x3b2   : > { %v1453_v7 = vpop.f32.mrb[7].mxu1 }
 0x3b3   : > { %v1039_v8 = vadd.f32 %v1451_v5, %v1374_v3 }
 0x3b5   : > { %v1044_v10 = vmax.f32 %v1039_v8, 0.0 }
 0x3b7   : > { %v1045_v11 = vpack.c.bf16 %v1044_v10, %v1044_v10 }
 0x3b9   : > { %1530 = vmatmul.mubr.bf16.vlgmr.msra.gmra.mrb[12].mxu0 %v1045_v11 }
 0x48c   : > { %v1151_v15 = vpop.f32.mrb[12].mxu0 }
 0x48d   : > { %v1152_v16 = vadd.f32 %v1391_v14, %v1151_v15  ;;  %v1531_v17 = vpop.f32.mrb[13].mxu0 }
 0x48e   : > { %v1154_v18 = vpop.f32.mrb[14].mxu0 }
 0x48f   : > { %v1157_v19 = vmax.f32 %v1152_v16, 0.0  ;;  %v1532_v20 = vpop.f32.mrb[15].mxu0 }
 0x491   : > { %v1158_v21 = vpack.c.bf16 %v1157_v19, %v1157_v19 }
 0x493   : > { %1550 = vmatmul.mubr.bf16.vlgmr.msra.gmra.mrb[8].mxu1 %v1158_v21 }
 0x566   : > { %v1264_v22 = vpop.f32.mrb[8].mxu1 }
 0x567   : > { %v1265_v23 = vadd.f32 %v1400_v9, %v1264_v22  ;;  %v1551_v24 = vpop.f32.mrb[9].mxu1 }
 0x568   : > { %v1267_v25 = vpop.f32.mrb[10].mxu1 }
 0x569   : > { %1270 = vst [vmem:[%s429_s27] sm:$0x1] %v1265_v23  ;;  %v1552_v26 = vpop.f32.mrb[11].mxu1 }
 0x56a PF: > { %s22_s21 = sadd.s32 1, %s1644_s21  }
 0x56b   : > { %p19_p4 = scmp.ge.s32.totalorder %s22_s21, 4  }
 0x56d   :  { %21 = sbr.rel (!%p19_p4) target bundleno = 1 (0x1), region = 101 }

// kernel: pointnet_rel_classifier_forward.4
= control target key start
LH: loop header
LB: loop body
LE: loop exit
PB: predicated region body
PF: predicated region fallthrough
CT: control target
= control target key end

     0   :  { %s5551_s0 = inlined_call_operand.vmem [shape: bf16[2,32,128], index: 0, kind: input, shape index: {}]   ;;  %s5552_s1 = inlined_call_operand.vmem [shape: bf16[2,128,128], index: 1, kind: input, shape index: {}]   ;;  %s5553_s2 = inlined_call_operand.vmem [shape: bf16[128,128], index: 2, kind: input, shape index: {}]   ;;  %s5554_s3 = inlined_call_operand.vmem [shape: f32[1,128], index: 3, kind: input, shape index: {}]   ;;  %s5555_s4 = inlined_call_operand.vmem [shape: bf16[128,128], index: 4, kind: input, shape index: {}]   ;;  %s5556_s5 = inlined_call_operand.vmem [shape: f32[1,128], index: 5, kind: input, shape index: {}]   ;;  %s5557_s6 = inlined_call_operand.vmem [shape: bf16[128,128], index: 6, kind: input, shape index: {}]   ;;  %s5558_s7 = inlined_call_operand.vmem [shape: f32[1,128], index: 7, kind: input, shape index: {}]   ;;  %s5559_s8 = inlined_call_operand.vmem [shape: bf16[128,256], index: 8, kind: input, shape index: {}]   ;;  %s5560_s9 = inlined_call_operand.vmem [shape: f32[1,256], index: 9, kind: input, shape index: {}]   ;;  %s5561_s10 = inlined_call_operand.vmem [shape: bf16[256,128], index: 10, kind: input, shape index: {}]   ;;  %s5562_s11 = inlined_call_operand.vmem [shape: f32[1,128], index: 11, kind: input, shape index: {}]   ;;  %s5563_s12 = inlined_call_operand.vmem [shape: bf16[128,128], index: 12, kind: input, shape index: {}]   ;;  %s5564_s13 = inlined_call_operand.vmem [shape: f32[1,128], index: 13, kind: input, shape index: {}]   ;;  %s5565_s14 = inlined_call_operand.hbm [shape: bf16[128,4096], index: 14, kind: input, shape index: {}]   ;;  %s5566_s15 = inlined_call_operand.vmem [shape: f32[1,4096], index: 15, kind: input, shape index: {}]   ;;  %s5567_s16 = inlined_call_operand.vmem [shape: f32[2,1,4096], index: 16, kind: output, shape index: {0}]   ;;  %s5568_s17 = inlined_call_operand.vmem [shape: bf16[2,32,128], index: 17, kind: output, shape index: {1}]  }
   0x1   :  { %5571 = sst [smem:[#allocation5_spill]] %s5551_s0 }
   0x2   :  { %5572 = sst [smem:[#allocation6_spill]] %s5552_s1 }
   0x3   :  { %23 = vsyncpa [#allocation3], 0  ;;  %s5096_s24 = smov 0  }
   0x4 LB: > { %s5102_s25 = sadd.s32 4294967295, %s4997_s24   ;;  %p4310_p0 = scmp.ge.s32.totalorder %s4997_s24, 1  ;;  %s4997_s24 = sphi %s5096_s24, %s29_s24  }
   0x5   : > { %p432_p1 = scmp.lt.s32.totalorder %s4997_s24, 3  ;;  %s4999_s26 = smov [#allocation2]  }
   0x6   : > { %s480_s27 = sshll.u32 %s4999_s26, 4  ;;  %p5569_p3 = scmp.eq.s32.totalorder %s5102_s25, 0  ;;  %s481_s27 = int_to_ptr.vmem [resolvable:$true] %s480_s27 }
   0x7   : > { %p5106_p2 = pnand %p4310_p0, %p432_p1  ;;  %s4959_s18 = scalar_lea.hbm %s5565_s14, 32768 }
   0x8   : > { %p4960_p6 = scmp.ne.s32.totalorder %s5565_s14, %s4959_s18  ;;  %p4966_p10 = scmp.lt.u32.totalorder %s4959_s18, %s5565_s14 }
   0x9   : > { %s5573_s28 = scalar_select %p5106_p2, 1, 0 }
   0xa   : > { %p4856_p4 = pneg %p5106_p2 }
   0xc   : > { %p5115_p5 = pnand %p5569_p3, %p4856_p4 }
   0xe   : > { %p4961_p7 = pneg %p5115_p5 }
  0x10   : > { %p4962_p8 = pnand %p4961_p7, %p4960_p6 }
  0x12   : > { %p4963_p9 = pneg %p4962_p8 }
  0x14   : > { %p4968_p11 = pnand %p4966_p10, %p4963_p9 }
  0x16   : > { %4971 = shalt.err (!%p4968_p11)
}
  0x17   : > { %s4972_s22 = scalar_lea.vmem %s481_s27, 32768  ;;  %p4980_p1 = scmp.lt.s32.totalorder %s481_s27, %s481_s27 }
  0x18   : > { %p4973_p12 = scmp.ne.s32.totalorder %s481_s27, %s4972_s22  ;;  %p4981_p4 = scmp.lt.s32.totalorder %s4972_s22, %s4972_s22 }
  0x1a   : > { %p4975_p13 = pnand %p4973_p12, %p4961_p7  ;;  %p4982_p3 = por %p4981_p4, %p4980_p1 }
  0x1c   : > { %p4976_p0 = pneg %p4975_p13 }
  0x1e   : > { %p4983_p2 = pnand %p4982_p3, %p4976_p0 }
  0x20   : > { %4986 = shalt.err (!%p4983_p2)
}
  0x21   : > { %s5000_s23 = smov 2048   ;;  %s5001_s26 = smov 128  }
  0x22   : > { %4859 = dma.hbm_to_vmem [thread:$0]  (!%p5115_p5), %s5565_s14, 32768, %s481_s27, [#allocation3], %s5000_s23, %s5000_s23, %s5001_s26  }
  0x23   : > { %p5575_p6 = scmp.ne.s32.totalorder %s5573_s28, 0 }
  0x24   : > { %p5576_p8 = scmp.eq.s32.totalorder (!%p5575_p6), %s5102_s25, 0 }
  0x25   : > { %515 = sbr.rel (%p5575_p6) target bundleno = 2103 (0x837), region = 84 }
  0x2c   : > { %4992 = dma.done.wait (%p5576_p8), [#allocation3], 32768   ;;  %p5577_p7 = pmov %p5576_p8 }
  0x2d   : > { %p576_p2 = scmp.lt.s32.totalorder %s5102_s25, 1  ;;  %s5578_s19 = sld [smem:[#allocation6_spill]]  ;;  %v4887_v5 = vld [vmem:[%s5553_s2] sm:$0xff]   ;;  %v4888_v6 = vld [vmem:[%s5553_s2 + $0x8] sm:$0xff]   ;;  %v4889_v8 = vld [vmem:[%s5553_s2 + $0x10] sm:$0xff]   ;;  %vm5004_vm0 = vmmov 0  }
  0x2e   : > { %4994 = vsyncadd (%p5577_p7), [#allocation3], 4294934528  ;;  %s5579_s22 = sld [smem:[#allocation5_spill]]  ;;  %4772 = vmatprep.subr.bf16.mxu1 %v4887_v5  ;;  %v4890_v10 = vld [vmem:[%s5553_s2 + $0x18] sm:$0xff]   ;;  %v4891_v12 = vld [vmem:[%s5553_s2 + $0x20] sm:$0xff]  }
  0x2f   : > { %s5581_s25 = smov (!%p576_p2, %s5102_s25), 1  ;;  %4773 = vmatpush3.bf16.msra.mxu1 %v4887_v5  ;;  %v4892_v14 = vld [vmem:[%s5553_s2 + $0x28] sm:$0xff]   ;;  %v4893_v16 = vld [vmem:[%s5553_s2 + $0x30] sm:$0xff]   ;;  %v4894_v17 = vld [vmem:[%s5553_s2 + $0x38] sm:$0xff]  }
  0x30   : > { %s4664_s29 = sshll.u32 %s5581_s25, 6  ;;  %s4663_s1 = sshll.u32 %s5581_s25, 4  ;;  %4774 = vmatprep.subr.bf16.mxu1 %v4888_v6  ;;  %v4895_v18 = vld [vmem:[%s5555_s4] sm:$0xff]   ;;  %v4896_v19 = vld [vmem:[%s5555_s4 + $0x8] sm:$0xff]   ;;  %v4897_v20 = vld [vmem:[%s5555_s4 + $0x10] sm:$0xff]  }
  0x31   : > { %v4898_v21 = vld [vmem:[%s5555_s4 + $0x18] sm:$0xff]   ;;  %v4899_v22 = vld [vmem:[%s5555_s4 + $0x20] sm:$0xff]   ;;  %v4900_v23 = vld [vmem:[%s5555_s4 + $0x28] sm:$0xff]   ;;  %s594_s30 = scalar_lea.vmem %s5568_s17, %s4663_s1 }
  0x32   : > { %v4901_v30 = vld [vmem:[%s5555_s4 + $0x30] sm:$0xff]   ;;  %v4902_v31 = vld [vmem:[%s5555_s4 + $0x38] sm:$0xff]   ;;  %v4903_v32 = vld [vmem:[%s5557_s6] sm:$0xff]  }
  0x33   : > { %s5149_s28 = scalar_lea.vmem %s5578_s19, %s4664_s29  ;;  %4775 = vmatpush3.bf16.msra.mxu1 %v4888_v6  ;;  %v4904_v33 = vld [vmem:[%s5557_s6 + $0x8] sm:$0xff]   ;;  %v4905_v34 = vld [vmem:[%s5557_s6 + $0x10] sm:$0xff]   ;;  %v4906_v35 = vld [vmem:[%s5557_s6 + $0x18] sm:$0xff]   ;;  %s4319_s19 = sshll.u32 %s5581_s25, 5 }
  0x34   : > { %v4877_v0 = vld [vmem:[%s5149_s28] sm:$0xff]   ;;  %v4878_v1 = vld [vmem:[%s5149_s28 + $0x8] sm:$0xff]   ;;  %v4879_v2 = vld [vmem:[%s5149_s28 + $0x10] sm:$0xff]   ;;  %s5160_s23 = scalar_lea.vmem %s5579_s22, %s4663_s1  ;;  %4776 = vmatprep.subr.bf16.mxu1 %v4889_v8  ;;  %s5491_s21 = scalar_lea.vmem %s5567_s16, %s4319_s19 }
  0x35   : > { %4752 = vmatprep.subr.bf16.mxu0 %v4877_v0  ;;  %v4880_v3 = vld [vmem:[%s5149_s28 + $0x18] sm:$0xff]   ;;  %v4885_v4 = vld [vmem:[%s5160_s23] sm:$0xff]   ;;  %v4882_v9 = vld [vmem:[%s5149_s28 + $0x28] sm:$0xff]  }
  0x36   : > { %4753 = vmatpush3.bf16.msra.mxu0 %v4877_v0  ;;  %4768 = vmatprep.mubr.bf16.mxu0 %v4885_v4  ;;  %v4881_v7 = vld [vmem:[%s5149_s28 + $0x20] sm:$0xff]   ;;  %v4883_v11 = vld [vmem:[%s5149_s28 + $0x30] sm:$0xff]   ;;  %v4884_v13 = vld [vmem:[%s5149_s28 + $0x38] sm:$0xff]  }
  0x37   : > { %4754 = vmatprep.subr.bf16.mxu0 %v4878_v1  ;;  %4777 = vmatpush3.bf16.msra.mxu1 %v4889_v8  ;;  %v4886_v15 = vld [vmem:[%s5160_s23 + $0x8] sm:$0xff]   ;;  %v4907_v36 = vld [vmem:[%s5557_s6 + $0x20] sm:$0xff]   ;;  %v4909_v53 = vld [vmem:[%s5557_s6 + $0x30] sm:$0xff]  }
  0x38   : > { %4778 = vmatprep.subr.bf16.mxu1 %v4890_v10  ;;  %v4908_v37 = vld [vmem:[%s5557_s6 + $0x28] sm:$0xff]   ;;  %v4332_v38 = vld [vmem:[%s5554_s3] ss:$0 sm:$0xff]  ;;  %v4910_v54 = vld [vmem:[%s5557_s6 + $0x38] sm:$0xff]  }
  0x39   : > { %v4911_v55 = vld [vmem:[%s5559_s8] ss:$8 sps:$4 sm:$0xff]   ;;  %v4913_v56 = vld [vmem:[%s5559_s8 + $0x4] ss:$8 sps:$4 sm:$0xff]   ;;  %v4916_v57 = vld [vmem:[%s5559_s8 + $0x14] ss:$8 sps:$4 sm:$0xff]  }
  0x3a   : > { %4755 = vmatpush3.bf16.msra.mxu0 %v4878_v1  ;;  %v4914_v58 = vld [vmem:[%s5559_s8 + $0x10] ss:$8 sps:$4 sm:$0xff]   ;;  %v4919_v59 = vld [vmem:[%s5559_s8 + $0x24] ss:$8 sps:$4 sm:$0xff]   ;;  %v4917_v60 = vld [vmem:[%s5559_s8 + $0x20] ss:$8 sps:$4 sm:$0xff]  }
  0x3b   : > { %4756 = vmatprep.subr.bf16.mxu0 %v4879_v2  ;;  %4779 = vmatpush3.bf16.msra.mxu1 %v4890_v10  ;;  %v4922_v61 = vld [vmem:[%s5559_s8 + $0x34] ss:$8 sps:$4 sm:$0xff]   ;;  %v4920_v62 = vld [vmem:[%s5559_s8 + $0x30] ss:$8 sps:$4 sm:$0xff]   ;;  %v4925_v63 = vld [vmem:[%s5559_s8 + $0x44] ss:$8 sps:$4 sm:$0xff]  }
  0x3c   : > { %4780 = vmatprep.subr.bf16.mxu1 %v4891_v12  ;;  %v4923_v0 = vld [vmem:[%s5559_s8 + $0x40] ss:$8 sps:$4 sm:$0xff]   ;;  %v4928_v1 = vld [vmem:[%s5559_s8 + $0x54] ss:$8 sps:$4 sm:$0xff]  }
  0x3e   : > { %4757 = vmatpush3.bf16.msra.mxu0 %v4879_v2  ;;  %v4926_v2 = vld [vmem:[%s5559_s8 + $0x50] ss:$8 sps:$4 sm:$0xff]  }
  0x3f   : > { %4758 = vmatprep.subr.bf16.mxu0 %v4880_v3  ;;  %4781 = vmatpush3.bf16.msra.mxu1 %v4891_v12 }
  0x40   : > { %4782 = vmatprep.subr.bf16.mxu1 %v4892_v14 }
  0x42   : > { %4759 = vmatpush3.bf16.msra.mxu0 %v4880_v3  ;;  %v4345_v3 = vld [vmem:[%s5556_s5] ss:$0 sm:$0xff] }
  0x43   : > { %4760 = vmatprep.subr.bf16.mxu0 %v4881_v7  ;;  %4783 = vmatpush3.bf16.msra.mxu1 %v4892_v14 }
  0x44   : > { %4784 = vmatprep.subr.bf16.mxu1 %v4893_v16 }
  0x46   : > { %4761 = vmatpush3.bf16.msra.mxu0 %v4881_v7 }
  0x47   : > { %4762 = vmatprep.subr.bf16.mxu0 %v4882_v9  ;;  %4785 = vmatpush3.bf16.msra.mxu1 %v4893_v16 }
  0x48   : > { %4786 = vmatprep.subr.bf16.mxu1 %v4894_v17 }
  0x4a   : > { %4763 = vmatpush3.bf16.msra.mxu0 %v4882_v9 }
  0x4b   : > { %4764 = vmatprep.subr.bf16.mxu0 %v4883_v11  ;;  %4787 = vmatpush3.bf16.msra.mxu1 %v4894_v17 }
  0x4c   : > { %4812 = vmatprep.subr.bf16.mxu1 %v4903_v32 }
  0x4e   : > { %4765 = vmatpush3.bf16.msra.mxu0 %v4883_v11 }
  0x4f   : > { %4766 = vmatprep.subr.bf16.mxu0 %v4884_v13 }
  0x52   : > { %4767 = vmatpush3.bf16.msra.mxu0 %v4884_v13 }
  0x53   : > { %4792 = vmatprep.subr.bf16.mxu0 %v4895_v18 }
  0x55   : > { %4769 = vmatmul.mubr.bf16.vlgmr.msra.gmra.mrb[0].mxu0 %v4886_v15 }
  0x56   : > { %4793 = vmatpush3.bf16.msra.mxu0 %v4895_v18  ;;  %v4931_v18 = vld [vmem:[%s5559_s8 + $0x64] ss:$8 sps:$4 sm:$0xff]  }
  0x57   : > { %4794 = vmatprep.subr.bf16.mxu0 %v4896_v19 }
  0x5a   : > { %4795 = vmatpush3.bf16.msra.mxu0 %v4896_v19  ;;  %v4929_v19 = vld [vmem:[%s5559_s8 + $0x60] ss:$8 sps:$4 sm:$0xff]  }
  0x5b   : > { %4796 = vmatprep.subr.bf16.mxu0 %v4897_v20 }
  0x5e   : > { %4797 = vmatpush3.bf16.msra.mxu0 %v4897_v20  ;;  %v4934_v20 = vld [vmem:[%s5559_s8 + $0x74] ss:$8 sps:$4 sm:$0xff]  }
  0x5f   : > { %4798 = vmatprep.subr.bf16.mxu0 %v4898_v21 }
  0x62   : > { %4799 = vmatpush3.bf16.msra.mxu0 %v4898_v21  ;;  %v4932_v21 = vld [vmem:[%s5559_s8 + $0x70] ss:$8 sps:$4 sm:$0xff]  }
  0x63   : > { %4800 = vmatprep.subr.bf16.mxu0 %v4899_v22 }
  0x66   : > { %4801 = vmatpush3.bf16.msra.mxu0 %v4899_v22  ;;  %v5002_v22 = vmov 0  }
  0x67   : > { %4802 = vmatprep.subr.bf16.mxu0 %v4900_v23 }
  0x6a   : > { %4803 = vmatpush3.bf16.msra.mxu0 %v4900_v23  ;;  %v4354_v23 = vld [vmem:[%s5558_s7] ss:$0 sm:$0xff] }
  0x6b   : > { %4804 = vmatprep.subr.bf16.mxu0 %v4901_v30 }
  0x6e   : > { %4805 = vmatpush3.bf16.msra.mxu0 %v4901_v30 }
  0x6f   : > { %4806 = vmatprep.subr.bf16.mxu0 %v4902_v31 }
  0x72   : > { %4807 = vmatpush3.bf16.msra.mxu0 %v4902_v31 }
  0x73   : > { %1231 = vmatprep.subr.bf16.mxu0 %v4913_v56  ;;  %v4952_v56 = vld [vmem:[%s5563_s12 + $0x8] sm:$0xff]  }
 0x128   : > { %v4770_v24 = vpop.f32.mrb[0].mxu0 }
 0x129   : > { %v710_v25 = vpop.f32.mrb[1].mxu0 }
 0x12a   : > { %v4771_v26 = vpop.f32.mrb[2].mxu0 }
 0x12b   : > { %v726_v27 = vpack.c.bf16 %v4771_v26, %v4770_v24  ;;  %v713_v28 = vpop.f32.mrb[3].mxu0 }
 0x12c   : > { %v725_v29 = vpack.c.bf16 %v713_v28, %v710_v25 }
 0x12e   : > { %4788 = vmatprep.mubr.bf16.mxu1 %v725_v29 }
 0x12f   : > { %4789 = vmatmul.mubr.bf16.vlgmr.msra.gmra.mrb[0].mxu1 %v726_v27 }
 0x130   : > { %4813 = vmatpush3.bf16.msra.mxu1 %v4903_v32 }
 0x131   : > { %4814 = vmatprep.subr.bf16.mxu1 %v4904_v33 }
 0x134   : > { %4815 = vmatpush3.bf16.msra.mxu1 %v4904_v33 }
 0x135   : > { %4816 = vmatprep.subr.bf16.mxu1 %v4905_v34 }
 0x138   : > { %4817 = vmatpush3.bf16.msra.mxu1 %v4905_v34 }
 0x139   : > { %4818 = vmatprep.subr.bf16.mxu1 %v4906_v35 }
 0x13c   : > { %4819 = vmatpush3.bf16.msra.mxu1 %v4906_v35 }
 0x13d   : > { %4820 = vmatprep.subr.bf16.mxu1 %v4907_v36 }
 0x140   : > { %4821 = vmatpush3.bf16.msra.mxu1 %v4907_v36 }
 0x141   : > { %4822 = vmatprep.subr.bf16.mxu1 %v4908_v37 }
 0x144   : > { %4823 = vmatpush3.bf16.msra.mxu1 %v4908_v37 }
 0x145   : > { %4824 = vmatprep.subr.bf16.mxu1 %v4909_v53 }
 0x148   : > { %4825 = vmatpush3.bf16.msra.mxu1 %v4909_v53  ;;  %v4950_v53 = vld [vmem:[%s5561_s10 + $0x38] sm:$0xff]  }
 0x149   : > { %4826 = vmatprep.subr.bf16.mxu1 %v4910_v54 }
 0x14c   : > { %4827 = vmatpush3.bf16.msra.mxu1 %v4910_v54  ;;  %v4951_v54 = vld [vmem:[%s5563_s12] sm:$0xff]  }
 0x202   : > { %v4790_v39 = vpop.f32.mrb[0].mxu1 }
 0x203   : > { %v841_v40 = vadd.f32 %v4790_v39, %v4332_v38  ;;  %v832_v41 = vpop.f32.mrb[1].mxu1  ;;  %v4936_v39 = vld [vmem:[%s5561_s10] sm:$0xff]  }
 0x204   : > { %v833_v42 = vadd.f32 %v4332_v38, %v832_v41  ;;  %v4791_v43 = vpop.f32.mrb[2].mxu1  ;;  %v4938_v41 = vld [vmem:[%s5561_s10 + $0x8] sm:$0xff]  }
 0x205   : > { %v844_v44 = vadd.f32 %v4791_v43, %v4332_v38  ;;  %v835_v45 = vpop.f32.mrb[3].mxu1  ;;  %v849_v47 = vmax.f32 %v841_v40, 0.0  ;;  %v4937_v40 = vld [vmem:[%s5561_s10 + $0x48] sm:$0xff]   ;;  %v4940_v43 = vld [vmem:[%s5561_s10 + $0x10] sm:$0xff]  }
 0x206   : > { %v836_v46 = vadd.f32 %v4332_v38, %v835_v45  ;;  %v847_v49 = vmax.f32 %v833_v42, 0.0  ;;  %v4935_v38 = vld [vmem:[%s5561_s10 + $0x40] sm:$0xff]   ;;  %v4939_v42 = vld [vmem:[%s5561_s10 + $0x50] sm:$0xff]   ;;  %v4942_v45 = vld [vmem:[%s5561_s10 + $0x18] sm:$0xff]  }
 0x207   : > { %v850_v48 = vmax.f32 %v844_v44, 0.0  ;;  %4721 = vmatprep.subr.bf16.mxu1 %v4935_v38  ;;  %v4941_v44 = vld [vmem:[%s5561_s10 + $0x58] sm:$0xff]  }
 0x208   : > { %v848_v50 = vmax.f32 %v836_v46, 0.0  ;;  %v4943_v46 = vld [vmem:[%s5561_s10 + $0x60] sm:$0xff]  }
 0x209   : > { %v852_v51 = vpack.c.bf16 %v850_v48, %v849_v47  ;;  %v4944_v47 = vld [vmem:[%s5561_s10 + $0x20] sm:$0xff]   ;;  %v4945_v48 = vld [vmem:[%s5561_s10 + $0x68] sm:$0xff]  }
 0x20a   : > { %v851_v52 = vpack.c.bf16 %v848_v50, %v847_v49  ;;  %v4946_v49 = vld [vmem:[%s5561_s10 + $0x28] sm:$0xff]   ;;  %v4947_v50 = vld [vmem:[%s5561_s10 + $0x70] sm:$0xff]  }
 0x20b   : > { %4680 = vst [vmem:[%s594_s30 + $0x8] sm:$0xff] %v852_v51  }
 0x20c   : > { %4674 = vst [vmem:[%s594_s30] sm:$0xff] %v851_v52   ;;  %4808 = vmatprep.mubr.bf16.mxu0 %v851_v52  ;;  %v4949_v52 = vld [vmem:[%s5561_s10 + $0x78] sm:$0xff]  }
 0x20d   : > { %4809 = vmatmul.mubr.bf16.vlgmr.msra.gmra.mrb[4].mxu0 %v852_v51  ;;  %v4948_v51 = vld [vmem:[%s5561_s10 + $0x30] sm:$0xff]  }
 0x20e   : > { %1232 = vmatpush1.bf16.msra.mxu0 %v4911_v55  ;;  %1263 = vmatprep.mubr.bf16.mxu0 %v5002_v22  ;;  %v5003_v55 = vmov 0.0  }
 0x20f   : > { %1233 = vmatprep.subr.bf16.mxu0 %v4916_v57  ;;  %v4953_v57 = vld [vmem:[%s5563_s12 + $0x10] sm:$0xff]  }
 0x212   : > { %1234 = vmatpush1.bf16.msra.mxu0 %v4914_v58  ;;  %v4954_v58 = vld [vmem:[%s5563_s12 + $0x18] sm:$0xff]  }
 0x213   : > { %1235 = vmatprep.subr.bf16.mxu0 %v4919_v59  ;;  %v4955_v59 = vld [vmem:[%s5563_s12 + $0x20] sm:$0xff]  }
 0x216   : > { %1236 = vmatpush1.bf16.msra.mxu0 %v4917_v60  ;;  %v4956_v60 = vld [vmem:[%s5563_s12 + $0x28] sm:$0xff]  }
 0x217   : > { %1237 = vmatprep.subr.bf16.mxu0 %v4922_v61  ;;  %v1141_v61 = vlaneseq }
 0x21a   : > { %1238 = vmatpush1.bf16.msra.mxu0 %v4920_v62  ;;  %v5378_v62 = vshrl.u32 %v1141_v61, 7 }
 0x21b   : > { %1239 = vmatprep.subr.bf16.mxu0 %v4925_v63 }
 0x21c   : > { %v5381_v63 = vsub.s32 0, %v5378_v62 }
 0x21e   : > { %1240 = vmatpush1.bf16.msra.mxu0 %v4923_v0  ;;  %v1139_v0 = vld [vmem:[%s5560_s9] sm:$0x3] }
 0x21f   : > { %1241 = vmatprep.subr.bf16.mxu0 %v4928_v1 }
 0x222   : > { %1242 = vmatpush1.bf16.msra.mxu0 %v4926_v2  ;;  %v5387_v2 = vsub.s32 1, %v5378_v62 }
 0x223   : > { %1243 = vmatprep.subr.bf16.mxu0 %v4931_v18 }
 0x226   : > { %1244 = vmatpush1.bf16.msra.mxu0 %v4929_v19 }
 0x227   : > { %1245 = vmatprep.subr.bf16.mxu0 %v4934_v20 }
 0x22a   : > { %1246 = vmatpush1.bf16.msra.mxu0 %v4932_v21 }
 0x22b   : > { %4832 = vmatprep.subr.bf16.mxu0 %v5003_v55 }
 0x2e0   : > { %v4810_v4 = vpop.f32.mrb[4].mxu0 }
 0x2e1   : > { %v985_v5 = vadd.f32 %v4810_v4, %v4345_v3  ;;  %v976_v6 = vpop.f32.mrb[5].mxu0 }
 0x2e2   : > { %v977_v7 = vadd.f32 %v4345_v3, %v976_v6  ;;  %v4811_v8 = vpop.f32.mrb[6].mxu0 }
 0x2e3   : > { %v988_v9 = vadd.f32 %v4811_v8, %v4345_v3  ;;  %v979_v10 = vpop.f32.mrb[7].mxu0  ;;  %v993_v12 = vmax.f32 %v985_v5, 0.0  ;;  %v1144_v5 = vrot.slane %v1139_v0, %v5381_v63 }
 0x2e4   : > { %v980_v11 = vadd.f32 %v4345_v3, %v979_v10  ;;  %v991_v14 = vmax.f32 %v977_v7, 0.0  ;;  %v1148_v7 = vrot.slane %v1139_v0, %v5387_v2 }
 0x2e5   : > { %v994_v13 = vmax.f32 %v988_v9, 0.0 }
 0x2e6   : > { %v992_v15 = vmax.f32 %v980_v11, 0.0 }
 0x2e7   : > { %v996_v16 = vpack.c.bf16 %v994_v13, %v993_v12 }
 0x2e8   : > { %v995_v17 = vpack.c.bf16 %v992_v15, %v991_v14 }
 0x2ea   : > { %4828 = vmatprep.mubr.bf16.mxu1 %v995_v17 }
 0x2eb   : > { %4829 = vmatmul.mubr.bf16.vlgmr.msra.gmra.mrb[4].mxu1 %v996_v16 }
 0x2ec   : > { %4722 = vmatpush3.bf16.msra.mxu1 %v4936_v39 }
 0x2ed   : > { %4723 = vmatprep.subr.bf16.mxu1 %v4937_v40 }
 0x2f0   : > { %4724 = vmatpush3.bf16.msra.mxu1 %v4938_v41 }
 0x2f1   : > { %4725 = vmatprep.subr.bf16.mxu1 %v4939_v42 }
 0x2f4   : > { %4726 = vmatpush3.bf16.msra.mxu1 %v4940_v43 }
 0x2f5   : > { %4727 = vmatprep.subr.bf16.mxu1 %v4941_v44 }
 0x2f8   : > { %4728 = vmatpush3.bf16.msra.mxu1 %v4942_v45 }
 0x2f9   : > { %4729 = vmatprep.subr.bf16.mxu1 %v4943_v46 }
 0x2fc   : > { %4730 = vmatpush3.bf16.msra.mxu1 %v4944_v47 }
 0x2fd   : > { %4731 = vmatprep.subr.bf16.mxu1 %v4945_v48 }
 0x300   : > { %4732 = vmatpush3.bf16.msra.mxu1 %v4946_v49  ;;  %v4957_v49 = vld [vmem:[%s5563_s12 + $0x30] sm:$0xff]  }
 0x301   : > { %4733 = vmatprep.subr.bf16.mxu1 %v4947_v50  ;;  %v4958_v50 = vld [vmem:[%s5563_s12 + $0x38] sm:$0xff]  }
 0x304   : > { %4734 = vmatpush3.bf16.msra.mxu1 %v4948_v51  ;;  %v1602_v51 = vld [vmem:[#allocation2] sm:$0xff] }
 0x305   : > { %4735 = vmatprep.subr.bf16.mxu1 %v4949_v52  ;;  %v1618_v52 = vld [vmem:[#allocation2 + $0x80] sm:$0xff] }
 0x308   : > { %4736 = vmatpush3.bf16.msra.mxu1 %v4950_v53  ;;  %v1603_v53 = vld [vmem:[#allocation2 + $0x8] sm:$0xff] }
 0x3be   : > { %v4830_v24 = vpop.f32.mrb[4].mxu1 }
 0x3bf   : > { %v1111_v25 = vadd.f32 %v4830_v24, %v4354_v23  ;;  %v1102_v26 = vpop.f32.mrb[5].mxu1 }
 0x3c0   : > { %v1103_v27 = vadd.f32 %v4354_v23, %v1102_v26  ;;  %v4831_v28 = vpop.f32.mrb[6].mxu1 }
 0x3c1   : > { %v1114_v29 = vadd.f32 %v4831_v28, %v4354_v23  ;;  %v1105_v30 = vpop.f32.mrb[7].mxu1  ;;  %v1119_v32 = vmax.f32 %v1111_v25, 0.0 }
 0x3c2   : > { %v1106_v31 = vadd.f32 %v4354_v23, %v1105_v30  ;;  %v1117_v34 = vmax.f32 %v1103_v27, 0.0 }
 0x3c3   : > { %v1120_v33 = vmax.f32 %v1114_v29, 0.0 }
 0x3c4   : > { %v1118_v35 = vmax.f32 %v1106_v31, 0.0 }
 0x3c5   : > { %v1122_v36 = vpack.c.bf16 %v1120_v33, %v1119_v32 }
 0x3c6   : > { %v1121_v37 = vpack.c.bf16 %v1118_v35, %v1117_v34 }
 0x3c8   : > { %1264 = vmatmul.mubr.bf16.vlgmr.msra.gmra.mrb[8].mxu0 %v1121_v37 }
 0x3c9   : > { %1273 = vmatprep.mubr.bf16.mxu0 %v5002_v22  ;;  %4833 = vmatpush3.bf16.msra.mxu0 %v4951_v54  ;;  %v4405_v54 = vcombine.low %v1602_v51, %v1618_v52 }
 0x3ca   : > { %4834 = vmatprep.subr.bf16.mxu0 %v5003_v55 }
 0x3cd   : > { %4835 = vmatpush3.bf16.msra.mxu0 %v4952_v56  ;;  %v4406_v56 = vcombine.high %v1602_v51, %v1618_v52  ;;  %v1795_v51 = vld [vmem:[#allocation2 + $0x608] sm:$0xff] }
 0x3ce   : > { %4836 = vmatprep.subr.bf16.mxu0 %v5003_v55  ;;  %v1811_v52 = vld [vmem:[#allocation2 + $0x688] sm:$0xff] }
 0x3cf   : > { %3306 = vmatprep.subr.bf16.mxu1 %v4406_v56  ;;  %v4599_v56 = vcombine.low %v1795_v51, %v1811_v52 }
 0x3d0   : > { %1274 = vmatmul.mubr.bf16.gmra.mrb[12].mxu0 %v1122_v36 }
 0x3d1   : > { %4837 = vmatpush3.bf16.msra.mxu0 %v4953_v57  ;;  %4848 = vmatprep.mubr.msk.bf16.mxu0 %vm5004_vm0, %v5003_v55  ;;  %v1619_v57 = vld [vmem:[#allocation2 + $0x88] sm:$0xff] }
 0x3d2   : > { %4838 = vmatprep.subr.bf16.mxu0 %v5003_v55  ;;  %v4408_v61 = vcombine.high %v1603_v53, %v1619_v57 }
 0x3d5   : > { %4839 = vmatpush3.bf16.msra.mxu0 %v4954_v58  ;;  %v1634_v58 = vld [vmem:[#allocation2 + $0x100] sm:$0xff] }
 0x3d6   : > { %4840 = vmatprep.subr.bf16.mxu0 %v5003_v55 }
 0x3d9   : > { %4841 = vmatpush3.bf16.msra.mxu0 %v4955_v59  ;;  %v1650_v59 = vld [vmem:[#allocation2 + $0x180] sm:$0xff] }
 0x3da   : > { %4842 = vmatprep.subr.bf16.mxu0 %v5003_v55  ;;  %v4438_v0 = vcombine.high %v1634_v58, %v1650_v59 }
 0x3dd   : > { %4843 = vmatpush3.bf16.msra.mxu0 %v4956_v60  ;;  %v4407_v60 = vcombine.low %v1603_v53, %v1619_v57  ;;  %v1826_v57 = vld [vmem:[#allocation2 + $0x700] sm:$0xff] }
 0x3de   : > { %4844 = vmatprep.subr.bf16.mxu0 %v5003_v55 }
 0x3e1   : > { %4845 = vmatpush3.bf16.msra.mxu0 %v4957_v49 }
 0x3e2   : > { %4846 = vmatprep.subr.bf16.mxu0 %v5003_v55 }
 0x3e5   : > { %4847 = vmatpush3.bf16.msra.mxu0 %v4958_v50 }
 0x3e6   : > { %3347 = vmatprep.subr.bf16.mxu0 %v4408_v61  ;;  %v1843_v61 = vld [vmem:[#allocation2 + $0x788] sm:$0xff] }
 0x49b   : > { %v1265_v1 = vpop.f32.mrb[8].mxu0 }
 0x49c   : > { %v1267_v3 = vpop.f32.mrb[9].mxu0  ;;  %v1266_v8 = vadd.f32 %v1265_v1, %v1144_v5  ;;  %v4437_v1 = vcombine.low %v1634_v58, %v1650_v59  ;;  %v1842_v58 = vld [vmem:[#allocation2 + $0x780] sm:$0xff]  ;;  %v1827_v59 = vld [vmem:[#allocation2 + $0x708] sm:$0xff] }
 0x49d   : > { %v1269_v4 = vpop.f32.mrb[10].mxu0  ;;  %v1268_v9 = vadd.f32 %v1267_v3, %v1148_v7  ;;  %v1666_v3 = vld [vmem:[#allocation2 + $0x200] sm:$0xff] }
 0x49e   : > { %v1271_v6 = vpop.f32.mrb[11].mxu0  ;;  %v1270_v11 = vadd.f32 %v1269_v4, %v1144_v5  ;;  %v1284_v17 = vmax.f32 %v1266_v8, 0.0  ;;  %v1682_v4 = vld [vmem:[#allocation2 + $0x280] sm:$0xff] }
 0x49f   : > { %v1272_v14 = vadd.f32 %v1271_v6, %v1148_v7  ;;  %v1285_v21 = vmax.f32 %v1268_v9, 0.0  ;;  %v4469_v55 = vcombine.low %v1666_v3, %v1682_v4  ;;  %v1698_v6 = vld [vmem:[#allocation2 + $0x300] sm:$0xff] }
 0x4a0   : > { %v1286_v25 = vmax.f32 %v1270_v11, 0.0  ;;  %v1746_v11 = vld [vmem:[#allocation2 + $0x480] sm:$0xff] }
 0x4a1   : > { %v1287_v28 = vmax.f32 %v1272_v14, 0.0  ;;  %v1762_v14 = vld [vmem:[#allocation2 + $0x500] sm:$0xff] }
 0x4a3   : > { %v1275_v10 = vpop.f32.mrb[12].mxu0 }
 0x4a4   : > { %v1276_v12 = vadd.f32 %v1275_v10, %v1144_v5  ;;  %v1277_v13 = vpop.f32.mrb[13].mxu0  ;;  %v1730_v10 = vld [vmem:[#allocation2 + $0x400] sm:$0xff] }
 0x4a5   : > { %v1278_v15 = vadd.f32 %v1277_v13, %v1148_v7  ;;  %v1279_v16 = vpop.f32.mrb[14].mxu0  ;;  %v4533_v13 = vcombine.low %v1730_v10, %v1746_v11 }
 0x4a6   : > { %v1288_v18 = vmax.f32 %v1276_v12, 0.0  ;;  %v1280_v19 = vadd.f32 %v1279_v16, %v1144_v5  ;;  %v1281_v20 = vpop.f32.mrb[15].mxu0  ;;  %v4470_v5 = vcombine.high %v1666_v3, %v1682_v4  ;;  %v4534_v12 = vcombine.high %v1730_v10, %v1746_v11  ;;  %v1604_v4 = vld [vmem:[#allocation2 + $0x10] sm:$0xff]  ;;  %v4396_v11 = vld [vmem:[%s5564_s13] ss:$0 sm:$0xff] }
 0x4a7   : > { %v1289_v23 = vmax.f32 %v1278_v15, 0.0  ;;  %v1282_v24 = vadd.f32 %v1281_v20, %v1148_v7  ;;  %v1714_v7 = vld [vmem:[#allocation2 + $0x380] sm:$0xff]  ;;  %v4632_v3 = vcombine.high %v1827_v59, %v1843_v61 }
 0x4a8   : > { %v1292_v26 = vmax.f32 %v1284_v17, %v1288_v18  ;;  %v1290_v27 = vmax.f32 %v1280_v19, 0.0  ;;  %v4502_v8 = vcombine.high %v1698_v6, %v1714_v7  ;;  %v4501_v9 = vcombine.low %v1698_v6, %v1714_v7  ;;  %v1778_v15 = vld [vmem:[#allocation2 + $0x580] sm:$0xff]  ;;  %v1621_v7 = vld [vmem:[#allocation2 + $0x98] sm:$0xff] }
 0x4a9   : > { %v1301_v29 = vmax.f32 %v1285_v21, %v1289_v23  ;;  %v1291_v30 = vmax.f32 %v1282_v24, 0.0  ;;  %v4566_v16 = vcombine.high %v1762_v14, %v1778_v15  ;;  %v4565_v17 = vcombine.low %v1762_v14, %v1778_v15  ;;  %v1794_v18 = vld [vmem:[#allocation2 + $0x600] sm:$0xff]  ;;  %v1636_v15 = vld [vmem:[#allocation2 + $0x110] sm:$0xff] }
 0x4aa   : > { %v1293_v31 = vmax.f32 %v1286_v25, %v1290_v27  ;;  %v1810_v19 = vld [vmem:[#allocation2 + $0x680] sm:$0xff] }
 0x4ab   : > { %v1302_v32 = vmax.f32 %v1287_v28, %v1291_v30  ;;  %v4598_v20 = vcombine.high %v1794_v18, %v1810_v19  ;;  %v4597_v21 = vcombine.low %v1794_v18, %v1810_v19  ;;  %v4379_v24 = vld [vmem:[%s5562_s11] ss:$0 sm:$0xff]  ;;  %v1635_v30 = vld [vmem:[#allocation2 + $0x108] sm:$0xff]  ;;  %v1637_v18 = vld [vmem:[#allocation2 + $0x118] sm:$0xff] }
 0x4ac   : > { %v1294_v33 = vmax.f32 %v1292_v26, %v1293_v31  ;;  %v1651_v31 = vld [vmem:[#allocation2 + $0x188] sm:$0xff]  ;;  %v1653_v19 = vld [vmem:[#allocation2 + $0x198] sm:$0xff] }
 0x4ad   : > { %v1303_v34 = vmax.f32 %v1301_v29, %v1302_v32 }
 0x4ae   : > { %v1295_v35 = vrot.slane %v1294_v33, 4 }
 0x4af   : > { %v1304_v36 = vrot.slane %v1303_v34, 4 }
 0x4b0   : > { %v1296_v37 = vmax.f32 %v1294_v33, %v1295_v35  ;;  %v1667_v35 = vld [vmem:[#allocation2 + $0x208] sm:$0xff] }
 0x4b1   : > { %v1305_v38 = vmax.f32 %v1303_v34, %v1304_v36  ;;  %v4440_v34 = vcombine.high %v1635_v30, %v1651_v31  ;;  %v1683_v36 = vld [vmem:[#allocation2 + $0x288] sm:$0xff] }
 0x4b2   : > { %v1297_v39 = vrot.slane %v1296_v37, 2 }
 0x4b3   : > { %v1306_v40 = vrot.slane %v1305_v38, 2 }
 0x4b4   : > { %v1298_v41 = vmax.f32 %v1296_v37, %v1297_v39  ;;  %v4439_v37 = vcombine.low %v1635_v30, %v1651_v31  ;;  %v1699_v39 = vld [vmem:[#allocation2 + $0x308] sm:$0xff]  ;;  %v4443_v31 = vcombine.low %v1637_v18, %v1653_v19 }
 0x4b5   : > { %v1307_v42 = vmax.f32 %v1305_v38, %v1306_v40  ;;  %v4472_v38 = vcombine.high %v1667_v35, %v1683_v36  ;;  %v1715_v40 = vld [vmem:[#allocation2 + $0x388] sm:$0xff] }
 0x4b6   : > { %v1299_v43 = vrot.slane %v1298_v41, 1 }
 0x4b7   : > { %v1308_v44 = vrot.slane %v1307_v42, 1 }
 0x4b8   : > { %v1300_v45 = vmax.f32 %v1298_v41, %v1299_v43  ;;  %v4471_v41 = vcombine.low %v1667_v35, %v1683_v36  ;;  %v1731_v43 = vld [vmem:[#allocation2 + $0x408] sm:$0xff]  ;;  %v1716_v35 = vld [vmem:[#allocation2 + $0x390] sm:$0xff]  ;;  %v1701_v36 = vld [vmem:[#allocation2 + $0x318] sm:$0xff] }
 0x4b9   : > { %v1309_v46 = vmax.f32 %v1307_v42, %v1308_v44  ;;  %v4504_v42 = vcombine.high %v1699_v39, %v1715_v40  ;;  %v1747_v44 = vld [vmem:[#allocation2 + $0x488] sm:$0xff] }
 0x4ba   : > { %v1310_v48 = vpack.c.bf16 %v1300_v45, %v1300_v45  ;;  %v4503_v45 = vcombine.low %v1699_v39, %v1715_v40  ;;  %v4535_v49 = vcombine.low %v1731_v43, %v1747_v44 }
 0x4bb   : > { %v1311_v47 = vpack.c.bf16 %v1309_v46, %v1309_v46  ;;  %v4536_v46 = vcombine.high %v1731_v43, %v1747_v44  ;;  %v1748_v43 = vld [vmem:[#allocation2 + $0x490] sm:$0xff]  ;;  %v1733_v44 = vld [vmem:[#allocation2 + $0x418] sm:$0xff] }
 0x4bd   : > { %1479 = vmatprep.mubr.bf16.mxu1 %v1311_v47  ;;  %v1763_v47 = vld [vmem:[#allocation2 + $0x508] sm:$0xff] }
 0x4be   : > { %1480 = vmatmul.mubr.bf16.vlgmr.msra.gmra.mrb[8].mxu1 %v1310_v48  ;;  %v1779_v48 = vld [vmem:[#allocation2 + $0x588] sm:$0xff] }
 0x4bf   : > { %3338 = vmatprep.mubr.bf16.mxu1 %v5002_v22  ;;  %3307 = vmatpush1.bf16.msra.mxu1 %v4405_v54  ;;  %v4568_v50 = vcombine.high %v1763_v47, %v1779_v48  ;;  %v4567_v53 = vcombine.low %v1763_v47, %v1779_v48  ;;  %v4600_v54 = vcombine.high %v1795_v51, %v1811_v52  ;;  %v1780_v51 = vld [vmem:[#allocation2 + $0x590] sm:$0xff]  ;;  %v1765_v52 = vld [vmem:[#allocation2 + $0x518] sm:$0xff] }
 0x4c0   : > { %3308 = vmatprep.subr.bf16.mxu1 %v4438_v0  ;;  %v4629_v0 = vcombine.low %v1826_v57, %v1842_v58 }
 0x4c3   : > { %3309 = vmatpush1.bf16.msra.mxu1 %v4437_v1  ;;  %v4631_v1 = vcombine.low %v1827_v59, %v1843_v61  ;;  %v1796_v59 = vld [vmem:[#allocation2 + $0x610] sm:$0xff]  ;;  %v1797_v61 = vld [vmem:[#allocation2 + $0x618] sm:$0xff] }
 0x4c4   : > { %3310 = vmatprep.subr.bf16.mxu1 %v4470_v5  ;;  %v1620_v5 = vld [vmem:[#allocation2 + $0x90] sm:$0xff] }
 0x4c5   : > { %v4410_v6 = vcombine.high %v1604_v4, %v1620_v5 }
 0x4c7   : > { %3311 = vmatpush1.bf16.msra.mxu1 %v4469_v55  ;;  %v1605_v55 = vld [vmem:[#allocation2 + $0x18] sm:$0xff] }
 0x4c8   : > { %3312 = vmatprep.subr.bf16.mxu1 %v4502_v8  ;;  %v4409_v8 = vcombine.low %v1604_v4, %v1620_v5  ;;  %v4412_v10 = vcombine.high %v1605_v55, %v1621_v7 }
 0x4cb   : > { %3313 = vmatpush1.bf16.msra.mxu1 %v4501_v9  ;;  %v4411_v9 = vcombine.low %v1605_v55, %v1621_v7  ;;  %v1828_v55 = vld [vmem:[#allocation2 + $0x710] sm:$0xff]  ;;  %v1829_v7 = vld [vmem:[#allocation2 + $0x718] sm:$0xff] }
 0x4cc   : > { %3314 = vmatprep.subr.bf16.mxu1 %v4534_v12 }
 0x4cf   : > { %3315 = vmatpush1.bf16.msra.mxu1 %v4533_v13 }
 0x4d0   : > { %3316 = vmatprep.subr.bf16.mxu1 %v4566_v16 }
 0x4d3   : > { %3317 = vmatpush1.bf16.msra.mxu1 %v4565_v17  ;;  %v1652_v17 = vld [vmem:[#allocation2 + $0x190] sm:$0xff] }
 0x4d4   : > { %3318 = vmatprep.subr.bf16.mxu1 %v4598_v20  ;;  %v4441_v30 = vcombine.low %v1636_v15, %v1652_v17 }
 0x4d7   : > { %3319 = vmatpush1.bf16.msra.mxu1 %v4597_v21 }
 0x591   : > { %v4737_v23 = vpop.f32.mrb[8].mxu1 }
 0x592   : > { %v4738_v25 = vpop.f32.mrb[9].mxu1 }
 0x593   : > { %v4739_v26 = vadd.f32 %v4738_v25, %v4737_v23  ;;  %v4740_v27 = vpop.f32.mrb[10].mxu1  ;;  %v4444_v25 = vcombine.high %v1637_v18, %v1653_v19 }
 0x594   : > { %v4741_v28 = vpop.f32.mrb[11].mxu1  ;;  %v1684_v27 = vld [vmem:[#allocation2 + $0x290] sm:$0xff] }
 0x595   : > { %v1482_v29 = vadd.f32 %v4739_v26, %v4379_v24  ;;  %v4442_v24 = vcombine.high %v1636_v15, %v1652_v17  ;;  %v1668_v26 = vld [vmem:[#allocation2 + $0x210] sm:$0xff]  ;;  %v1669_v28 = vld [vmem:[#allocation2 + $0x218] sm:$0xff]  ;;  %v1607_v15 = vld [vmem:[#allocation2 + $0x28] sm:$0xff] }
 0x597   : > { %v1487_v32 = vmax.f32 %v1482_v29, 0.0  ;;  %v1685_v29 = vld [vmem:[#allocation2 + $0x298] sm:$0xff] }
 0x598   : > { %v4475_v39 = vcombine.low %v1669_v28, %v1685_v29 }
 0x599   : > { %v1488_v33 = vpack.c.bf16 %v1487_v32, %v1487_v32  ;;  %v4474_v32 = vcombine.high %v1668_v26, %v1684_v27 }
 0x59b   : > { %4849 = vmatmul.mubr.bf16.vlgmr.msra.gmra.mrb[16].mxu0 %v1488_v33  ;;  %v4476_v33 = vcombine.high %v1669_v28, %v1685_v29 }
 0x59c   : > { %3348 = vmatpush1.bf16.msra.mxu0 %v4407_v60  ;;  %3379 = vmatprep.mubr.bf16.mxu0 %v5002_v22  ;;  %v4630_v60 = vcombine.high %v1826_v57, %v1842_v58 }
 0x59d   : > { %3349 = vmatprep.subr.bf16.mxu0 %v4440_v34  ;;  %v1700_v34 = vld [vmem:[#allocation2 + $0x310] sm:$0xff] }
 0x59e   : > { %3320 = vmatprep.subr.bf16.mxu1 %v4630_v60  ;;  %v4506_v40 = vcombine.high %v1700_v34, %v1716_v35  ;;  %v1812_v60 = vld [vmem:[#allocation2 + $0x690] sm:$0xff] }
 0x59f   : > { %3321 = vmatpush1.bf16.msra.mxu1 %v4629_v0  ;;  %v1813_v0 = vld [vmem:[#allocation2 + $0x698] sm:$0xff]  ;;  %v4602_v4 = vcombine.high %v1796_v59, %v1812_v60 }
 0x5a0   : > { %3350 = vmatpush1.bf16.msra.mxu0 %v4439_v37  ;;  %3388 = vmatprep.subr.bf16.mxu1 %v4410_v6  ;;  %v1717_v37 = vld [vmem:[#allocation2 + $0x398] sm:$0xff]  ;;  %v4604_v5 = vcombine.high %v1797_v61, %v1813_v0  ;;  %v1844_v6 = vld [vmem:[#allocation2 + $0x790] sm:$0xff] }
 0x5a1   : > { %3351 = vmatprep.subr.bf16.mxu0 %v4472_v38  ;;  %v4473_v38 = vcombine.low %v1668_v26, %v1684_v27  ;;  %v4507_v47 = vcombine.low %v1701_v36, %v1717_v37  ;;  %v4633_v17 = vcombine.low %v1828_v55, %v1844_v6  ;;  %v1655_v26 = vld [vmem:[#allocation2 + $0x1a8] sm:$0xff] }
 0x5a4   : > { %3352 = vmatpush1.bf16.msra.mxu0 %v4471_v41  ;;  %v4508_v41 = vcombine.high %v1701_v36, %v1717_v37 }
 0x5a5   : > { %3353 = vmatprep.subr.bf16.mxu0 %v4504_v42  ;;  %v1732_v42 = vld [vmem:[#allocation2 + $0x410] sm:$0xff] }
 0x5a6   : > { %v4538_v48 = vcombine.high %v1732_v42, %v1748_v43 }
 0x5a8   : > { %3354 = vmatpush1.bf16.msra.mxu0 %v4503_v45  ;;  %v1749_v45 = vld [vmem:[#allocation2 + $0x498] sm:$0xff] }
 0x5a9   : > { %3355 = vmatprep.subr.bf16.mxu0 %v4536_v46  ;;  %v4505_v46 = vcombine.low %v1700_v34, %v1716_v35  ;;  %v1687_v34 = vld [vmem:[#allocation2 + $0x2a8] sm:$0xff] }
 0x5ac   : > { %3356 = vmatpush1.bf16.msra.mxu0 %v4535_v49  ;;  %v4540_v49 = vcombine.high %v1733_v44, %v1749_v45 }
 0x5ad   : > { %3357 = vmatprep.subr.bf16.mxu0 %v4568_v50  ;;  %v1764_v50 = vld [vmem:[#allocation2 + $0x510] sm:$0xff] }
 0x5ae   : > { %v4570_v57 = vcombine.high %v1764_v50, %v1780_v51 }
 0x5b0   : > { %3358 = vmatpush1.bf16.msra.mxu0 %v4567_v53  ;;  %v1781_v53 = vld [vmem:[#allocation2 + $0x598] sm:$0xff] }
 0x5b1   : > { %3359 = vmatprep.subr.bf16.mxu0 %v4600_v54  ;;  %v4537_v54 = vcombine.low %v1732_v42, %v1748_v43  ;;  %v4572_v58 = vcombine.high %v1765_v52, %v1781_v53  ;;  %v1719_v42 = vld [vmem:[#allocation2 + $0x3a8] sm:$0xff] }
 0x5b4   : > { %3360 = vmatpush1.bf16.msra.mxu0 %v4599_v56  ;;  %v4539_v56 = vcombine.low %v1733_v44, %v1749_v45 }
 0x5b5   : > { %3361 = vmatprep.subr.bf16.mxu0 %v4632_v3  ;;  %v4571_v3 = vcombine.low %v1765_v52, %v1781_v53 }
 0x5b8   : > { %3362 = vmatpush1.bf16.msra.mxu0 %v4631_v1  ;;  %v4569_v1 = vcombine.low %v1764_v50, %v1780_v51  ;;  %v1751_v50 = vld [vmem:[#allocation2 + $0x4a8] sm:$0xff] }
 0x5b9   : > { %3429 = vmatprep.subr.bf16.mxu0 %v4412_v10  ;;  %v4603_v10 = vcombine.low %v1797_v61, %v1813_v0 }
 0x66e   : > { %v1594_v12 = vpop.f32.mrb[16].mxu0 }
 0x66f   : > { %v1595_v13 = vadd.f32 %v4396_v11, %v1594_v12  ;;  %v4850_v14 = vpop.f32.mrb[17].mxu0  ;;  %v4634_v11 = vcombine.high %v1828_v55, %v1844_v6  ;;  %v1815_v55 = vld [vmem:[#allocation2 + $0x6a8] sm:$0xff] }
 0x670   : > { %v1597_v16 = vpop.f32.mrb[18].mxu0  ;;  %v1622_v14 = vld [vmem:[#allocation2 + $0xa0] sm:$0xff] }
 0x671   : > { %v1600_v20 = vmax.f32 %v1595_v13, 0.0  ;;  %v4851_v21 = vpop.f32.mrb[19].mxu0  ;;  %v1606_v13 = vld [vmem:[#allocation2 + $0x20] sm:$0xff]  ;;  %v1623_v16 = vld [vmem:[#allocation2 + $0xa8] sm:$0xff] }
 0x672   : > { %v4414_v19 = vcombine.high %v1606_v13, %v1622_v14  ;;  %v1638_v21 = vld [vmem:[#allocation2 + $0x120] sm:$0xff]  ;;  %v4413_v27 = vcombine.low %v1606_v13, %v1622_v14  ;;  %v4415_v28 = vcombine.low %v1607_v15, %v1623_v16  ;;  %v1847_v13 = vld [vmem:[#allocation2 + $0x7a8] sm:$0xff] }
 0x673   : > { %v5407_v23 = vpack.c.bf16 %v1600_v20, %v1600_v20  ;;  %v4416_v20 = vcombine.high %v1607_v15, %v1623_v16 }
 0x675   : > { %3339 = vmatmul.mubr.bf16.vlgmr.msra.gmra.mrb[12].mxu1 %v5407_v23  ;;  %3380 = vmatmul.mubr.bf16.vlgmr.msra.gmra.mrb[20].mxu0 %v5407_v23 }
 0x676   : > { %3389 = vmatpush1.bf16.msra.mxu1 %v4409_v8  ;;  %3430 = vmatpush1.bf16.msra.mxu0 %v4411_v9  ;;  %v1845_v8 = vld [vmem:[#allocation2 + $0x798] sm:$0xff]  ;;  %v4601_v9 = vcombine.low %v1796_v59, %v1812_v60  ;;  %v1783_v59 = vld [vmem:[#allocation2 + $0x5a8] sm:$0xff] }
 0x677   : > { %3390 = vmatprep.subr.bf16.mxu1 %v4442_v24  ;;  %3431 = vmatprep.subr.bf16.mxu0 %v4444_v25  ;;  %v4636_v12 = vcombine.high %v1829_v7, %v1845_v8  ;;  %v4635_v18 = vcombine.low %v1829_v7, %v1845_v8  ;;  %v1654_v24 = vld [vmem:[#allocation2 + $0x1a0] sm:$0xff]  ;;  %v1639_v25 = vld [vmem:[#allocation2 + $0x128] sm:$0xff] }
 0x678   : > { %3420 = vmatprep.mubr.bf16.mxu1 %v5002_v22  ;;  %3461 = vmatprep.mubr.bf16.mxu0 %v5002_v22  ;;  %v4446_v29 = vcombine.high %v1638_v21, %v1654_v24  ;;  %v4445_v35 = vcombine.low %v1638_v21, %v1654_v24  ;;  %v4447_v36 = vcombine.low %v1639_v25, %v1655_v26  ;;  %v1625_v21 = vld [vmem:[#allocation2 + $0xb8] sm:$0xff] }
 0x67a   : > { %3391 = vmatpush1.bf16.msra.mxu1 %v4441_v30  ;;  %3432 = vmatpush1.bf16.msra.mxu0 %v4443_v31  ;;  %v4448_v30 = vcombine.high %v1639_v25, %v1655_v26  ;;  %v1670_v31 = vld [vmem:[#allocation2 + $0x220] sm:$0xff] }
 0x67b   : > { %3392 = vmatprep.subr.bf16.mxu1 %v4474_v32  ;;  %3433 = vmatprep.subr.bf16.mxu0 %v4476_v33  ;;  %v1686_v32 = vld [vmem:[#allocation2 + $0x2a0] sm:$0xff]  ;;  %v1671_v33 = vld [vmem:[#allocation2 + $0x228] sm:$0xff] }
 0x67c   : > { %v4478_v37 = vcombine.high %v1670_v31, %v1686_v32  ;;  %v4477_v43 = vcombine.low %v1670_v31, %v1686_v32  ;;  %v4479_v44 = vcombine.low %v1671_v33, %v1687_v34  ;;  %v1657_v31 = vld [vmem:[#allocation2 + $0x1b8] sm:$0xff] }
 0x67e   : > { %3393 = vmatpush1.bf16.msra.mxu1 %v4473_v38  ;;  %3434 = vmatpush1.bf16.msra.mxu0 %v4475_v39  ;;  %v4480_v38 = vcombine.high %v1671_v33, %v1687_v34  ;;  %v1702_v39 = vld [vmem:[#allocation2 + $0x320] sm:$0xff] }
 0x67f   : > { %3394 = vmatprep.subr.bf16.mxu1 %v4506_v40  ;;  %3435 = vmatprep.subr.bf16.mxu0 %v4508_v41  ;;  %v1718_v40 = vld [vmem:[#allocation2 + $0x3a0] sm:$0xff]  ;;  %v1703_v41 = vld [vmem:[#allocation2 + $0x328] sm:$0xff] }
 0x680   : > { %v4510_v45 = vcombine.high %v1702_v39, %v1718_v40  ;;  %v4509_v51 = vcombine.low %v1702_v39, %v1718_v40  ;;  %v4511_v52 = vcombine.low %v1703_v41, %v1719_v42  ;;  %v1689_v39 = vld [vmem:[#allocation2 + $0x2b8] sm:$0xff] }
 0x682   : > { %3395 = vmatpush1.bf16.msra.mxu1 %v4505_v46  ;;  %3436 = vmatpush1.bf16.msra.mxu0 %v4507_v47  ;;  %v4512_v46 = vcombine.high %v1703_v41, %v1719_v42  ;;  %v1734_v47 = vld [vmem:[#allocation2 + $0x420] sm:$0xff] }
 0x683   : > { %3396 = vmatprep.subr.bf16.mxu1 %v4538_v48  ;;  %3437 = vmatprep.subr.bf16.mxu0 %v4540_v49  ;;  %v1750_v48 = vld [vmem:[#allocation2 + $0x4a0] sm:$0xff]  ;;  %v1735_v49 = vld [vmem:[#allocation2 + $0x428] sm:$0xff] }
 0x684   : > { %v4542_v53 = vcombine.high %v1734_v47, %v1750_v48  ;;  %v4541_v60 = vcombine.low %v1734_v47, %v1750_v48  ;;  %v4543_v61 = vcombine.low %v1735_v49, %v1751_v50  ;;  %v1721_v47 = vld [vmem:[#allocation2 + $0x3b8] sm:$0xff] }
 0x686   : > { %3397 = vmatpush1.bf16.msra.mxu1 %v4537_v54  ;;  %3438 = vmatpush1.bf16.msra.mxu0 %v4539_v56  ;;  %v4544_v54 = vcombine.high %v1735_v49, %v1751_v50  ;;  %v1766_v56 = vld [vmem:[#allocation2 + $0x520] sm:$0xff] }
 0x687   : > { %3398 = vmatprep.subr.bf16.mxu1 %v4570_v57  ;;  %3439 = vmatprep.subr.bf16.mxu0 %v4572_v58  ;;  %v1782_v57 = vld [vmem:[#allocation2 + $0x5a0] sm:$0xff]  ;;  %v1767_v58 = vld [vmem:[#allocation2 + $0x528] sm:$0xff] }
 0x688   : > { %v4574_v0 = vcombine.high %v1766_v56, %v1782_v57  ;;  %v4573_v6 = vcombine.low %v1766_v56, %v1782_v57  ;;  %v4575_v7 = vcombine.low %v1767_v58, %v1783_v59  ;;  %v1753_v56 = vld [vmem:[#allocation2 + $0x4b8] sm:$0xff] }
 0x68a   : > { %3399 = vmatpush1.bf16.msra.mxu1 %v4569_v1  ;;  %3440 = vmatpush1.bf16.msra.mxu0 %v4571_v3  ;;  %v4576_v1 = vcombine.high %v1767_v58, %v1783_v59  ;;  %v1798_v3 = vld [vmem:[#allocation2 + $0x620] sm:$0xff] }
 0x68b   : > { %3400 = vmatprep.subr.bf16.mxu1 %v4602_v4  ;;  %3441 = vmatprep.subr.bf16.mxu0 %v4604_v5  ;;  %v1814_v4 = vld [vmem:[#allocation2 + $0x6a0] sm:$0xff]  ;;  %v1799_v5 = vld [vmem:[#allocation2 + $0x628] sm:$0xff] }
 0x68c   : > { %v4606_v8 = vcombine.high %v1798_v3, %v1814_v4  ;;  %v4605_v14 = vcombine.low %v1798_v3, %v1814_v4  ;;  %v4607_v15 = vcombine.low %v1799_v5, %v1815_v55  ;;  %v1785_v3 = vld [vmem:[#allocation2 + $0x5b8] sm:$0xff] }
 0x68e   : > { %3401 = vmatpush1.bf16.msra.mxu1 %v4601_v9  ;;  %3442 = vmatpush1.bf16.msra.mxu0 %v4603_v10  ;;  %v4608_v9 = vcombine.high %v1799_v5, %v1815_v55  ;;  %v1830_v10 = vld [vmem:[#allocation2 + $0x720] sm:$0xff] }
 0x68f   : > { %3402 = vmatprep.subr.bf16.mxu1 %v4634_v11  ;;  %3443 = vmatprep.subr.bf16.mxu0 %v4636_v12  ;;  %v1846_v11 = vld [vmem:[#allocation2 + $0x7a0] sm:$0xff]  ;;  %v1831_v12 = vld [vmem:[#allocation2 + $0x728] sm:$0xff] }
 0x690   : > { %v4638_v16 = vcombine.high %v1830_v10, %v1846_v11  ;;  %v4637_v24 = vcombine.low %v1830_v10, %v1846_v11  ;;  %v4639_v25 = vcombine.low %v1831_v12, %v1847_v13  ;;  %v1817_v10 = vld [vmem:[#allocation2 + $0x6b8] sm:$0xff] }
 0x692   : > { %3403 = vmatpush1.bf16.msra.mxu1 %v4633_v17  ;;  %3444 = vmatpush1.bf16.msra.mxu0 %v4635_v18  ;;  %v4640_v17 = vcombine.high %v1831_v12, %v1847_v13  ;;  %v1608_v18 = vld [vmem:[#allocation2 + $0x30] sm:$0xff] }
 0x693   : > { %3470 = vmatprep.subr.bf16.mxu1 %v4414_v19  ;;  %3511 = vmatprep.subr.bf16.mxu0 %v4416_v20  ;;  %v1624_v19 = vld [vmem:[#allocation2 + $0xb0] sm:$0xff]  ;;  %v1609_v20 = vld [vmem:[#allocation2 + $0x38] sm:$0xff] }
 0x694   : > { %v4418_v26 = vcombine.high %v1608_v18, %v1624_v19  ;;  %v4417_v32 = vcombine.low %v1608_v18, %v1624_v19  ;;  %v4419_v33 = vcombine.low %v1609_v20, %v1625_v21  ;;  %v1849_v18 = vld [vmem:[#allocation2 + $0x7b8] sm:$0xff] }
 0x695   : > { %3421 = vmatmul.mubr.bf16.vlgmr.msra.gmra.mrb[16].mxu1 %v5407_v23  ;;  %3462 = vmatmul.mubr.bf16.vlgmr.msra.gmra.mrb[24].mxu0 %v5407_v23 }
 0x696   : > { %3471 = vmatpush1.bf16.msra.mxu1 %v4413_v27  ;;  %3512 = vmatpush1.bf16.msra.mxu0 %v4415_v28  ;;  %v4420_v27 = vcombine.high %v1609_v20, %v1625_v21  ;;  %v1640_v28 = vld [vmem:[#allocation2 + $0x130] sm:$0xff] }
 0x697   : > { %3472 = vmatprep.subr.bf16.mxu1 %v4446_v29  ;;  %3513 = vmatprep.subr.bf16.mxu0 %v4448_v30  ;;  %v1656_v29 = vld [vmem:[#allocation2 + $0x1b0] sm:$0xff]  ;;  %v1641_v30 = vld [vmem:[#allocation2 + $0x138] sm:$0xff] }
 0x698   : > { %3502 = vmatprep.mubr.bf16.mxu1 %v5002_v22  ;;  %3543 = vmatprep.mubr.bf16.mxu0 %v5002_v22  ;;  %v4450_v34 = vcombine.high %v1640_v28, %v1656_v29  ;;  %v4449_v40 = vcombine.low %v1640_v28, %v1656_v29  ;;  %v4451_v41 = vcombine.low %v1641_v30, %v1657_v31  ;;  %v1627_v28 = vld [vmem:[#allocation2 + $0xc8] sm:$0xff] }
 0x69a   : > { %3473 = vmatpush1.bf16.msra.mxu1 %v4445_v35  ;;  %3514 = vmatpush1.bf16.msra.mxu0 %v4447_v36  ;;  %v4452_v35 = vcombine.high %v1641_v30, %v1657_v31  ;;  %v1672_v36 = vld [vmem:[#allocation2 + $0x230] sm:$0xff] }
 0x69b   : > { %3474 = vmatprep.subr.bf16.mxu1 %v4478_v37  ;;  %3515 = vmatprep.subr.bf16.mxu0 %v4480_v38  ;;  %v1688_v37 = vld [vmem:[#allocation2 + $0x2b0] sm:$0xff]  ;;  %v1673_v38 = vld [vmem:[#allocation2 + $0x238] sm:$0xff] }
 0x69c   : > { %v4482_v42 = vcombine.high %v1672_v36, %v1688_v37  ;;  %v4481_v48 = vcombine.low %v1672_v36, %v1688_v37  ;;  %v4483_v49 = vcombine.low %v1673_v38, %v1689_v39  ;;  %v1659_v36 = vld [vmem:[#allocation2 + $0x1c8] sm:$0xff] }
 0x69e   : > { %3475 = vmatpush1.bf16.msra.mxu1 %v4477_v43  ;;  %3516 = vmatpush1.bf16.msra.mxu0 %v4479_v44  ;;  %v4484_v43 = vcombine.high %v1673_v38, %v1689_v39  ;;  %v1704_v44 = vld [vmem:[#allocation2 + $0x330] sm:$0xff] }
 0x69f   : > { %3476 = vmatprep.subr.bf16.mxu1 %v4510_v45  ;;  %3517 = vmatprep.subr.bf16.mxu0 %v4512_v46  ;;  %v1720_v45 = vld [vmem:[#allocation2 + $0x3b0] sm:$0xff]  ;;  %v1705_v46 = vld [vmem:[#allocation2 + $0x338] sm:$0xff] }
 0x6a0   : > { %v4514_v50 = vcombine.high %v1704_v44, %v1720_v45  ;;  %v4513_v57 = vcombine.low %v1704_v44, %v1720_v45  ;;  %v4515_v58 = vcombine.low %v1705_v46, %v1721_v47  ;;  %v1691_v44 = vld [vmem:[#allocation2 + $0x2c8] sm:$0xff] }
 0x6a2   : > { %3477 = vmatpush1.bf16.msra.mxu1 %v4509_v51  ;;  %3518 = vmatpush1.bf16.msra.mxu0 %v4511_v52  ;;  %v4516_v51 = vcombine.high %v1705_v46, %v1721_v47  ;;  %v1736_v52 = vld [vmem:[#allocation2 + $0x430] sm:$0xff] }
 0x6a3   : > { %3478 = vmatprep.subr.bf16.mxu1 %v4542_v53  ;;  %3519 = vmatprep.subr.bf16.mxu0 %v4544_v54  ;;  %v1752_v53 = vld [vmem:[#allocation2 + $0x4b0] sm:$0xff]  ;;  %v1737_v54 = vld [vmem:[#allocation2 + $0x438] sm:$0xff] }
 0x6a4   : > { %v4546_v59 = vcombine.high %v1736_v52, %v1752_v53  ;;  %v4545_v4 = vcombine.low %v1736_v52, %v1752_v53  ;;  %v4547_v5 = vcombine.low %v1737_v54, %v1753_v56  ;;  %v1723_v52 = vld [vmem:[#allocation2 + $0x3c8] sm:$0xff] }
 0x6a6   : > { %3479 = vmatpush1.bf16.msra.mxu1 %v4541_v60  ;;  %3520 = vmatpush1.bf16.msra.mxu0 %v4543_v61  ;;  %v4548_v60 = vcombine.high %v1737_v54, %v1753_v56  ;;  %v1768_v61 = vld [vmem:[#allocation2 + $0x530] sm:$0xff] }
 0x6a7   : > { %3480 = vmatprep.subr.bf16.mxu1 %v4574_v0  ;;  %3521 = vmatprep.subr.bf16.mxu0 %v4576_v1  ;;  %v1784_v0 = vld [vmem:[#allocation2 + $0x5b0] sm:$0xff]  ;;  %v1769_v1 = vld [vmem:[#allocation2 + $0x538] sm:$0xff] }
 0x6a8   : > { %v4578_v55 = vcombine.high %v1768_v61, %v1784_v0  ;;  %v4577_v11 = vcombine.low %v1768_v61, %v1784_v0  ;;  %v4579_v12 = vcombine.low %v1769_v1, %v1785_v3  ;;  %v1755_v61 = vld [vmem:[#allocation2 + $0x4c8] sm:$0xff] }
 0x6aa   : > { %3481 = vmatpush1.bf16.msra.mxu1 %v4573_v6  ;;  %3522 = vmatpush1.bf16.msra.mxu0 %v4575_v7  ;;  %v4580_v6 = vcombine.high %v1769_v1, %v1785_v3  ;;  %v1800_v7 = vld [vmem:[#allocation2 + $0x630] sm:$0xff] }
 0x6ab   : > { %3482 = vmatprep.subr.bf16.mxu1 %v4606_v8  ;;  %3523 = vmatprep.subr.bf16.mxu0 %v4608_v9  ;;  %v1816_v8 = vld [vmem:[#allocation2 + $0x6b0] sm:$0xff]  ;;  %v1801_v9 = vld [vmem:[#allocation2 + $0x638] sm:$0xff] }
 0x6ac   : > { %v4610_v13 = vcombine.high %v1800_v7, %v1816_v8  ;;  %v4609_v19 = vcombine.low %v1800_v7, %v1816_v8  ;;  %v4611_v20 = vcombine.low %v1801_v9, %v1817_v10  ;;  %v1787_v7 = vld [vmem:[#allocation2 + $0x5c8] sm:$0xff] }
 0x6ae   : > { %3483 = vmatpush1.bf16.msra.mxu1 %v4605_v14  ;;  %3524 = vmatpush1.bf16.msra.mxu0 %v4607_v15  ;;  %v4612_v14 = vcombine.high %v1801_v9, %v1817_v10  ;;  %v1832_v15 = vld [vmem:[#allocation2 + $0x730] sm:$0xff] }
 0x6af   : > { %3484 = vmatprep.subr.bf16.mxu1 %v4638_v16  ;;  %3525 = vmatprep.subr.bf16.mxu0 %v4640_v17  ;;  %v1848_v16 = vld [vmem:[#allocation2 + $0x7b0] sm:$0xff]  ;;  %v1833_v17 = vld [vmem:[#allocation2 + $0x738] sm:$0xff] }
 0x6b0   : > { %v4642_v21 = vcombine.high %v1832_v15, %v1848_v16  ;;  %v4641_v29 = vcombine.low %v1832_v15, %v1848_v16  ;;  %v4643_v30 = vcombine.low %v1833_v17, %v1849_v18  ;;  %v1819_v15 = vld [vmem:[#allocation2 + $0x6c8] sm:$0xff] }
 0x6b2   : > { %3485 = vmatpush1.bf16.msra.mxu1 %v4637_v24  ;;  %3526 = vmatpush1.bf16.msra.mxu0 %v4639_v25  ;;  %v4644_v24 = vcombine.high %v1833_v17, %v1849_v18  ;;  %v1610_v25 = vld [vmem:[#allocation2 + $0x40] sm:$0xff] }
 0x6b3   : > { %3552 = vmatprep.subr.bf16.mxu1 %v4418_v26  ;;  %3593 = vmatprep.subr.bf16.mxu0 %v4420_v27  ;;  %v1626_v26 = vld [vmem:[#allocation2 + $0xc0] sm:$0xff]  ;;  %v1611_v27 = vld [vmem:[#allocation2 + $0x48] sm:$0xff] }
 0x6b4   : > { %v4422_v31 = vcombine.high %v1610_v25, %v1626_v26  ;;  %v4421_v37 = vcombine.low %v1610_v25, %v1626_v26  ;;  %v4423_v38 = vcombine.low %v1611_v27, %v1627_v28  ;;  %v1851_v25 = vld [vmem:[#allocation2 + $0x7c8] sm:$0xff] }
 0x6b5   : > { %3503 = vmatmul.mubr.bf16.vlgmr.msra.gmra.mrb[20].mxu1 %v5407_v23  ;;  %3544 = vmatmul.mubr.bf16.vlgmr.msra.gmra.mrb[28].mxu0 %v5407_v23 }
 0x6b6   : > { %3553 = vmatpush1.bf16.msra.mxu1 %v4417_v32  ;;  %3594 = vmatpush1.bf16.msra.mxu0 %v4419_v33  ;;  %v4424_v32 = vcombine.high %v1611_v27, %v1627_v28  ;;  %v1642_v33 = vld [vmem:[#allocation2 + $0x140] sm:$0xff] }
 0x6b7   : > { %3554 = vmatprep.subr.bf16.mxu1 %v4450_v34  ;;  %3595 = vmatprep.subr.bf16.mxu0 %v4452_v35  ;;  %v1658_v34 = vld [vmem:[#allocation2 + $0x1c0] sm:$0xff]  ;;  %v1643_v35 = vld [vmem:[#allocation2 + $0x148] sm:$0xff] }
 0x6b8   : > { %3584 = vmatprep.mubr.bf16.mxu1 %v5002_v22  ;;  %3625 = vmatprep.mubr.bf16.mxu0 %v5002_v22  ;;  %v4454_v39 = vcombine.high %v1642_v33, %v1658_v34  ;;  %v4453_v45 = vcombine.low %v1642_v33, %v1658_v34  ;;  %v4455_v46 = vcombine.low %v1643_v35, %v1659_v36  ;;  %v1629_v33 = vld [vmem:[#allocation2 + $0xd8] sm:$0xff] }
 0x6ba   : > { %3555 = vmatpush1.bf16.msra.mxu1 %v4449_v40  ;;  %3596 = vmatpush1.bf16.msra.mxu0 %v4451_v41  ;;  %v4456_v40 = vcombine.high %v1643_v35, %v1659_v36  ;;  %v1674_v41 = vld [vmem:[#allocation2 + $0x240] sm:$0xff] }
 0x6bb   : > { %3556 = vmatprep.subr.bf16.mxu1 %v4482_v42  ;;  %3597 = vmatprep.subr.bf16.mxu0 %v4484_v43  ;;  %v1690_v42 = vld [vmem:[#allocation2 + $0x2c0] sm:$0xff]  ;;  %v1675_v43 = vld [vmem:[#allocation2 + $0x248] sm:$0xff] }
 0x6bc   : > { %v4486_v47 = vcombine.high %v1674_v41, %v1690_v42  ;;  %v4485_v53 = vcombine.low %v1674_v41, %v1690_v42  ;;  %v4487_v54 = vcombine.low %v1675_v43, %v1691_v44  ;;  %v1661_v41 = vld [vmem:[#allocation2 + $0x1d8] sm:$0xff] }
 0x6be   : > { %3557 = vmatpush1.bf16.msra.mxu1 %v4481_v48  ;;  %3598 = vmatpush1.bf16.msra.mxu0 %v4483_v49  ;;  %v4488_v48 = vcombine.high %v1675_v43, %v1691_v44  ;;  %v1706_v49 = vld [vmem:[#allocation2 + $0x340] sm:$0xff] }
 0x6bf   : > { %3558 = vmatprep.subr.bf16.mxu1 %v4514_v50  ;;  %3599 = vmatprep.subr.bf16.mxu0 %v4516_v51  ;;  %v1722_v50 = vld [vmem:[#allocation2 + $0x3c0] sm:$0xff]  ;;  %v1707_v51 = vld [vmem:[#allocation2 + $0x348] sm:$0xff] }
 0x6c0   : > { %v4518_v56 = vcombine.high %v1706_v49, %v1722_v50  ;;  %v4517_v0 = vcombine.low %v1706_v49, %v1722_v50  ;;  %v4519_v1 = vcombine.low %v1707_v51, %v1723_v52  ;;  %v1693_v49 = vld [vmem:[#allocation2 + $0x2d8] sm:$0xff] }
 0x6c2   : > { %3559 = vmatpush1.bf16.msra.mxu1 %v4513_v57  ;;  %3600 = vmatpush1.bf16.msra.mxu0 %v4515_v58  ;;  %v4520_v57 = vcombine.high %v1707_v51, %v1723_v52  ;;  %v1738_v58 = vld [vmem:[#allocation2 + $0x440] sm:$0xff] }
 0x6c3   : > { %3560 = vmatprep.subr.bf16.mxu1 %v4546_v59  ;;  %3601 = vmatprep.subr.bf16.mxu0 %v4548_v60  ;;  %v1754_v59 = vld [vmem:[#allocation2 + $0x4c0] sm:$0xff]  ;;  %v1739_v60 = vld [vmem:[#allocation2 + $0x448] sm:$0xff] }
 0x6c4   : > { %v4550_v3 = vcombine.high %v1738_v58, %v1754_v59  ;;  %v4549_v8 = vcombine.low %v1738_v58, %v1754_v59  ;;  %v4551_v9 = vcombine.low %v1739_v60, %v1755_v61  ;;  %v1725_v58 = vld [vmem:[#allocation2 + $0x3d8] sm:$0xff] }
 0x6c6   : > { %3561 = vmatpush1.bf16.msra.mxu1 %v4545_v4  ;;  %3602 = vmatpush1.bf16.msra.mxu0 %v4547_v5  ;;  %v4552_v4 = vcombine.high %v1739_v60, %v1755_v61  ;;  %v1770_v5 = vld [vmem:[#allocation2 + $0x540] sm:$0xff] }
 0x6c7   : > { %3562 = vmatprep.subr.bf16.mxu1 %v4578_v55  ;;  %3603 = vmatprep.subr.bf16.mxu0 %v4580_v6  ;;  %v1786_v55 = vld [vmem:[#allocation2 + $0x5c0] sm:$0xff]  ;;  %v1771_v6 = vld [vmem:[#allocation2 + $0x548] sm:$0xff] }
 0x6c8   : > { %v4582_v10 = vcombine.high %v1770_v5, %v1786_v55  ;;  %v4581_v16 = vcombine.low %v1770_v5, %v1786_v55  ;;  %v4583_v17 = vcombine.low %v1771_v6, %v1787_v7  ;;  %v1757_v5 = vld [vmem:[#allocation2 + $0x4d8] sm:$0xff] }
 0x6ca   : > { %3563 = vmatpush1.bf16.msra.mxu1 %v4577_v11  ;;  %3604 = vmatpush1.bf16.msra.mxu0 %v4579_v12  ;;  %v4584_v11 = vcombine.high %v1771_v6, %v1787_v7  ;;  %v1802_v12 = vld [vmem:[#allocation2 + $0x640] sm:$0xff] }
 0x6cb   : > { %3564 = vmatprep.subr.bf16.mxu1 %v4610_v13  ;;  %3605 = vmatprep.subr.bf16.mxu0 %v4612_v14  ;;  %v1818_v13 = vld [vmem:[#allocation2 + $0x6c0] sm:$0xff]  ;;  %v1803_v14 = vld [vmem:[#allocation2 + $0x648] sm:$0xff] }
 0x6cc   : > { %v4614_v18 = vcombine.high %v1802_v12, %v1818_v13  ;;  %v4613_v26 = vcombine.low %v1802_v12, %v1818_v13  ;;  %v4615_v27 = vcombine.low %v1803_v14, %v1819_v15  ;;  %v1789_v12 = vld [vmem:[#allocation2 + $0x5d8] sm:$0xff] }
 0x6ce   : > { %3565 = vmatpush1.bf16.msra.mxu1 %v4609_v19  ;;  %3606 = vmatpush1.bf16.msra.mxu0 %v4611_v20  ;;  %v4616_v19 = vcombine.high %v1803_v14, %v1819_v15  ;;  %v1834_v20 = vld [vmem:[#allocation2 + $0x740] sm:$0xff] }
 0x6cf   : > { %3566 = vmatprep.subr.bf16.mxu1 %v4642_v21  ;;  %3607 = vmatprep.subr.bf16.mxu0 %v4644_v24  ;;  %v1850_v21 = vld [vmem:[#allocation2 + $0x7c0] sm:$0xff]  ;;  %v1835_v24 = vld [vmem:[#allocation2 + $0x748] sm:$0xff] }
 0x6d0   : > { %v4646_v28 = vcombine.high %v1834_v20, %v1850_v21  ;;  %v4645_v34 = vcombine.low %v1834_v20, %v1850_v21  ;;  %v4647_v35 = vcombine.low %v1835_v24, %v1851_v25  ;;  %v1821_v20 = vld [vmem:[#allocation2 + $0x6d8] sm:$0xff] }
 0x6d2   : > { %3567 = vmatpush1.bf16.msra.mxu1 %v4641_v29  ;;  %3608 = vmatpush1.bf16.msra.mxu0 %v4643_v30  ;;  %v4648_v29 = vcombine.high %v1835_v24, %v1851_v25  ;;  %v1612_v30 = vld [vmem:[#allocation2 + $0x50] sm:$0xff] }
 0x6d3   : > { %3634 = vmatprep.subr.bf16.mxu1 %v4422_v31  ;;  %3675 = vmatprep.subr.bf16.mxu0 %v4424_v32  ;;  %v1628_v31 = vld [vmem:[#allocation2 + $0xd0] sm:$0xff]  ;;  %v1613_v32 = vld [vmem:[#allocation2 + $0x58] sm:$0xff] }
 0x6d4   : > { %v4426_v36 = vcombine.high %v1612_v30, %v1628_v31  ;;  %v4425_v42 = vcombine.low %v1612_v30, %v1628_v31  ;;  %v4427_v43 = vcombine.low %v1613_v32, %v1629_v33  ;;  %v1853_v30 = vld [vmem:[#allocation2 + $0x7d8] sm:$0xff] }
 0x6d5   : > { %3585 = vmatmul.mubr.bf16.vlgmr.msra.gmra.mrb[24].mxu1 %v5407_v23  ;;  %3626 = vmatmul.mubr.bf16.vlgmr.msra.gmra.mrb[32].mxu0 %v5407_v23 }
 0x6d6   : > { %3635 = vmatpush1.bf16.msra.mxu1 %v4421_v37  ;;  %3676 = vmatpush1.bf16.msra.mxu0 %v4423_v38  ;;  %v4428_v37 = vcombine.high %v1613_v32, %v1629_v33  ;;  %v1644_v38 = vld [vmem:[#allocation2 + $0x150] sm:$0xff] }
 0x6d7   : > { %3636 = vmatprep.subr.bf16.mxu1 %v4454_v39  ;;  %3677 = vmatprep.subr.bf16.mxu0 %v4456_v40  ;;  %v1660_v39 = vld [vmem:[#allocation2 + $0x1d0] sm:$0xff]  ;;  %v1645_v40 = vld [vmem:[#allocation2 + $0x158] sm:$0xff] }
 0x6d8   : > { %3666 = vmatprep.mubr.bf16.mxu1 %v5002_v22  ;;  %3707 = vmatprep.mubr.bf16.mxu0 %v5002_v22  ;;  %v4458_v44 = vcombine.high %v1644_v38, %v1660_v39  ;;  %v4457_v50 = vcombine.low %v1644_v38, %v1660_v39  ;;  %v4459_v51 = vcombine.low %v1645_v40, %v1661_v41  ;;  %v1631_v38 = vld [vmem:[#allocation2 + $0xe8] sm:$0xff] }
 0x6da   : > { %3637 = vmatpush1.bf16.msra.mxu1 %v4453_v45  ;;  %3678 = vmatpush1.bf16.msra.mxu0 %v4455_v46  ;;  %v4460_v45 = vcombine.high %v1645_v40, %v1661_v41  ;;  %v1676_v46 = vld [vmem:[#allocation2 + $0x250] sm:$0xff] }
 0x6db   : > { %3638 = vmatprep.subr.bf16.mxu1 %v4486_v47  ;;  %3679 = vmatprep.subr.bf16.mxu0 %v4488_v48  ;;  %v1692_v47 = vld [vmem:[#allocation2 + $0x2d0] sm:$0xff]  ;;  %v1677_v48 = vld [vmem:[#allocation2 + $0x258] sm:$0xff] }
 0x6dc   : > { %v4490_v52 = vcombine.high %v1676_v46, %v1692_v47  ;;  %v4489_v59 = vcombine.low %v1676_v46, %v1692_v47  ;;  %v4491_v60 = vcombine.low %v1677_v48, %v1693_v49  ;;  %v1663_v46 = vld [vmem:[#allocation2 + $0x1e8] sm:$0xff] }
 0x6de   : > { %3639 = vmatpush1.bf16.msra.mxu1 %v4485_v53  ;;  %3680 = vmatpush1.bf16.msra.mxu0 %v4487_v54  ;;  %v4492_v53 = vcombine.high %v1677_v48, %v1693_v49  ;;  %v1708_v54 = vld [vmem:[#allocation2 + $0x350] sm:$0xff] }
 0x6df   : > { %3640 = vmatprep.subr.bf16.mxu1 %v4518_v56  ;;  %3681 = vmatprep.subr.bf16.mxu0 %v4520_v57  ;;  %v1724_v56 = vld [vmem:[#allocation2 + $0x3d0] sm:$0xff]  ;;  %v1709_v57 = vld [vmem:[#allocation2 + $0x358] sm:$0xff] }
 0x6e0   : > { %v4522_v61 = vcombine.high %v1708_v54, %v1724_v56  ;;  %v4521_v55 = vcombine.low %v1708_v54, %v1724_v56  ;;  %v4523_v6 = vcombine.low %v1709_v57, %v1725_v58  ;;  %v1695_v54 = vld [vmem:[#allocation2 + $0x2e8] sm:$0xff] }
 0x6e2   : > { %3641 = vmatpush1.bf16.msra.mxu1 %v4517_v0  ;;  %3682 = vmatpush1.bf16.msra.mxu0 %v4519_v1  ;;  %v4524_v0 = vcombine.high %v1709_v57, %v1725_v58  ;;  %v1740_v1 = vld [vmem:[#allocation2 + $0x450] sm:$0xff] }
 0x6e3   : > { %3642 = vmatprep.subr.bf16.mxu1 %v4550_v3  ;;  %3683 = vmatprep.subr.bf16.mxu0 %v4552_v4  ;;  %v1756_v3 = vld [vmem:[#allocation2 + $0x4d0] sm:$0xff]  ;;  %v1741_v4 = vld [vmem:[#allocation2 + $0x458] sm:$0xff] }
 0x6e4   : > { %v4554_v7 = vcombine.high %v1740_v1, %v1756_v3  ;;  %v4553_v13 = vcombine.low %v1740_v1, %v1756_v3  ;;  %v4555_v14 = vcombine.low %v1741_v4, %v1757_v5  ;;  %v1727_v1 = vld [vmem:[#allocation2 + $0x3e8] sm:$0xff] }
 0x6e6   : > { %3643 = vmatpush1.bf16.msra.mxu1 %v4549_v8  ;;  %3684 = vmatpush1.bf16.msra.mxu0 %v4551_v9  ;;  %v4556_v8 = vcombine.high %v1741_v4, %v1757_v5  ;;  %v1772_v9 = vld [vmem:[#allocation2 + $0x550] sm:$0xff] }
 0x6e7   : > { %3644 = vmatprep.subr.bf16.mxu1 %v4582_v10  ;;  %3685 = vmatprep.subr.bf16.mxu0 %v4584_v11  ;;  %v1788_v10 = vld [vmem:[#allocation2 + $0x5d0] sm:$0xff]  ;;  %v1773_v11 = vld [vmem:[#allocation2 + $0x558] sm:$0xff] }
 0x6e8   : > { %v4586_v15 = vcombine.high %v1772_v9, %v1788_v10  ;;  %v4585_v21 = vcombine.low %v1772_v9, %v1788_v10  ;;  %v4587_v24 = vcombine.low %v1773_v11, %v1789_v12  ;;  %v1759_v9 = vld [vmem:[#allocation2 + $0x4e8] sm:$0xff] }
 0x6ea   : > { %3645 = vmatpush1.bf16.msra.mxu1 %v4581_v16  ;;  %3686 = vmatpush1.bf16.msra.mxu0 %v4583_v17  ;;  %v4588_v16 = vcombine.high %v1773_v11, %v1789_v12  ;;  %v1804_v17 = vld [vmem:[#allocation2 + $0x650] sm:$0xff] }
 0x6eb   : > { %3646 = vmatprep.subr.bf16.mxu1 %v4614_v18  ;;  %3687 = vmatprep.subr.bf16.mxu0 %v4616_v19  ;;  %v1820_v18 = vld [vmem:[#allocation2 + $0x6d0] sm:$0xff]  ;;  %v1805_v19 = vld [vmem:[#allocation2 + $0x658] sm:$0xff] }
 0x6ec   : > { %v4618_v25 = vcombine.high %v1804_v17, %v1820_v18  ;;  %v4617_v31 = vcombine.low %v1804_v17, %v1820_v18  ;;  %v4619_v32 = vcombine.low %v1805_v19, %v1821_v20  ;;  %v1791_v17 = vld [vmem:[#allocation2 + $0x5e8] sm:$0xff] }
 0x6ee   : > { %3647 = vmatpush1.bf16.msra.mxu1 %v4613_v26  ;;  %3688 = vmatpush1.bf16.msra.mxu0 %v4615_v27  ;;  %v4620_v26 = vcombine.high %v1805_v19, %v1821_v20  ;;  %v1836_v27 = vld [vmem:[#allocation2 + $0x750] sm:$0xff] }
 0x6ef   : > { %3648 = vmatprep.subr.bf16.mxu1 %v4646_v28  ;;  %3689 = vmatprep.subr.bf16.mxu0 %v4648_v29  ;;  %v1852_v28 = vld [vmem:[#allocation2 + $0x7d0] sm:$0xff]  ;;  %v1837_v29 = vld [vmem:[#allocation2 + $0x758] sm:$0xff] }
 0x6f0   : > { %v4650_v33 = vcombine.high %v1836_v27, %v1852_v28  ;;  %v4649_v39 = vcombine.low %v1836_v27, %v1852_v28  ;;  %v4651_v40 = vcombine.low %v1837_v29, %v1853_v30  ;;  %v1823_v27 = vld [vmem:[#allocation2 + $0x6e8] sm:$0xff] }
 0x6f2   : > { %3649 = vmatpush1.bf16.msra.mxu1 %v4645_v34  ;;  %3690 = vmatpush1.bf16.msra.mxu0 %v4647_v35  ;;  %v4652_v34 = vcombine.high %v1837_v29, %v1853_v30  ;;  %v1614_v35 = vld [vmem:[#allocation2 + $0x60] sm:$0xff] }
 0x6f3   : > { %3716 = vmatprep.subr.bf16.mxu1 %v4426_v36  ;;  %3757 = vmatprep.subr.bf16.mxu0 %v4428_v37  ;;  %v1630_v36 = vld [vmem:[#allocation2 + $0xe0] sm:$0xff]  ;;  %v1615_v37 = vld [vmem:[#allocation2 + $0x68] sm:$0xff] }
 0x6f4   : > { %v4430_v41 = vcombine.high %v1614_v35, %v1630_v36  ;;  %v4429_v47 = vcombine.low %v1614_v35, %v1630_v36  ;;  %v4431_v48 = vcombine.low %v1615_v37, %v1631_v38  ;;  %v1855_v35 = vld [vmem:[#allocation2 + $0x7e8] sm:$0xff] }
 0x6f5   : > { %3667 = vmatmul.mubr.bf16.vlgmr.msra.gmra.mrb[28].mxu1 %v5407_v23  ;;  %3708 = vmatmul.mubr.bf16.vlgmr.msra.gmra.mrb[36].mxu0 %v5407_v23 }
 0x6f6   : > { %3717 = vmatpush1.bf16.msra.mxu1 %v4425_v42  ;;  %3758 = vmatpush1.bf16.msra.mxu0 %v4427_v43  ;;  %v4432_v42 = vcombine.high %v1615_v37, %v1631_v38  ;;  %v1646_v43 = vld [vmem:[#allocation2 + $0x160] sm:$0xff] }
 0x6f7   : > { %3718 = vmatprep.subr.bf16.mxu1 %v4458_v44  ;;  %3759 = vmatprep.subr.bf16.mxu0 %v4460_v45  ;;  %v1662_v44 = vld [vmem:[#allocation2 + $0x1e0] sm:$0xff]  ;;  %v1647_v45 = vld [vmem:[#allocation2 + $0x168] sm:$0xff] }
 0x6f8   : > { %3748 = vmatprep.mubr.bf16.mxu1 %v5002_v22  ;;  %3789 = vmatprep.mubr.bf16.mxu0 %v5002_v22  ;;  %v4462_v49 = vcombine.high %v1646_v43, %v1662_v44  ;;  %v4461_v56 = vcombine.low %v1646_v43, %v1662_v44  ;;  %v4463_v57 = vcombine.low %v1647_v45, %v1663_v46  ;;  %v1633_v43 = vld [vmem:[#allocation2 + $0xf8] sm:$0xff] }
 0x6fa   : > { %3719 = vmatpush1.bf16.msra.mxu1 %v4457_v50  ;;  %3760 = vmatpush1.bf16.msra.mxu0 %v4459_v51  ;;  %v4464_v50 = vcombine.high %v1647_v45, %v1663_v46  ;;  %v1678_v51 = vld [vmem:[#allocation2 + $0x260] sm:$0xff] }
 0x6fb   : > { %3720 = vmatprep.subr.bf16.mxu1 %v4490_v52  ;;  %3761 = vmatprep.subr.bf16.mxu0 %v4492_v53  ;;  %v1694_v52 = vld [vmem:[#allocation2 + $0x2e0] sm:$0xff]  ;;  %v1679_v53 = vld [vmem:[#allocation2 + $0x268] sm:$0xff] }
 0x6fc   : > { %v4494_v58 = vcombine.high %v1678_v51, %v1694_v52  ;;  %v4493_v3 = vcombine.low %v1678_v51, %v1694_v52  ;;  %v4495_v4 = vcombine.low %v1679_v53, %v1695_v54  ;;  %v1665_v51 = vld [vmem:[#allocation2 + $0x1f8] sm:$0xff] }
 0x6fe   : > { %3721 = vmatpush1.bf16.msra.mxu1 %v4489_v59  ;;  %3762 = vmatpush1.bf16.msra.mxu0 %v4491_v60  ;;  %v4496_v59 = vcombine.high %v1679_v53, %v1695_v54  ;;  %v1710_v60 = vld [vmem:[#allocation2 + $0x360] sm:$0xff] }
 0x6ff   : > { %3722 = vmatprep.subr.bf16.mxu1 %v4522_v61  ;;  %3763 = vmatprep.subr.bf16.mxu0 %v4524_v0  ;;  %v1726_v61 = vld [vmem:[#allocation2 + $0x3e0] sm:$0xff]  ;;  %v1711_v0 = vld [vmem:[#allocation2 + $0x368] sm:$0xff] }
 0x700   : > { %v4526_v5 = vcombine.high %v1710_v60, %v1726_v61  ;;  %v4525_v10 = vcombine.low %v1710_v60, %v1726_v61  ;;  %v4527_v11 = vcombine.low %v1711_v0, %v1727_v1  ;;  %v1697_v60 = vld [vmem:[#allocation2 + $0x2f8] sm:$0xff] }
 0x702   : > { %3723 = vmatpush1.bf16.msra.mxu1 %v4521_v55  ;;  %3764 = vmatpush1.bf16.msra.mxu0 %v4523_v6  ;;  %v4528_v55 = vcombine.high %v1711_v0, %v1727_v1  ;;  %v1742_v6 = vld [vmem:[#allocation2 + $0x460] sm:$0xff] }
 0x703   : > { %3724 = vmatprep.subr.bf16.mxu1 %v4554_v7  ;;  %3765 = vmatprep.subr.bf16.mxu0 %v4556_v8  ;;  %v1758_v7 = vld [vmem:[#allocation2 + $0x4e0] sm:$0xff]  ;;  %v1743_v8 = vld [vmem:[#allocation2 + $0x468] sm:$0xff] }
 0x704   : > { %v4558_v12 = vcombine.high %v1742_v6, %v1758_v7  ;;  %v4557_v18 = vcombine.low %v1742_v6, %v1758_v7  ;;  %v4559_v19 = vcombine.low %v1743_v8, %v1759_v9  ;;  %v1729_v6 = vld [vmem:[#allocation2 + $0x3f8] sm:$0xff] }
 0x706   : > { %3725 = vmatpush1.bf16.msra.mxu1 %v4553_v13  ;;  %3766 = vmatpush1.bf16.msra.mxu0 %v4555_v14  ;;  %v4560_v13 = vcombine.high %v1743_v8, %v1759_v9  ;;  %v1774_v14 = vld [vmem:[#allocation2 + $0x560] sm:$0xff] }
 0x707   : > { %3726 = vmatprep.subr.bf16.mxu1 %v4586_v15  ;;  %3767 = vmatprep.subr.bf16.mxu0 %v4588_v16  ;;  %v1790_v15 = vld [vmem:[#allocation2 + $0x5e0] sm:$0xff]  ;;  %v1775_v16 = vld [vmem:[#allocation2 + $0x568] sm:$0xff] }
 0x708   : > { %v4590_v20 = vcombine.high %v1774_v14, %v1790_v15  ;;  %v4589_v28 = vcombine.low %v1774_v14, %v1790_v15  ;;  %v4591_v29 = vcombine.low %v1775_v16, %v1791_v17  ;;  %v1761_v14 = vld [vmem:[#allocation2 + $0x4f8] sm:$0xff] }
 0x70a   : > { %3727 = vmatpush1.bf16.msra.mxu1 %v4585_v21  ;;  %3768 = vmatpush1.bf16.msra.mxu0 %v4587_v24  ;;  %v4592_v21 = vcombine.high %v1775_v16, %v1791_v17  ;;  %v1806_v24 = vld [vmem:[#allocation2 + $0x660] sm:$0xff] }
 0x70b   : > { %3728 = vmatprep.subr.bf16.mxu1 %v4618_v25  ;;  %3769 = vmatprep.subr.bf16.mxu0 %v4620_v26  ;;  %v1822_v25 = vld [vmem:[#allocation2 + $0x6e0] sm:$0xff]  ;;  %v1807_v26 = vld [vmem:[#allocation2 + $0x668] sm:$0xff] }
 0x70c   : > { %v4622_v30 = vcombine.high %v1806_v24, %v1822_v25  ;;  %v4621_v36 = vcombine.low %v1806_v24, %v1822_v25  ;;  %v4623_v37 = vcombine.low %v1807_v26, %v1823_v27  ;;  %v5438_v24 = vsub.s32 2, %v5378_v62 }
 0x70e   : > { %3729 = vmatpush1.bf16.msra.mxu1 %v4617_v31  ;;  %3770 = vmatpush1.bf16.msra.mxu0 %v4619_v32  ;;  %v4624_v31 = vcombine.high %v1807_v26, %v1823_v27  ;;  %v1838_v32 = vld [vmem:[#allocation2 + $0x760] sm:$0xff] }
 0x70f   : > { %3730 = vmatprep.subr.bf16.mxu1 %v4650_v33  ;;  %3771 = vmatprep.subr.bf16.mxu0 %v4652_v34  ;;  %v1854_v33 = vld [vmem:[#allocation2 + $0x7e0] sm:$0xff]  ;;  %v1839_v34 = vld [vmem:[#allocation2 + $0x768] sm:$0xff] }
 0x710   : > { %v4654_v38 = vcombine.high %v1838_v32, %v1854_v33  ;;  %v4653_v44 = vcombine.low %v1838_v32, %v1854_v33  ;;  %v4655_v45 = vcombine.low %v1839_v34, %v1855_v35  ;;  %v5443_v27 = vld [vmem:[%s5566_s15] sm:$0xff]  ;;  %v1808_v33 = vld [vmem:[#allocation2 + $0x670] sm:$0xff] }
 0x712   : > { %3731 = vmatpush1.bf16.msra.mxu1 %v4649_v39  ;;  %3772 = vmatpush1.bf16.msra.mxu0 %v4651_v40  ;;  %v4656_v39 = vcombine.high %v1839_v34, %v1855_v35  ;;  %v1616_v40 = vld [vmem:[#allocation2 + $0x70] sm:$0xff]  ;;  %v1809_v35 = vld [vmem:[#allocation2 + $0x678] sm:$0xff] }
 0x713   : > { %3798 = vmatprep.subr.bf16.mxu1 %v4430_v41  ;;  %3839 = vmatprep.subr.bf16.mxu0 %v4432_v42  ;;  %v1632_v41 = vld [vmem:[#allocation2 + $0xf0] sm:$0xff]  ;;  %v1617_v42 = vld [vmem:[#allocation2 + $0x78] sm:$0xff] }
 0x714   : > { %v4434_v46 = vcombine.high %v1616_v40, %v1632_v41  ;;  %v4433_v52 = vcombine.low %v1616_v40, %v1632_v41  ;;  %v4435_v53 = vcombine.low %v1617_v42, %v1633_v43  ;;  %v1824_v34 = vld [vmem:[#allocation2 + $0x6f0] sm:$0xff]  ;;  %v1873_v41 = vrot.slane %v5443_v27, %v5387_v2 }
 0x715   : > { %3749 = vmatmul.mubr.bf16.vlgmr.msra.gmra.mrb[32].mxu1 %v5407_v23  ;;  %3790 = vmatmul.mubr.bf16.vlgmr.msra.gmra.mrb[40].mxu0 %v5407_v23 }
 0x716   : > { %3799 = vmatpush1.bf16.msra.mxu1 %v4429_v47  ;;  %3840 = vmatpush1.bf16.msra.mxu0 %v4431_v48  ;;  %v4436_v47 = vcombine.high %v1617_v42, %v1633_v43  ;;  %v1648_v48 = vld [vmem:[#allocation2 + $0x170] sm:$0xff] }
 0x717   : > { %3800 = vmatprep.subr.bf16.mxu1 %v4462_v49  ;;  %3841 = vmatprep.subr.bf16.mxu0 %v4464_v50  ;;  %v1664_v49 = vld [vmem:[#allocation2 + $0x1f0] sm:$0xff]  ;;  %v1649_v50 = vld [vmem:[#allocation2 + $0x178] sm:$0xff] }
 0x718   : > { %3830 = vmatprep.mubr.bf16.mxu1 %v5002_v22  ;;  %3871 = vmatprep.mubr.bf16.mxu0 %v5002_v22  ;;  %v4466_v54 = vcombine.high %v1648_v48, %v1664_v49  ;;  %v4465_v61 = vcombine.low %v1648_v48, %v1664_v49  ;;  %v4467_v0 = vcombine.low %v1649_v50, %v1665_v51  ;;  %v1856_v49 = vld [vmem:[#allocation2 + $0x7f0] sm:$0xff] }
 0x71a   : > { %3801 = vmatpush1.bf16.msra.mxu1 %v4461_v56  ;;  %3842 = vmatpush1.bf16.msra.mxu0 %v4463_v57  ;;  %v4468_v56 = vcombine.high %v1649_v50, %v1665_v51  ;;  %v1680_v57 = vld [vmem:[#allocation2 + $0x270] sm:$0xff]  ;;  %v1841_v50 = vld [vmem:[#allocation2 + $0x778] sm:$0xff] }
 0x71b   : > { %3802 = vmatprep.subr.bf16.mxu1 %v4494_v58  ;;  %3843 = vmatprep.subr.bf16.mxu0 %v4496_v59  ;;  %v1696_v58 = vld [vmem:[#allocation2 + $0x2f0] sm:$0xff]  ;;  %v1681_v59 = vld [vmem:[#allocation2 + $0x278] sm:$0xff] }
 0x71c   : > { %v4498_v1 = vcombine.high %v1680_v57, %v1696_v58  ;;  %v4497_v7 = vcombine.low %v1680_v57, %v1696_v58  ;;  %v4499_v8 = vcombine.low %v1681_v59, %v1697_v60  ;;  %v1857_v51 = vld [vmem:[#allocation2 + $0x7f8] sm:$0xff]  ;;  %v4625_v57 = vcombine.low %v1808_v33, %v1824_v34 }
 0x71e   : > { %3803 = vmatpush1.bf16.msra.mxu1 %v4493_v3  ;;  %3844 = vmatpush1.bf16.msra.mxu0 %v4495_v4  ;;  %v4500_v3 = vcombine.high %v1681_v59, %v1697_v60  ;;  %v1712_v4 = vld [vmem:[#allocation2 + $0x370] sm:$0xff] }
 0x71f   : > { %3804 = vmatprep.subr.bf16.mxu1 %v4526_v5  ;;  %3845 = vmatprep.subr.bf16.mxu0 %v4528_v55  ;;  %v1728_v5 = vld [vmem:[#allocation2 + $0x3f0] sm:$0xff]  ;;  %v1713_v55 = vld [vmem:[#allocation2 + $0x378] sm:$0xff] }
 0x720   : > { %v4530_v9 = vcombine.high %v1712_v4, %v1728_v5  ;;  %v4529_v15 = vcombine.low %v1712_v4, %v1728_v5  ;;  %v4531_v16 = vcombine.low %v1713_v55, %v1729_v6 }
 0x722   : > { %3805 = vmatpush1.bf16.msra.mxu1 %v4525_v10  ;;  %3846 = vmatpush1.bf16.msra.mxu0 %v4527_v11  ;;  %v4532_v10 = vcombine.high %v1713_v55, %v1729_v6  ;;  %v1744_v11 = vld [vmem:[#allocation2 + $0x470] sm:$0xff]  ;;  %v4660_v55 = vcombine.high %v1841_v50, %v1857_v51 }
 0x723   : > { %3806 = vmatprep.subr.bf16.mxu1 %v4558_v12  ;;  %3847 = vmatprep.subr.bf16.mxu0 %v4560_v13  ;;  %v1760_v12 = vld [vmem:[#allocation2 + $0x4f0] sm:$0xff]  ;;  %v1745_v13 = vld [vmem:[#allocation2 + $0x478] sm:$0xff] }
 0x724   : > { %v4562_v17 = vcombine.high %v1744_v11, %v1760_v12  ;;  %v4561_v25 = vcombine.low %v1744_v11, %v1760_v12  ;;  %v4563_v26 = vcombine.low %v1745_v13, %v1761_v14  ;;  %v4659_v11 = vcombine.low %v1841_v50, %v1857_v51 }
 0x726   : > { %3807 = vmatpush1.bf16.msra.mxu1 %v4557_v18  ;;  %3848 = vmatpush1.bf16.msra.mxu0 %v4559_v19  ;;  %v1776_v18 = vld [vmem:[#allocation2 + $0x570] sm:$0xff] }
 0x727   : > { %3808 = vmatprep.subr.bf16.mxu1 %v4590_v20  ;;  %3849 = vmatprep.subr.bf16.mxu0 %v4592_v21  ;;  %v1792_v19 = vld [vmem:[#allocation2 + $0x5f0] sm:$0xff]  ;;  %v1777_v20 = vld [vmem:[#allocation2 + $0x578] sm:$0xff] }
 0x728   : > { %v1793_v21 = vld [vmem:[#allocation2 + $0x5f8] sm:$0xff] }
 0x729   : > { %v4596_v32 = vcombine.high %v1777_v20, %v1793_v21  ;;  %v4595_v40 = vcombine.low %v1777_v20, %v1793_v21 }
 0x72a   : > { %3809 = vmatpush1.bf16.msra.mxu1 %v4589_v28  ;;  %3850 = vmatpush1.bf16.msra.mxu0 %v4591_v29  ;;  %v5005_v28 = vmov 1966171168  }
 0x72b   : > { %3810 = vmatprep.subr.bf16.mxu1 %v4622_v30  ;;  %3851 = vmatprep.subr.bf16.mxu0 %v4624_v31  ;;  %v3999_v29 = vunpack.c.l.s4 %v5005_v28  ;;  %v5446_v30 = vsub.s32 3, %v5378_v62  ;;  %v4594_v31 = vcombine.high %v1776_v18, %v1792_v19 }
 0x72d   : > { %v4000_v42 = vunpack.c.0.s8 %v3999_v29  ;;  %v1881_v43 = vrot.slane %v5443_v27, %v5446_v30 }
 0x72e   : > { %3811 = vmatpush1.bf16.msra.mxu1 %v4621_v36  ;;  %3852 = vmatpush1.bf16.msra.mxu0 %v4623_v37  ;;  %v1825_v36 = vld [vmem:[#allocation2 + $0x6f8] sm:$0xff]  ;;  %v1869_v37 = vrot.slane %v5443_v27, %v5381_v63 }
 0x72f   : > { %3812 = vmatprep.subr.bf16.mxu1 %v4654_v38  ;;  %3853 = vmatprep.subr.bf16.mxu0 %v4656_v39  ;;  %v1877_v38 = vrot.slane %v5443_v27, %v5438_v24  ;;  %v4593_v39 = vcombine.low %v1776_v18, %v1792_v19  ;;  %v4627_v58 = vcombine.low %v1809_v35, %v1825_v36 }
 0x730   : > { %v5457_v60 = vsub.s32 %v4000_v42, %v5378_v62  ;;  %v1859_v42 = vld [vmem:[%s5566_s15 + $0x8] sm:$0xff] }
 0x732   : > { %3813 = vmatpush1.bf16.msra.mxu1 %v4653_v44  ;;  %3854 = vmatpush1.bf16.msra.mxu0 %v4655_v45  ;;  %v4626_v44 = vcombine.high %v1808_v33, %v1824_v34  ;;  %v4628_v45 = vcombine.high %v1809_v35, %v1825_v36 }
 0x733   : > { %3880 = vmatprep.subr.bf16.mxu1 %v4434_v46  ;;  %3921 = vmatprep.subr.bf16.mxu0 %v4436_v47  ;;  %v1840_v46 = vld [vmem:[#allocation2 + $0x770] sm:$0xff] }
 0x734   : > { %v4658_v5 = vcombine.high %v1840_v46, %v1856_v49 }
 0x735   : > { %3831 = vmatmul.mubr.bf16.vlgmr.msra.gmra.mrb[36].mxu1 %v5407_v23  ;;  %3872 = vmatmul.mubr.bf16.vlgmr.msra.gmra.mrb[44].mxu0 %v5407_v23 }
 0x736   : > { %3881 = vmatpush1.bf16.msra.mxu1 %v4433_v52  ;;  %3922 = vmatpush1.bf16.msra.mxu0 %v4435_v53 }
 0x737   : > { %3882 = vmatprep.subr.bf16.mxu1 %v4466_v54  ;;  %3923 = vmatprep.subr.bf16.mxu0 %v4468_v56 }
 0x738   : > { %3912 = vmatprep.mubr.bf16.mxu1 %v5002_v22  ;;  %3953 = vmatprep.mubr.bf16.mxu0 %v5002_v22  ;;  %v4564_v22 = vcombine.high %v1745_v13, %v1761_v14  ;;  %v5464_v13 = vsub.s32 4, %v5378_v62  ;;  %v5467_v14 = vsub.s32 6, %v5378_v62 }
 0x73a   : > { %3883 = vmatpush1.bf16.msra.mxu1 %v4465_v61  ;;  %3924 = vmatpush1.bf16.msra.mxu0 %v4467_v0 }
 0x73b   : > { %3884 = vmatprep.subr.bf16.mxu1 %v4498_v1  ;;  %3925 = vmatprep.subr.bf16.mxu0 %v4500_v3 }
 0x73e   : > { %3885 = vmatpush1.bf16.msra.mxu1 %v4497_v7  ;;  %3926 = vmatpush1.bf16.msra.mxu0 %v4499_v8  ;;  %v4657_v8 = vcombine.low %v1840_v46, %v1856_v49  ;;  %v1913_v46 = vrot.slane %v1859_v42, %v5446_v30 }
 0x73f   : > { %3886 = vmatprep.subr.bf16.mxu1 %v4530_v9  ;;  %3927 = vmatprep.subr.bf16.mxu0 %v4532_v10 }
 0x742   : > { %3887 = vmatpush1.bf16.msra.mxu1 %v4529_v15  ;;  %3928 = vmatpush1.bf16.msra.mxu0 %v4531_v16  ;;  %v5470_v15 = vsub.s32 5, %v5378_v62  ;;  %v5473_v16 = vsub.s32 7, %v5378_v62 }
 0x743   : > { %3888 = vmatprep.subr.bf16.mxu1 %v4562_v17  ;;  %3929 = vmatprep.subr.bf16.mxu0 %v4564_v22  ;;  %v1885_v17 = vrot.slane %v5443_v27, %v5464_v13  ;;  %v1893_v22 = vrot.slane %v5443_v27, %v5467_v14 }
 0x744   : > { %v1897_v18 = vrot.slane %v5443_v27, %v5473_v16 }
 0x746   : > { %3889 = vmatpush1.bf16.msra.mxu1 %v4561_v25  ;;  %3930 = vmatpush1.bf16.msra.mxu0 %v4563_v26 }
 0x747   : > { %3890 = vmatprep.subr.bf16.mxu1 %v4594_v31  ;;  %3931 = vmatprep.subr.bf16.mxu0 %v4596_v32 }
 0x748   : > { %v3340_v47 = vpop.f32.mrb[12].mxu1  ;;  %v3381_v48 = vpop.f32.mrb[20].mxu0 }
 0x749   : > { %v3341_v52 = vadd.f32 %v3340_v47, %v1869_v37  ;;  %v3382_v53 = vadd.f32 %v3381_v48, %v1877_v38  ;;  %v3342_v54 = vpop.f32.mrb[13].mxu1  ;;  %v3383_v56 = vpop.f32.mrb[21].mxu0 }
 0x74a   : > { %v3343_v59 = vadd.f32 %v3342_v54, %v1873_v41  ;;  %v3384_v61 = vadd.f32 %v3383_v56, %v1881_v43  ;;  %3891 = vmatpush1.bf16.msra.mxu1 %v4593_v39  ;;  %3932 = vmatpush1.bf16.msra.mxu0 %v4595_v40  ;;  %v3344_v0 = vpop.f32.mrb[14].mxu1  ;;  %v3385_v1 = vpop.f32.mrb[22].mxu0  ;;  %v1901_v43 = vrot.slane %v1859_v42, %v5381_v63 }
 0x74b   : > { %v3345_v3 = vpop.f32.mrb[15].mxu1  ;;  %v3386_v4 = vpop.f32.mrb[23].mxu0  ;;  %3892 = vmatprep.subr.bf16.mxu1 %v4626_v44  ;;  %3933 = vmatprep.subr.bf16.mxu0 %v4628_v45  ;;  %v1909_v44 = vrot.slane %v1859_v42, %v5438_v24  ;;  %v1905_v45 = vrot.slane %v1859_v42, %v5387_v2 }
 0x74c   : > { %v3994_v6 = vcombine.low %v3341_v52, %v3343_v59  ;;  %v3995_v7 = vcombine.low %v3382_v53, %v3384_v61 }
 0x74e   : > { %v4004_v9 = vrot.slane %v3994_v6, %v5457_v60  ;;  %v4011_v10 = vrot.slane %v3995_v7, %v5457_v60  ;;  %3893 = vmatpush1.bf16.msra.mxu1 %v4625_v57  ;;  %3934 = vmatpush1.bf16.msra.mxu0 %v4627_v58  ;;  %v1921_v6 = vrot.slane %v1859_v42, %v5470_v15 }
 0x74f   : > { %3894 = vmatprep.subr.bf16.mxu1 %v4658_v5  ;;  %3935 = vmatprep.subr.bf16.mxu0 %v4660_v55  ;;  %v1917_v5 = vrot.slane %v1859_v42, %v5464_v13  ;;  %v1925_v55 = vrot.slane %v1859_v42, %v5467_v14  ;;  %v1929_v7 = vrot.slane %v1859_v42, %v5473_v16 }
 0x750   : > { %v4026_v12 = vcombine.low %v4004_v9, %v4011_v10 }
 0x752   : > { %3895 = vmatpush1.bf16.msra.mxu1 %v4657_v8  ;;  %3936 = vmatpush1.bf16.msra.mxu0 %v4659_v11  ;;  %v4034_v39 = vrot.slane %v4026_v12, %v5457_v60 }
 0x755   : > { %3913 = vmatmul.mubr.bf16.vlgmr.msra.gmra.mrb[40].mxu1 %v5407_v23  ;;  %3954 = vmatmul.mubr.bf16.vlgmr.msra.gmra.mrb[48].mxu0 %v5407_v23  ;;  %v1889_v23 = vrot.slane %v5443_v27, %v5470_v15 }
 0x768   : > { %v3422_v19 = vpop.f32.mrb[16].mxu1  ;;  %v3463_v20 = vpop.f32.mrb[24].mxu0 }
 0x769   : > { %v3423_v21 = vadd.f32 %v3422_v19, %v1885_v17  ;;  %v3464_v25 = vadd.f32 %v3463_v20, %v1893_v22  ;;  %v3424_v26 = vpop.f32.mrb[17].mxu1  ;;  %v3465_v62 = vpop.f32.mrb[25].mxu0 }
 0x76a   : > { %v3425_v28 = vadd.f32 %v3424_v26, %v1889_v23  ;;  %v3466_v29 = vadd.f32 %v3465_v62, %v1897_v18  ;;  %v3426_v31 = vpop.f32.mrb[18].mxu1  ;;  %v3467_v32 = vpop.f32.mrb[26].mxu0 }
 0x76b   : > { %v3427_v33 = vpop.f32.mrb[19].mxu1  ;;  %v3468_v34 = vpop.f32.mrb[27].mxu0 }
 0x76c   : > { %v3996_v35 = vcombine.low %v3423_v21, %v3425_v28  ;;  %v3997_v36 = vcombine.low %v3464_v25, %v3466_v29  ;;  %v1860_v34 = vld [vmem:[%s5566_s15 + $0x10] sm:$0xff] }
 0x76e   : > { %v4018_v37 = vrot.slane %v3996_v35, %v5457_v60  ;;  %v4025_v38 = vrot.slane %v3997_v36, %v5457_v60  ;;  %v1933_v35 = vrot.slane %v1860_v34, %v5381_v63  ;;  %v1941_v36 = vrot.slane %v1860_v34, %v5438_v24 }
 0x770   : > { %v4027_v27 = vcombine.low %v4018_v37, %v4025_v38  ;;  %v1937_v37 = vrot.slane %v1860_v34, %v5387_v2  ;;  %v1945_v38 = vrot.slane %v1860_v34, %v5446_v30 }
 0x772   : > { %v4041_v40 = vrot.slane %v4027_v27, %v5457_v60 }
 0x774   : > { %v4042_v41 = vcombine.low %v4034_v39, %v4041_v40 }
 0x776   : > { %4194 = vst [vmem:[%s5491_s21] sm:$0xff] %v4042_v41 }
 0x788   : > { %v3504_v47 = vpop.f32.mrb[20].mxu1  ;;  %v3545_v48 = vpop.f32.mrb[28].mxu0 }
 0x789   : > { %v3505_v49 = vadd.f32 %v3504_v47, %v1901_v43  ;;  %v3546_v50 = vadd.f32 %v3545_v48, %v1909_v44  ;;  %v3506_v51 = vpop.f32.mrb[21].mxu1  ;;  %v3547_v52 = vpop.f32.mrb[29].mxu0 }
 0x78a   : > { %v3507_v53 = vadd.f32 %v3506_v51, %v1905_v45  ;;  %v3548_v54 = vadd.f32 %v3547_v52, %v1913_v46  ;;  %v3508_v56 = vpop.f32.mrb[22].mxu1  ;;  %v3549_v57 = vpop.f32.mrb[30].mxu0 }
 0x78b   : > { %v3509_v58 = vpop.f32.mrb[23].mxu1  ;;  %v3550_v59 = vpop.f32.mrb[31].mxu0  ;;  %v1949_v56 = vrot.slane %v1860_v34, %v5464_v13  ;;  %v1957_v57 = vrot.slane %v1860_v34, %v5467_v14 }
 0x78c   : > { %v4043_v61 = vcombine.low %v3505_v49, %v3507_v53  ;;  %v4044_v0 = vcombine.low %v3546_v50, %v3548_v54  ;;  %v1953_v58 = vrot.slane %v1860_v34, %v5470_v15  ;;  %v1961_v59 = vrot.slane %v1860_v34, %v5473_v16 }
 0x78e   : > { %v4053_v1 = vrot.slane %v4043_v61, %v5457_v60  ;;  %v4060_v3 = vrot.slane %v4044_v0, %v5457_v60 }
 0x790   : > { %v4075_v4 = vcombine.low %v4053_v1, %v4060_v3 }
 0x792   : > { %v4083_v31 = vrot.slane %v4075_v4, %v5457_v60 }
 0x7a8   : > { %v3586_v8 = vpop.f32.mrb[24].mxu1  ;;  %v3627_v9 = vpop.f32.mrb[32].mxu0 }
 0x7a9   : > { %v3587_v10 = vadd.f32 %v3586_v8, %v1917_v5  ;;  %v3628_v11 = vadd.f32 %v3627_v9, %v1925_v55  ;;  %v3588_v12 = vpop.f32.mrb[25].mxu1  ;;  %v3629_v17 = vpop.f32.mrb[33].mxu0 }
 0x7aa   : > { %v3589_v22 = vadd.f32 %v3588_v12, %v1921_v6  ;;  %v3630_v23 = vadd.f32 %v3629_v17, %v1929_v7  ;;  %v3590_v18 = vpop.f32.mrb[26].mxu1  ;;  %v3631_v19 = vpop.f32.mrb[34].mxu0 }
 0x7ab   : > { %v3591_v20 = vpop.f32.mrb[27].mxu1  ;;  %v3632_v21 = vpop.f32.mrb[35].mxu0 }
 0x7ac   : > { %v4045_v25 = vcombine.low %v3587_v10, %v3589_v22  ;;  %v4046_v26 = vcombine.low %v3628_v11, %v3630_v23  ;;  %v1861_v21 = vld [vmem:[%s5566_s15 + $0x18] sm:$0xff] }
 0x7ae   : > { %v4067_v62 = vrot.slane %v4045_v25, %v5457_v60  ;;  %v4074_v28 = vrot.slane %v4046_v26, %v5457_v60  ;;  %v1965_v25 = vrot.slane %v1861_v21, %v5381_v63  ;;  %v1973_v26 = vrot.slane %v1861_v21, %v5438_v24 }
 0x7b0   : > { %v4076_v29 = vcombine.low %v4067_v62, %v4074_v28  ;;  %v1969_v62 = vrot.slane %v1861_v21, %v5387_v2  ;;  %v1977_v28 = vrot.slane %v1861_v21, %v5446_v30  ;;  %v1981_v30 = vrot.slane %v1861_v21, %v5464_v13 }
 0x7b2   : > { %v4090_v32 = vrot.slane %v4076_v29, %v5457_v60 }
 0x7b4   : > { %v4091_v33 = vcombine.low %v4083_v31, %v4090_v32 }
 0x7b6   : > { %4195 = vst [vmem:[%s5491_s21 + $0x8] sm:$0xff] %v4091_v33 }
 0x7c8   : > { %v3668_v27 = vpop.f32.mrb[28].mxu1  ;;  %v3709_v39 = vpop.f32.mrb[36].mxu0 }
 0x7c9   : > { %v3669_v40 = vadd.f32 %v3668_v27, %v1933_v35  ;;  %v3710_v41 = vadd.f32 %v3709_v39, %v1941_v36  ;;  %v3670_v42 = vpop.f32.mrb[29].mxu1  ;;  %v3711_v43 = vpop.f32.mrb[37].mxu0 }
 0x7ca   : > { %v3671_v44 = vadd.f32 %v3670_v42, %v1937_v37  ;;  %v3712_v45 = vadd.f32 %v3711_v43, %v1945_v38  ;;  %v3672_v46 = vpop.f32.mrb[30].mxu1  ;;  %v3713_v47 = vpop.f32.mrb[38].mxu0  ;;  %v1989_v43 = vrot.slane %v1861_v21, %v5467_v14 }
 0x7cb   : > { %v3673_v48 = vpop.f32.mrb[31].mxu1  ;;  %v3714_v49 = vpop.f32.mrb[39].mxu0 }
 0x7cc   : > { %v4092_v50 = vcombine.low %v3669_v40, %v3671_v44  ;;  %v4093_v51 = vcombine.low %v3710_v41, %v3712_v45  ;;  %v1985_v44 = vrot.slane %v1861_v21, %v5470_v15  ;;  %v1993_v45 = vrot.slane %v1861_v21, %v5473_v16 }
 0x7ce   : > { %v4102_v52 = vrot.slane %v4092_v50, %v5457_v60  ;;  %v4109_v53 = vrot.slane %v4093_v51, %v5457_v60 }
 0x7d0   : > { %v4124_v54 = vcombine.low %v4102_v52, %v4109_v53 }
 0x7d2   : > { %v4132_v18 = vrot.slane %v4124_v54, %v5457_v60 }
 0x7e8   : > { %v3750_v61 = vpop.f32.mrb[32].mxu1  ;;  %v3791_v0 = vpop.f32.mrb[40].mxu0 }
 0x7e9   : > { %v3751_v1 = vadd.f32 %v3750_v61, %v1949_v56  ;;  %v3792_v3 = vadd.f32 %v3791_v0, %v1957_v57  ;;  %v3752_v4 = vpop.f32.mrb[33].mxu1  ;;  %v3793_v5 = vpop.f32.mrb[41].mxu0 }
 0x7ea   : > { %v3753_v55 = vadd.f32 %v3752_v4, %v1953_v58  ;;  %v3794_v6 = vadd.f32 %v3793_v5, %v1961_v59  ;;  %v3754_v7 = vpop.f32.mrb[34].mxu1  ;;  %v3795_v8 = vpop.f32.mrb[42].mxu0 }
 0x7eb   : > { %v3755_v9 = vpop.f32.mrb[35].mxu1  ;;  %v3796_v10 = vpop.f32.mrb[43].mxu0 }
 0x7ec   : > { %v4094_v11 = vcombine.low %v3751_v1, %v3753_v55  ;;  %v4095_v12 = vcombine.low %v3792_v3, %v3794_v6 }
 0x7ee   : > { %v4116_v17 = vrot.slane %v4094_v11, %v5457_v60  ;;  %v4123_v22 = vrot.slane %v4095_v12, %v5457_v60 }
 0x7f0   : > { %v4125_v23 = vcombine.low %v4116_v17, %v4123_v22 }
 0x7f2   : > { %v4139_v19 = vrot.slane %v4125_v23, %v5457_v60 }
 0x7f4   : > { %v4140_v20 = vcombine.low %v4132_v18, %v4139_v19 }
 0x7f6   : > { %4196 = vst [vmem:[%s5491_s21 + $0x10] sm:$0xff] %v4140_v20 }
 0x808   : > { %v3832_v29 = vpop.f32.mrb[36].mxu1  ;;  %v3873_v31 = vpop.f32.mrb[44].mxu0 }
 0x809   : > { %v3833_v32 = vadd.f32 %v3832_v29, %v1965_v25  ;;  %v3874_v33 = vadd.f32 %v3873_v31, %v1973_v26  ;;  %v3834_v34 = vpop.f32.mrb[37].mxu1  ;;  %v3875_v35 = vpop.f32.mrb[45].mxu0 }
 0x80a   : > { %v3835_v36 = vadd.f32 %v3834_v34, %v1969_v62  ;;  %v3876_v37 = vadd.f32 %v3875_v35, %v1977_v28  ;;  %v3836_v38 = vpop.f32.mrb[38].mxu1  ;;  %v3877_v27 = vpop.f32.mrb[46].mxu0 }
 0x80b   : > { %v3837_v39 = vpop.f32.mrb[39].mxu1  ;;  %v3878_v40 = vpop.f32.mrb[47].mxu0 }
 0x80c   : > { %v4141_v41 = vcombine.low %v3833_v32, %v3835_v36  ;;  %v4142_v63 = vcombine.low %v3874_v33, %v3876_v37 }
 0x80e   : > { %v4151_v24 = vrot.slane %v4141_v41, %v5457_v60  ;;  %v4158_v2 = vrot.slane %v4142_v63, %v5457_v60 }
 0x810   : > { %v4173_v42 = vcombine.low %v4151_v24, %v4158_v2 }
 0x812   : > { %v4181_v61 = vrot.slane %v4173_v42, %v5457_v60 }
 0x828   : > { %v3914_v46 = vpop.f32.mrb[40].mxu1  ;;  %v3955_v47 = vpop.f32.mrb[48].mxu0 }
 0x829   : > { %v3915_v48 = vadd.f32 %v3914_v46, %v1981_v30  ;;  %v3956_v49 = vadd.f32 %v3955_v47, %v1989_v43  ;;  %v3916_v50 = vpop.f32.mrb[41].mxu1  ;;  %v3957_v51 = vpop.f32.mrb[49].mxu0 }
 0x82a   : > { %v3917_v52 = vadd.f32 %v3916_v50, %v1985_v44  ;;  %v3958_v53 = vadd.f32 %v3957_v51, %v1993_v45  ;;  %v3918_v54 = vpop.f32.mrb[42].mxu1  ;;  %v3959_v56 = vpop.f32.mrb[50].mxu0 }
 0x82b   : > { %v3919_v57 = vpop.f32.mrb[43].mxu1  ;;  %v3960_v58 = vpop.f32.mrb[51].mxu0 }
 0x82c   : > { %v4143_v13 = vcombine.low %v3915_v48, %v3917_v52  ;;  %v4144_v59 = vcombine.low %v3956_v49, %v3958_v53 }
 0x82e   : > { %v4165_v14 = vrot.slane %v4143_v13, %v5457_v60  ;;  %v4172_v15 = vrot.slane %v4144_v59, %v5457_v60 }
 0x830   : > { %v4174_v16 = vcombine.low %v4165_v14, %v4172_v15 }
 0x832   : > { %v4188_v0 = vrot.slane %v4174_v16, %v5457_v60 }
 0x834   : > { %v4189_v1 = vcombine.low %v4181_v61, %v4188_v0 }
 0x836   : > { %4197 = vst [vmem:[%s5491_s21 + $0x18] sm:$0xff] %v4189_v1 }
 0x837 PF: > { %s29_s24 = sadd.s32 1, %s4997_s24  }
 0x838   : > { %p26_p3 = scmp.ge.s32.totalorder %s29_s24, 4  }
 0x83a   :  { %28 = sbr.rel (!%p26_p3) target bundleno = 4 (0x4), region = 134 }
 0x841   :  { %4233 = vsyncpa [#allocation3], 1 }
 0x842   :  { %4235 = vsyncpa [#allocation3 + $0x1], 1 }

</bundles_post_ra>
